<compile_context>
chip_gen: v7x
topology: tpu7x:2x2x1
jax: 0.10.0
libtpu: 0.0.40
codegen_flags: <defaults>
</compile_context>

<pallas_src>
import jax
import jax.numpy as jnp
from jax import lax
from jax.experimental import pallas as pl
from jax.experimental.pallas import tpu as pltpu

# ----------------------------- configuration -----------------------------
B         = 2        # batch
B_PAD     = 8        # batch rows padded to fill all 8 sublanes of the MXU/VPU
C_IN      = 4        # image channels
IMG       = 16       # spatial size (IMG x IMG)
FEAT      = 64       # stand-in for xception's 2048-d pooled feature
EMBED     = 32       # stand-in for embed=1024
HIDDEN    = 32       # stand-in for hidden_size=1024 (embed == hidden, as in module)
LAYERS    = 4        # stand-in for num_layers=64
VOCAB     = 50
VOCAB_PAD = 128      # pad vocab to a full lane width -> unmasked, lane-dense store
SEQ       = 8        # captions.size(1)
HW        = IMG * IMG

assert EMBED == HIDDEN, "module uses embed == hidden (1024/1024)"


# ------------------------- fused forward kernel ---------------------------
def fused_kernel(x_ref, wv_ref, bv_ref, we_ref, be_ref,
                 wih_ref, whh_ref, bih_ref, bhh_ref, wfc_ref, bfc_ref,
                 out_ref, seq_ref, gi_ref):
    l = pl.program_id(0)
    H = HIDDEN

    # ---- l == 0: visual backbone + Encoder + layer-0 input-gate projection ----
    # TODO(synk): the real frozen xception backbone is an external submodule not
    # defined in the provided source; replaced by a pointwise projection + ReLU
    # + global average pool producing FEAT-dim features.
    @pl.when(l == 0)
    def _init():
        x = x_ref[...].reshape(B_PAD * HW, C_IN)             # single 2-D matmul
        y = jnp.dot(x, wv_ref[...], preferred_element_type=jnp.float32) + bv_ref[...]
        y = jnp.maximum(y, 0.0)                              # ReLU
        feats = jnp.mean(y.reshape(B_PAD, HW, FEAT), axis=1)  # global avg pool
        enc = jnp.dot(feats, we_ref[...], preferred_element_type=jnp.float32) + be_ref[...]
        enc = jnp.maximum(enc, 0.0)                          # Encoder: Linear + ReLU
        # Layer 0's decoder input is `enc` at EVERY timestep, so compute its
        # input-gate projection ONCE and broadcast over time (instead of
        # pushing SEQ identical rows through the MXU).
        gi0 = jnp.dot(enc.astype(jnp.bfloat16), wih_ref[...],
                      preferred_element_type=jnp.float32) + bih_ref[...]
        gi_ref[...] = jnp.broadcast_to(
            gi0[None], (SEQ, B_PAD, 3 * H)).reshape(SEQ * B_PAD, 3 * H)

    # ---- l > 0: batched input-gate projection over the whole sequence ----
    @pl.when(l > 0)
    def _proj():
        gi_ref[...] = jnp.dot(seq_ref[...].astype(jnp.bfloat16), wih_ref[...],
                              preferred_element_type=jnp.float32) + bih_ref[...]

    # ---- recurrent loop of this layer over all timesteps (layer-major) ----
    whh = whh_ref[...]                          # bf16, loaded once per layer
    bhh = bhh_ref[...]
    h = jnp.zeros((B_PAD, H), jnp.float32)      # per-layer initial hidden = 0
    hs = []
    # TODO(synk): at real caption lengths (SEQ >= 20) switch this static unroll
    # to lax.fori_loop(..., unroll=True) with pl.ds indexing into gi_ref to
    # bound vreg live ranges.
    for t in range(SEQ):
        gi = gi_ref[t * B_PAD:(t + 1) * B_PAD, :]            # (B_PAD, 3H)
        gh = jnp.dot(h.astype(jnp.bfloat16), whh,
                     preferred_element_type=jnp.float32) + bhh
        # NOTE: at real scale H=1024 these gate slices are 128-lane aligned.
        r = jax.nn.sigmoid(gi[:, 0:H] + gh[:, 0:H])
        z = jax.nn.sigmoid(gi[:, H:2 * H] + gh[:, H:2 * H])
        n = jnp.tanh(gi[:, 2 * H:] + r * gh[:, 2 * H:])
        h = (1.0 - z) * n + z * h
        hs.append(h)
    hs_all = jnp.concatenate(hs, axis=0)        # (SEQ*B_PAD, H), time-major
    seq_ref[...] = hs_all                       # ONE dense store; next layer's input

    # ---- last layer: one vocab projection + ONE fully dense store ----
    @pl.when(l == LAYERS - 1)
    def _final():
        out_ref[...] = jnp.dot(hs_all.astype(jnp.bfloat16), wfc_ref[...],
                               preferred_element_type=jnp.float32) + bfc_ref[...]


def fused_forward(x_pad, kp):
    out_flat = pl.pallas_call(
        fused_kernel,
        out_shape=jax.ShapeDtypeStruct((SEQ * B_PAD, VOCAB_PAD), jnp.float32),
        grid=(LAYERS,),
        in_specs=[
            pl.BlockSpec((B_PAD, HW, C_IN), lambda l: (0, 0, 0)),
            pl.BlockSpec((C_IN, FEAT),      lambda l: (0, 0)),
            pl.BlockSpec((1, FEAT),         lambda l: (0, 0)),
            pl.BlockSpec((FEAT, EMBED),     lambda l: (0, 0)),
            pl.BlockSpec((1, EMBED),        lambda l: (0, 0)),
            # per-layer GRU weight tiles (bf16), indexed by the layer grid axis:
            pl.BlockSpec((None, EMBED, 3 * HIDDEN),  lambda l: (l, 0, 0)),
            pl.BlockSpec((None, HIDDEN, 3 * HIDDEN), lambda l: (l, 0, 0)),
            pl.BlockSpec((None, 1, 3 * HIDDEN),      lambda l: (l, 0, 0)),
            pl.BlockSpec((None, 1, 3 * HIDDEN),      lambda l: (l, 0, 0)),
            pl.BlockSpec((HIDDEN, VOCAB_PAD), lambda l: (0, 0)),
            pl.BlockSpec((1, VOCAB_PAD),      lambda l: (0, 0)),
        ],
        # constant block index along l -> output stays VMEM-resident, written
        # back to HBM once after the last layer.
        out_specs=pl.BlockSpec((SEQ * B_PAD, VOCAB_PAD), lambda l: (0, 0)),
        scratch_shapes=[
            pltpu.VMEM((SEQ * B_PAD, HIDDEN), jnp.float32),      # layer i/o sequence
            pltpu.VMEM((SEQ * B_PAD, 3 * HIDDEN), jnp.float32),  # input-gate projections
        ],
        compiler_params=pltpu.CompilerParams(
            dimension_semantics=("arbitrary",),
        ),
    )(x_pad, kp["wv"], kp["bv"], kp["we"], kp["be"],
      kp["wih"], kp["whh"], kp["bih"], kp["bhh"], kp["wfc"], kp["bfc"])
    # tiny epilogue on an (SEQ*B_PAD, 128) slab: drop padded rows / vocab lanes
    out = out_flat.reshape(SEQ, B_PAD, VOCAB_PAD)[:, :B, :VOCAB]
    return jnp.transpose(out, (1, 0, 2))        # (B, SEQ, VOCAB)


# --------------------------- full model forward ---------------------------
def image_captioning_forward(images_nchw, captions, kparams):
    # glue: NCHW -> (B, H*W, C); pad batch rows to B_PAD so every matmul in the
    # kernel fills all 8 sublanes (padded rows never touch real rows).
    x = jnp.transpose(images_nchw, (0, 2, 3, 1)).reshape(B, HW, C_IN)
    x_pad = jnp.pad(x, ((0, B_PAD - B), (0, 0), (0, 0)))
    output = fused_forward(x_pad, kparams)
    return output, captions


# ------------------------------ parameters --------------------------------
def make_params(key):
    ks = jax.random.split(key, 9)
    s = 0.1
    return {
        "wv":  s * jax.random.normal(ks[0], (C_IN, FEAT), jnp.float32),
        "bv":  s * jax.random.normal(ks[1], (1, FEAT), jnp.float32),
        "we":  s * jax.random.normal(ks[2], (FEAT, EMBED), jnp.float32),
        "be":  s * jax.random.normal(ks[3], (1, EMBED), jnp.float32),
        # GRU weights stored pre-transposed (input, 3*hidden); gate order r,z,n
        "wih": s * jax.random.normal(ks[4], (LAYERS, EMBED, 3 * HIDDEN), jnp.float32),
        "whh": s * jax.random.normal(ks[5], (LAYERS, HIDDEN, 3 * HIDDEN), jnp.float32),
        "bih": s * jax.random.normal(ks[6], (LAYERS, 1, 3 * HIDDEN), jnp.float32),
        "bhh": s * jax.random.normal(ks[7], (LAYERS, 1, 3 * HIDDEN), jnp.float32),
        "wfc": s * jax.random.normal(ks[8], (HIDDEN, VOCAB), jnp.float32),
        "bfc": jnp.zeros((1, VOCAB), jnp.float32),
    }


def prepare_params(p):
    """One-time preparation, hoisted out of the forward call:
    bf16 casts of the streamed GRU / vocab weights + lane-padded vocab proj.
    TODO(synk): int8 weights + per-channel scales on v5e/v6e, fp8 on v7x."""
    kp = dict(p)
    kp["wih"] = p["wih"].astype(jnp.bfloat16)
    kp["whh"] = p["whh"].astype(jnp.bfloat16)
    wfc_pad = jnp.zeros((HIDDEN, VOCAB_PAD), jnp.float32).at[:, :VOCAB].set(p["wfc"])
    kp["wfc"] = wfc_pad.astype(jnp.bfloat16)
    kp["bfc"] = jnp.zeros((1, VOCAB_PAD), jnp.float32).at[:, :VOCAB].set(p["bfc"])
    return kp


# ------------------------- pure-JAX reference -----------------------------
def _bf16_dot(a, w_bf16):
    return jnp.dot(a.astype(jnp.bfloat16), w_bf16, preferred_element_type=jnp.float32)


def reference_forward(images_nchw, rparams, kparams):
    x = jnp.transpose(images_nchw, (0, 2, 3, 1)).reshape(B, HW, C_IN)
    y = jnp.maximum(jnp.einsum("bpc,cf->bpf", x, rparams["wv"]) + rparams["bv"], 0.0)
    feats = jnp.mean(y, axis=1)
    enc = jnp.maximum(feats @ rparams["we"] + rparams["be"], 0.0)
    H = HIDDEN
    h = jnp.zeros((LAYERS, B, H), jnp.float32)
    outs = []
    for _ in range(SEQ):
        inp = enc
        new_h = []
        for l in range(LAYERS):
            hp = h[l]
            gi = _bf16_dot(inp, kparams["wih"][l]) + rparams["bih"][l]
            gh = _bf16_dot(hp, kparams["whh"][l]) + rparams["bhh"][l]
            r = jax.nn.sigmoid(gi[:, :H] + gh[:, :H])
            z = jax.nn.sigmoid(gi[:, H:2 * H] + gh[:, H:2 * H])
            n = jnp.tanh(gi[:, 2 * H:] + r * gh[:, 2 * H:])
            hn = (1.0 - z) * n + z * hp
            new_h.append(hn)
            inp = hn
        h = jnp.stack(new_h)
        outs.append(_bf16_dot(inp, kparams["wfc"])[:, :VOCAB] + rparams["bfc"])
    return jnp.stack(outs, axis=1)               # (B, SEQ, VOCAB)


# --------------------------------- main -----------------------------------
if __name__ == "__main__":
    key = jax.random.PRNGKey(0)
    kp_, ki_, kc_ = jax.random.split(key, 3)
    raw_params = make_params(kp_)
    kparams = prepare_params(raw_params)          # hoisted one-time prep

    images = jax.random.normal(ki_, (B, C_IN, IMG, IMG), jnp.float32)   # NCHW
    captions = jax.random.randint(kc_, (B, SEQ), 0, VOCAB, jnp.int32)

    output, caps_out = image_captioning_forward(images, captions, kparams)
    output = jax.block_until_ready(output)

    ref = reference_forward(images, raw_params, kparams)
    assert output.shape == (B, SEQ, VOCAB), output.shape
    assert jnp.allclose(output, ref, atol=1e-3, rtol=1e-3), "mismatch vs reference"
    assert jnp.array_equal(caps_out, captions)

    print("KERNEL_OK")
</pallas_src>

<mosaic_0001>
module attributes {stable_mosaic.version = 11 : i64} {
  func.func @fused_kernel(%arg0: i32, %arg1: memref<8x256x4xf32, #tpu.memory_space<vmem>>, %arg2: memref<4x64xf32, #tpu.memory_space<vmem>>, %arg3: memref<1x64xf32, #tpu.memory_space<vmem>>, %arg4: memref<64x32xf32, #tpu.memory_space<vmem>>, %arg5: memref<1x32xf32, #tpu.memory_space<vmem>>, %arg6: memref<1x32x96xbf16, #tpu.memory_space<vmem>>, %arg7: memref<1x32x96xbf16, #tpu.memory_space<vmem>>, %arg8: memref<1x1x96xf32, #tpu.memory_space<vmem>>, %arg9: memref<1x1x96xf32, #tpu.memory_space<vmem>>, %arg10: memref<32x128xbf16, #tpu.memory_space<vmem>>, %arg11: memref<1x128xf32, #tpu.memory_space<vmem>>, %arg12: memref<64x128xf32, #tpu.memory_space<vmem>>, %arg13: memref<64x32xf32, #tpu.memory_space<vmem>>, %arg14: memref<64x96xf32, #tpu.memory_space<vmem>>) attributes {dimension_semantics = [#tpu.dimension_semantics<arbitrary>], iteration_bounds = array<i64: 4>, scalar_prefetch = 0 : i64, scratch_operands = 2 : i64, tpu.core_type = #tpu.core_type<tc>, window_params = [{pipeline_mode = #tpu.pipeline_mode<synchronous>, transform_indices = @transform_0, window_bounds = array<i64: 8, 256, 4>}, {pipeline_mode = #tpu.pipeline_mode<synchronous>, transform_indices = @transform_1, window_bounds = array<i64: 4, 64>}, {pipeline_mode = #tpu.pipeline_mode<synchronous>, transform_indices = @transform_2, window_bounds = array<i64: 1, 64>}, {pipeline_mode = #tpu.pipeline_mode<synchronous>, transform_indices = @transform_3, window_bounds = array<i64: 64, 32>}, {pipeline_mode = #tpu.pipeline_mode<synchronous>, transform_indices = @transform_4, window_bounds = array<i64: 1, 32>}, {transform_indices = @transform_5, window_bounds = array<i64: 1, 32, 96>}, {transform_indices = @transform_6, window_bounds = array<i64: 1, 32, 96>}, {transform_indices = @transform_7, window_bounds = array<i64: 1, 1, 96>}, {transform_indices = @transform_8, window_bounds = array<i64: 1, 1, 96>}, {pipeline_mode = #tpu.pipeline_mode<synchronous>, transform_indices = @transform_9, window_bounds = array<i64: 32, 128>}, {pipeline_mode = #tpu.pipeline_mode<synchronous>, transform_indices = @transform_10, window_bounds = array<i64: 1, 128>}, {pipeline_mode = #tpu.pipeline_mode<synchronous>, transform_indices = @transform_11, window_bounds = array<i64: 64, 128>}]} {
    %c0_i32 = arith.constant 0 : i32
    %0 = arith.cmpi eq, %arg0, %c0_i32 : i32
    %1 = arith.extui %0 : i1 to i32
    %c0_i32_0 = arith.constant 0 : i32
    %2 = arith.cmpi ne, %1, %c0_i32_0 : i32
    scf.if %2 {
      %c0_52 = arith.constant 0 : index
      %c0_53 = arith.constant 0 : index
      %c0_54 = arith.constant 0 : index
      %264 = vector.load %arg1[%c0_52, %c0_53, %c0_54] : memref<8x256x4xf32, #tpu.memory_space<vmem>>, vector<8x256x4xf32>
      %265 = vector.shape_cast %264 : vector<8x256x4xf32> to vector<2048x4xf32>
      %c0_55 = arith.constant 0 : index
      %c0_56 = arith.constant 0 : index
      %266 = vector.load %arg2[%c0_55, %c0_56] : memref<4x64xf32, #tpu.memory_space<vmem>>, vector<4x64xf32>
      %cst_57 = arith.constant dense<0.000000e+00> : vector<2048x64xf32>
      %267 = tpu.matmul %265, %266, %cst_57 {dimension_numbers = #tpu.dot_dimension_numbers<[1], [0], [0], [1], [0, 0, 1, 1], [], []>} : vector<2048x4xf32>, vector<4x64xf32>, vector<2048x64xf32> -> vector<2048x64xf32>
      %c0_58 = arith.constant 0 : index
      %c0_59 = arith.constant 0 : index
      %268 = vector.load %arg3[%c0_58, %c0_59] : memref<1x64xf32, #tpu.memory_space<vmem>>, vector<1x64xf32>
      %269 = vector.broadcast %268 : vector<1x64xf32> to vector<2048x64xf32>
      %270 = arith.addf %267, %269 : vector<2048x64xf32>
      %cst_60 = arith.constant 0.000000e+00 : f32
      %271 = vector.broadcast %cst_60 : f32 to vector<2048x64xf32>
      %272 = arith.maximumf %270, %271 : vector<2048x64xf32>
      %273 = vector.shape_cast %272 : vector<2048x64xf32> to vector<8x256x64xf32>
      %cst_61 = arith.constant dense<0.000000e+00> : vector<8x64xf32>
      %274 = vector.multi_reduction <add>, %273, %cst_61 [1] : vector<8x256x64xf32> to vector<8x64xf32>
      %cst_62 = arith.constant 2.560000e+02 : f32
      %275 = vector.broadcast %cst_62 : f32 to vector<8x64xf32>
      %276 = arith.divf %274, %275 : vector<8x64xf32>
      %c0_63 = arith.constant 0 : index
      %c0_64 = arith.constant 0 : index
      %277 = vector.load %arg4[%c0_63, %c0_64] : memref<64x32xf32, #tpu.memory_space<vmem>>, vector<64x32xf32>
      %cst_65 = arith.constant dense<0.000000e+00> : vector<8x32xf32>
      %278 = tpu.matmul %276, %277, %cst_65 {dimension_numbers = #tpu.dot_dimension_numbers<[1], [0], [0], [1], [0, 0, 1, 1], [], []>} : vector<8x64xf32>, vector<64x32xf32>, vector<8x32xf32> -> vector<8x32xf32>
      %c0_66 = arith.constant 0 : index
      %c0_67 = arith.constant 0 : index
      %279 = vector.load %arg5[%c0_66, %c0_67] : memref<1x32xf32, #tpu.memory_space<vmem>>, vector<1x32xf32>
      %280 = vector.broadcast %279 : vector<1x32xf32> to vector<8x32xf32>
      %281 = arith.addf %278, %280 : vector<8x32xf32>
      %cst_68 = arith.constant 0.000000e+00 : f32
      %282 = vector.broadcast %cst_68 : f32 to vector<8x32xf32>
      %283 = arith.maximumf %281, %282 : vector<8x32xf32>
      %284 = arith.truncf %283 : vector<8x32xf32> to vector<8x32xbf16>
      %c0_69 = arith.constant 0 : index
      %c0_70 = arith.constant 0 : index
      %c0_71 = arith.constant 0 : index
      %285 = vector.load %arg6[%c0_69, %c0_70, %c0_71] : memref<1x32x96xbf16, #tpu.memory_space<vmem>>, vector<1x32x96xbf16>
      %286 = vector.shape_cast %285 : vector<1x32x96xbf16> to vector<32x96xbf16>
      %cst_72 = arith.constant dense<0.000000e+00> : vector<8x96xf32>
      %287 = tpu.matmul %284, %286, %cst_72 {dimension_numbers = #tpu.dot_dimension_numbers<[1], [0], [0], [1], [0, 0, 1, 1], [], []>} : vector<8x32xbf16>, vector<32x96xbf16>, vector<8x96xf32> -> vector<8x96xf32>
      %c0_73 = arith.constant 0 : index
      %c0_74 = arith.constant 0 : index
      %c0_75 = arith.constant 0 : index
      %288 = vector.load %arg8[%c0_73, %c0_74, %c0_75] : memref<1x1x96xf32, #tpu.memory_space<vmem>>, vector<1x1x96xf32>
      %289 = vector.shape_cast %288 : vector<1x1x96xf32> to vector<1x96xf32>
      %290 = vector.broadcast %289 : vector<1x96xf32> to vector<8x96xf32>
      %291 = arith.addf %287, %290 : vector<8x96xf32>
      %292 = vector.shape_cast %291 : vector<8x96xf32> to vector<1x8x96xf32>
      %293 = vector.shape_cast %292 : vector<1x8x96xf32> to vector<1x8x96xf32>
      %294 = vector.broadcast %293 : vector<1x8x96xf32> to vector<8x8x96xf32>
      %295 = vector.shape_cast %294 : vector<8x8x96xf32> to vector<64x96xf32>
      %c0_76 = arith.constant 0 : index
      %c0_77 = arith.constant 0 : index
      %296 = vector.load %arg14[%c0_76, %c0_77] : memref<64x96xf32, #tpu.memory_space<vmem>>, vector<64x96xf32>
      tpu.vector_store %arg14[%c0_76, %c0_77], %295 {strides = array<i32>} : memref<64x96xf32, #tpu.memory_space<vmem>>, vector<64x96xf32>,
    } else {
    }
    %c0_i32_1 = arith.constant 0 : i32
    %3 = arith.cmpi sgt, %arg0, %c0_i32_1 : i32
    %4 = arith.extui %3 : i1 to i32
    %c0_i32_2 = arith.constant 0 : i32
    %5 = arith.cmpi ne, %4, %c0_i32_2 : i32
    scf.if %5 {
      %c0_52 = arith.constant 0 : index
      %c0_53 = arith.constant 0 : index
      %264 = vector.load %arg13[%c0_52, %c0_53] : memref<64x32xf32, #tpu.memory_space<vmem>>, vector<64x32xf32>
      %265 = arith.truncf %264 : vector<64x32xf32> to vector<64x32xbf16>
      %c0_54 = arith.constant 0 : index
      %c0_55 = arith.constant 0 : index
      %c0_56 = arith.constant 0 : index
      %266 = vector.load %arg6[%c0_54, %c0_55, %c0_56] : memref<1x32x96xbf16, #tpu.memory_space<vmem>>, vector<1x32x96xbf16>
      %267 = vector.shape_cast %266 : vector<1x32x96xbf16> to vector<32x96xbf16>
      %cst_57 = arith.constant dense<0.000000e+00> : vector<64x96xf32>
      %268 = tpu.matmul %265, %267, %cst_57 {dimension_numbers = #tpu.dot_dimension_numbers<[1], [0], [0], [1], [0, 0, 1, 1], [], []>} : vector<64x32xbf16>, vector<32x96xbf16>, vector<64x96xf32> -> vector<64x96xf32>
      %c0_58 = arith.constant 0 : index
      %c0_59 = arith.constant 0 : index
      %c0_60 = arith.constant 0 : index
      %269 = vector.load %arg8[%c0_58, %c0_59, %c0_60] : memref<1x1x96xf32, #tpu.memory_space<vmem>>, vector<1x1x96xf32>
      %270 = vector.shape_cast %269 : vector<1x1x96xf32> to vector<1x96xf32>
      %271 = vector.broadcast %270 : vector<1x96xf32> to vector<64x96xf32>
      %272 = arith.addf %268, %271 : vector<64x96xf32>
      %c0_61 = arith.constant 0 : index
      %c0_62 = arith.constant 0 : index
      %273 = vector.load %arg14[%c0_61, %c0_62] : memref<64x96xf32, #tpu.memory_space<vmem>>, vector<64x96xf32>
      tpu.vector_store %arg14[%c0_61, %c0_62], %272 {strides = array<i32>} : memref<64x96xf32, #tpu.memory_space<vmem>>, vector<64x96xf32>,
    } else {
    }
    %c0 = arith.constant 0 : index
    %c0_3 = arith.constant 0 : index
    %c0_4 = arith.constant 0 : index
    %6 = vector.load %arg7[%c0, %c0_3, %c0_4] : memref<1x32x96xbf16, #tpu.memory_space<vmem>>, vector<1x32x96xbf16>
    %7 = vector.shape_cast %6 : vector<1x32x96xbf16> to vector<32x96xbf16>
    %c0_5 = arith.constant 0 : index
    %c0_6 = arith.constant 0 : index
    %c0_7 = arith.constant 0 : index
    %8 = vector.load %arg9[%c0_5, %c0_6, %c0_7] : memref<1x1x96xf32, #tpu.memory_space<vmem>>, vector<1x1x96xf32>
    %9 = vector.shape_cast %8 : vector<1x1x96xf32> to vector<1x96xf32>
    %cst = arith.constant 0.000000e+00 : f32
    %10 = vector.broadcast %cst : f32 to vector<8x32xf32>
    %c0_8 = arith.constant 0 : index
    %c0_9 = arith.constant 0 : index
    %11 = vector.load %arg14[%c0_8, %c0_9] : memref<64x96xf32, #tpu.memory_space<vmem>>, vector<8x96xf32>
    %12 = arith.truncf %10 : vector<8x32xf32> to vector<8x32xbf16>
    %cst_10 = arith.constant dense<0.000000e+00> : vector<8x96xf32>
    %13 = tpu.matmul %12, %7, %cst_10 {dimension_numbers = #tpu.dot_dimension_numbers<[1], [0], [0], [1], [0, 0, 1, 1], [], []>} : vector<8x32xbf16>, vector<32x96xbf16>, vector<8x96xf32> -> vector<8x96xf32>
    %14 = vector.broadcast %9 : vector<1x96xf32> to vector<8x96xf32>
    %15 = arith.addf %13, %14 : vector<8x96xf32>
    %16 = vector.extract_strided_slice %11 {offsets = [0, 0], sizes = [8, 32], strides = [1, 1]} : vector<8x96xf32> to vector<8x32xf32>
    %17 = vector.extract_strided_slice %15 {offsets = [0, 0], sizes = [8, 32], strides = [1, 1]} : vector<8x96xf32> to vector<8x32xf32>
    %18 = arith.addf %16, %17 : vector<8x32xf32>
    %19 = arith.negf %18 : vector<8x32xf32>
    %20 = math.exp %19 : vector<8x32xf32>
    %cst_11 = arith.constant 1.000000e+00 : f32
    %21 = vector.broadcast %cst_11 : f32 to vector<8x32xf32>
    %22 = arith.addf %21, %20 : vector<8x32xf32>
    %23 = arith.divf %21, %22 : vector<8x32xf32>
    %24 = vector.extract_strided_slice %11 {offsets = [0, 32], sizes = [8, 32], strides = [1, 1]} : vector<8x96xf32> to vector<8x32xf32>
    %25 = vector.extract_strided_slice %15 {offsets = [0, 32], sizes = [8, 32], strides = [1, 1]} : vector<8x96xf32> to vector<8x32xf32>
    %26 = arith.addf %24, %25 : vector<8x32xf32>
    %27 = arith.negf %26 : vector<8x32xf32>
    %28 = math.exp %27 : vector<8x32xf32>
    %cst_12 = arith.constant 1.000000e+00 : f32
    %29 = vector.broadcast %cst_12 : f32 to vector<8x32xf32>
    %30 = arith.addf %29, %28 : vector<8x32xf32>
    %31 = arith.divf %29, %30 : vector<8x32xf32>
    %32 = vector.extract_strided_slice %11 {offsets = [0, 64], sizes = [8, 32], strides = [1, 1]} : vector<8x96xf32> to vector<8x32xf32>
    %33 = vector.extract_strided_slice %15 {offsets = [0, 64], sizes = [8, 32], strides = [1, 1]} : vector<8x96xf32> to vector<8x32xf32>
    %34 = arith.mulf %23, %33 : vector<8x32xf32>
    %35 = arith.addf %32, %34 : vector<8x32xf32>
    %36 = math.tanh %35 : vector<8x32xf32>
    %cst_13 = arith.constant 1.000000e+00 : f32
    %37 = vector.broadcast %cst_13 : f32 to vector<8x32xf32>
    %38 = arith.subf %37, %31 : vector<8x32xf32>
    %39 = arith.mulf %38, %36 : vector<8x32xf32>
    %40 = arith.mulf %31, %10 : vector<8x32xf32>
    %41 = arith.addf %39, %40 : vector<8x32xf32>
    %c8 = arith.constant 8 : index
    %c0_14 = arith.constant 0 : index
    %42 = vector.load %arg14[%c8, %c0_14] : memref<64x96xf32, #tpu.memory_space<vmem>>, vector<8x96xf32>
    %43 = arith.truncf %41 : vector<8x32xf32> to vector<8x32xbf16>
    %cst_15 = arith.constant dense<0.000000e+00> : vector<8x96xf32>
    %44 = tpu.matmul %43, %7, %cst_15 {dimension_numbers = #tpu.dot_dimension_numbers<[1], [0], [0], [1], [0, 0, 1, 1], [], []>} : vector<8x32xbf16>, vector<32x96xbf16>, vector<8x96xf32> -> vector<8x96xf32>
    %45 = vector.broadcast %9 : vector<1x96xf32> to vector<8x96xf32>
    %46 = arith.addf %44, %45 : vector<8x96xf32>
    %47 = vector.extract_strided_slice %42 {offsets = [0, 0], sizes = [8, 32], strides = [1, 1]} : vector<8x96xf32> to vector<8x32xf32>
    %48 = vector.extract_strided_slice %46 {offsets = [0, 0], sizes = [8, 32], strides = [1, 1]} : vector<8x96xf32> to vector<8x32xf32>
    %49 = arith.addf %47, %48 : vector<8x32xf32>
    %50 = arith.negf %49 : vector<8x32xf32>
    %51 = math.exp %50 : vector<8x32xf32>
    %cst_16 = arith.constant 1.000000e+00 : f32
    %52 = vector.broadcast %cst_16 : f32 to vector<8x32xf32>
    %53 = arith.addf %52, %51 : vector<8x32xf32>
    %54 = arith.divf %52, %53 : vector<8x32xf32>
    %55 = vector.extract_strided_slice %42 {offsets = [0, 32], sizes = [8, 32], strides = [1, 1]} : vector<8x96xf32> to vector<8x32xf32>
    %56 = vector.extract_strided_slice %46 {offsets = [0, 32], sizes = [8, 32], strides = [1, 1]} : vector<8x96xf32> to vector<8x32xf32>
    %57 = arith.addf %55, %56 : vector<8x32xf32>
    %58 = arith.negf %57 : vector<8x32xf32>
    %59 = math.exp %58 : vector<8x32xf32>
    %cst_17 = arith.constant 1.000000e+00 : f32
    %60 = vector.broadcast %cst_17 : f32 to vector<8x32xf32>
    %61 = arith.addf %60, %59 : vector<8x32xf32>
    %62 = arith.divf %60, %61 : vector<8x32xf32>
    %63 = vector.extract_strided_slice %42 {offsets = [0, 64], sizes = [8, 32], strides = [1, 1]} : vector<8x96xf32> to vector<8x32xf32>
    %64 = vector.extract_strided_slice %46 {offsets = [0, 64], sizes = [8, 32], strides = [1, 1]} : vector<8x96xf32> to vector<8x32xf32>
    %65 = arith.mulf %54, %64 : vector<8x32xf32>
    %66 = arith.addf %63, %65 : vector<8x32xf32>
    %67 = math.tanh %66 : vector<8x32xf32>
    %cst_18 = arith.constant 1.000000e+00 : f32
    %68 = vector.broadcast %cst_18 : f32 to vector<8x32xf32>
    %69 = arith.subf %68, %62 : vector<8x32xf32>
    %70 = arith.mulf %69, %67 : vector<8x32xf32>
    %71 = arith.mulf %62, %41 : vector<8x32xf32>
    %72 = arith.addf %70, %71 : vector<8x32xf32>
    %c16 = arith.constant 16 : index
    %c0_19 = arith.constant 0 : index
    %73 = vector.load %arg14[%c16, %c0_19] : memref<64x96xf32, #tpu.memory_space<vmem>>, vector<8x96xf32>
    %74 = arith.truncf %72 : vector<8x32xf32> to vector<8x32xbf16>
    %cst_20 = arith.constant dense<0.000000e+00> : vector<8x96xf32>
    %75 = tpu.matmul %74, %7, %cst_20 {dimension_numbers = #tpu.dot_dimension_numbers<[1], [0], [0], [1], [0, 0, 1, 1], [], []>} : vector<8x32xbf16>, vector<32x96xbf16>, vector<8x96xf32> -> vector<8x96xf32>
    %76 = vector.broadcast %9 : vector<1x96xf32> to vector<8x96xf32>
    %77 = arith.addf %75, %76 : vector<8x96xf32>
    %78 = vector.extract_strided_slice %73 {offsets = [0, 0], sizes = [8, 32], strides = [1, 1]} : vector<8x96xf32> to vector<8x32xf32>
    %79 = vector.extract_strided_slice %77 {offsets = [0, 0], sizes = [8, 32], strides = [1, 1]} : vector<8x96xf32> to vector<8x32xf32>
    %80 = arith.addf %78, %79 : vector<8x32xf32>
    %81 = arith.negf %80 : vector<8x32xf32>
    %82 = math.exp %81 : vector<8x32xf32>
    %cst_21 = arith.constant 1.000000e+00 : f32
    %83 = vector.broadcast %cst_21 : f32 to vector<8x32xf32>
    %84 = arith.addf %83, %82 : vector<8x32xf32>
    %85 = arith.divf %83, %84 : vector<8x32xf32>
    %86 = vector.extract_strided_slice %73 {offsets = [0, 32], sizes = [8, 32], strides = [1, 1]} : vector<8x96xf32> to vector<8x32xf32>
    %87 = vector.extract_strided_slice %77 {offsets = [0, 32], sizes = [8, 32], strides = [1, 1]} : vector<8x96xf32> to vector<8x32xf32>
    %88 = arith.addf %86, %87 : vector<8x32xf32>
    %89 = arith.negf %88 : vector<8x32xf32>
    %90 = math.exp %89 : vector<8x32xf32>
    %cst_22 = arith.constant 1.000000e+00 : f32
    %91 = vector.broadcast %cst_22 : f32 to vector<8x32xf32>
    %92 = arith.addf %91, %90 : vector<8x32xf32>
    %93 = arith.divf %91, %92 : vector<8x32xf32>
    %94 = vector.extract_strided_slice %73 {offsets = [0, 64], sizes = [8, 32], strides = [1, 1]} : vector<8x96xf32> to vector<8x32xf32>
    %95 = vector.extract_strided_slice %77 {offsets = [0, 64], sizes = [8, 32], strides = [1, 1]} : vector<8x96xf32> to vector<8x32xf32>
    %96 = arith.mulf %85, %95 : vector<8x32xf32>
    %97 = arith.addf %94, %96 : vector<8x32xf32>
    %98 = math.tanh %97 : vector<8x32xf32>
    %cst_23 = arith.constant 1.000000e+00 : f32
    %99 = vector.broadcast %cst_23 : f32 to vector<8x32xf32>
    %100 = arith.subf %99, %93 : vector<8x32xf32>
    %101 = arith.mulf %100, %98 : vector<8x32xf32>
    %102 = arith.mulf %93, %72 : vector<8x32xf32>
    %103 = arith.addf %101, %102 : vector<8x32xf32>
    %c24 = arith.constant 24 : index
    %c0_24 = arith.constant 0 : index
    %104 = vector.load %arg14[%c24, %c0_24] : memref<64x96xf32, #tpu.memory_space<vmem>>, vector<8x96xf32>
    %105 = arith.truncf %103 : vector<8x32xf32> to vector<8x32xbf16>
    %cst_25 = arith.constant dense<0.000000e+00> : vector<8x96xf32>
    %106 = tpu.matmul %105, %7, %cst_25 {dimension_numbers = #tpu.dot_dimension_numbers<[1], [0], [0], [1], [0, 0, 1, 1], [], []>} : vector<8x32xbf16>, vector<32x96xbf16>, vector<8x96xf32> -> vector<8x96xf32>
    %107 = vector.broadcast %9 : vector<1x96xf32> to vector<8x96xf32>
    %108 = arith.addf %106, %107 : vector<8x96xf32>
    %109 = vector.extract_strided_slice %104 {offsets = [0, 0], sizes = [8, 32], strides = [1, 1]} : vector<8x96xf32> to vector<8x32xf32>
    %110 = vector.extract_strided_slice %108 {offsets = [0, 0], sizes = [8, 32], strides = [1, 1]} : vector<8x96xf32> to vector<8x32xf32>
    %111 = arith.addf %109, %110 : vector<8x32xf32>
    %112 = arith.negf %111 : vector<8x32xf32>
    %113 = math.exp %112 : vector<8x32xf32>
    %cst_26 = arith.constant 1.000000e+00 : f32
    %114 = vector.broadcast %cst_26 : f32 to vector<8x32xf32>
    %115 = arith.addf %114, %113 : vector<8x32xf32>
    %116 = arith.divf %114, %115 : vector<8x32xf32>
    %117 = vector.extract_strided_slice %104 {offsets = [0, 32], sizes = [8, 32], strides = [1, 1]} : vector<8x96xf32> to vector<8x32xf32>
    %118 = vector.extract_strided_slice %108 {offsets = [0, 32], sizes = [8, 32], strides = [1, 1]} : vector<8x96xf32> to vector<8x32xf32>
    %119 = arith.addf %117, %118 : vector<8x32xf32>
    %120 = arith.negf %119 : vector<8x32xf32>
    %121 = math.exp %120 : vector<8x32xf32>
    %cst_27 = arith.constant 1.000000e+00 : f32
    %122 = vector.broadcast %cst_27 : f32 to vector<8x32xf32>
    %123 = arith.addf %122, %121 : vector<8x32xf32>
    %124 = arith.divf %122, %123 : vector<8x32xf32>
    %125 = vector.extract_strided_slice %104 {offsets = [0, 64], sizes = [8, 32], strides = [1, 1]} : vector<8x96xf32> to vector<8x32xf32>
    %126 = vector.extract_strided_slice %108 {offsets = [0, 64], sizes = [8, 32], strides = [1, 1]} : vector<8x96xf32> to vector<8x32xf32>
    %127 = arith.mulf %116, %126 : vector<8x32xf32>
    %128 = arith.addf %125, %127 : vector<8x32xf32>
    %129 = math.tanh %128 : vector<8x32xf32>
    %cst_28 = arith.constant 1.000000e+00 : f32
    %130 = vector.broadcast %cst_28 : f32 to vector<8x32xf32>
    %131 = arith.subf %130, %124 : vector<8x32xf32>
    %132 = arith.mulf %131, %129 : vector<8x32xf32>
    %133 = arith.mulf %124, %103 : vector<8x32xf32>
    %134 = arith.addf %132, %133 : vector<8x32xf32>
    %c32 = arith.constant 32 : index
    %c0_29 = arith.constant 0 : index
    %135 = vector.load %arg14[%c32, %c0_29] : memref<64x96xf32, #tpu.memory_space<vmem>>, vector<8x96xf32>
    %136 = arith.truncf %134 : vector<8x32xf32> to vector<8x32xbf16>
    %cst_30 = arith.constant dense<0.000000e+00> : vector<8x96xf32>
    %137 = tpu.matmul %136, %7, %cst_30 {dimension_numbers = #tpu.dot_dimension_numbers<[1], [0], [0], [1], [0, 0, 1, 1], [], []>} : vector<8x32xbf16>, vector<32x96xbf16>, vector<8x96xf32> -> vector<8x96xf32>
    %138 = vector.broadcast %9 : vector<1x96xf32> to vector<8x96xf32>
    %139 = arith.addf %137, %138 : vector<8x96xf32>
    %140 = vector.extract_strided_slice %135 {offsets = [0, 0], sizes = [8, 32], strides = [1, 1]} : vector<8x96xf32> to vector<8x32xf32>
    %141 = vector.extract_strided_slice %139 {offsets = [0, 0], sizes = [8, 32], strides = [1, 1]} : vector<8x96xf32> to vector<8x32xf32>
    %142 = arith.addf %140, %141 : vector<8x32xf32>
    %143 = arith.negf %142 : vector<8x32xf32>
    %144 = math.exp %143 : vector<8x32xf32>
    %cst_31 = arith.constant 1.000000e+00 : f32
    %145 = vector.broadcast %cst_31 : f32 to vector<8x32xf32>
    %146 = arith.addf %145, %144 : vector<8x32xf32>
    %147 = arith.divf %145, %146 : vector<8x32xf32>
    %148 = vector.extract_strided_slice %135 {offsets = [0, 32], sizes = [8, 32], strides = [1, 1]} : vector<8x96xf32> to vector<8x32xf32>
    %149 = vector.extract_strided_slice %139 {offsets = [0, 32], sizes = [8, 32], strides = [1, 1]} : vector<8x96xf32> to vector<8x32xf32>
    %150 = arith.addf %148, %149 : vector<8x32xf32>
    %151 = arith.negf %150 : vector<8x32xf32>
    %152 = math.exp %151 : vector<8x32xf32>
    %cst_32 = arith.constant 1.000000e+00 : f32
    %153 = vector.broadcast %cst_32 : f32 to vector<8x32xf32>
    %154 = arith.addf %153, %152 : vector<8x32xf32>
    %155 = arith.divf %153, %154 : vector<8x32xf32>
    %156 = vector.extract_strided_slice %135 {offsets = [0, 64], sizes = [8, 32], strides = [1, 1]} : vector<8x96xf32> to vector<8x32xf32>
    %157 = vector.extract_strided_slice %139 {offsets = [0, 64], sizes = [8, 32], strides = [1, 1]} : vector<8x96xf32> to vector<8x32xf32>
    %158 = arith.mulf %147, %157 : vector<8x32xf32>
    %159 = arith.addf %156, %158 : vector<8x32xf32>
    %160 = math.tanh %159 : vector<8x32xf32>
    %cst_33 = arith.constant 1.000000e+00 : f32
    %161 = vector.broadcast %cst_33 : f32 to vector<8x32xf32>
    %162 = arith.subf %161, %155 : vector<8x32xf32>
    %163 = arith.mulf %162, %160 : vector<8x32xf32>
    %164 = arith.mulf %155, %134 : vector<8x32xf32>
    %165 = arith.addf %163, %164 : vector<8x32xf32>
    %c40 = arith.constant 40 : index
    %c0_34 = arith.constant 0 : index
    %166 = vector.load %arg14[%c40, %c0_34] : memref<64x96xf32, #tpu.memory_space<vmem>>, vector<8x96xf32>
    %167 = arith.truncf %165 : vector<8x32xf32> to vector<8x32xbf16>
    %cst_35 = arith.constant dense<0.000000e+00> : vector<8x96xf32>
    %168 = tpu.matmul %167, %7, %cst_35 {dimension_numbers = #tpu.dot_dimension_numbers<[1], [0], [0], [1], [0, 0, 1, 1], [], []>} : vector<8x32xbf16>, vector<32x96xbf16>, vector<8x96xf32> -> vector<8x96xf32>
    %169 = vector.broadcast %9 : vector<1x96xf32> to vector<8x96xf32>
    %170 = arith.addf %168, %169 : vector<8x96xf32>
    %171 = vector.extract_strided_slice %166 {offsets = [0, 0], sizes = [8, 32], strides = [1, 1]} : vector<8x96xf32> to vector<8x32xf32>
    %172 = vector.extract_strided_slice %170 {offsets = [0, 0], sizes = [8, 32], strides = [1, 1]} : vector<8x96xf32> to vector<8x32xf32>
    %173 = arith.addf %171, %172 : vector<8x32xf32>
    %174 = arith.negf %173 : vector<8x32xf32>
    %175 = math.exp %174 : vector<8x32xf32>
    %cst_36 = arith.constant 1.000000e+00 : f32
    %176 = vector.broadcast %cst_36 : f32 to vector<8x32xf32>
    %177 = arith.addf %176, %175 : vector<8x32xf32>
    %178 = arith.divf %176, %177 : vector<8x32xf32>
    %179 = vector.extract_strided_slice %166 {offsets = [0, 32], sizes = [8, 32], strides = [1, 1]} : vector<8x96xf32> to vector<8x32xf32>
    %180 = vector.extract_strided_slice %170 {offsets = [0, 32], sizes = [8, 32], strides = [1, 1]} : vector<8x96xf32> to vector<8x32xf32>
    %181 = arith.addf %179, %180 : vector<8x32xf32>
    %182 = arith.negf %181 : vector<8x32xf32>
    %183 = math.exp %182 : vector<8x32xf32>
    %cst_37 = arith.constant 1.000000e+00 : f32
    %184 = vector.broadcast %cst_37 : f32 to vector<8x32xf32>
    %185 = arith.addf %184, %183 : vector<8x32xf32>
    %186 = arith.divf %184, %185 : vector<8x32xf32>
    %187 = vector.extract_strided_slice %166 {offsets = [0, 64], sizes = [8, 32], strides = [1, 1]} : vector<8x96xf32> to vector<8x32xf32>
    %188 = vector.extract_strided_slice %170 {offsets = [0, 64], sizes = [8, 32], strides = [1, 1]} : vector<8x96xf32> to vector<8x32xf32>
    %189 = arith.mulf %178, %188 : vector<8x32xf32>
    %190 = arith.addf %187, %189 : vector<8x32xf32>
    %191 = math.tanh %190 : vector<8x32xf32>
    %cst_38 = arith.constant 1.000000e+00 : f32
    %192 = vector.broadcast %cst_38 : f32 to vector<8x32xf32>
    %193 = arith.subf %192, %186 : vector<8x32xf32>
    %194 = arith.mulf %193, %191 : vector<8x32xf32>
    %195 = arith.mulf %186, %165 : vector<8x32xf32>
    %196 = arith.addf %194, %195 : vector<8x32xf32>
    %c48 = arith.constant 48 : index
    %c0_39 = arith.constant 0 : index
    %197 = vector.load %arg14[%c48, %c0_39] : memref<64x96xf32, #tpu.memory_space<vmem>>, vector<8x96xf32>
    %198 = arith.truncf %196 : vector<8x32xf32> to vector<8x32xbf16>
    %cst_40 = arith.constant dense<0.000000e+00> : vector<8x96xf32>
    %199 = tpu.matmul %198, %7, %cst_40 {dimension_numbers = #tpu.dot_dimension_numbers<[1], [0], [0], [1], [0, 0, 1, 1], [], []>} : vector<8x32xbf16>, vector<32x96xbf16>, vector<8x96xf32> -> vector<8x96xf32>
    %200 = vector.broadcast %9 : vector<1x96xf32> to vector<8x96xf32>
    %201 = arith.addf %199, %200 : vector<8x96xf32>
    %202 = vector.extract_strided_slice %197 {offsets = [0, 0], sizes = [8, 32], strides = [1, 1]} : vector<8x96xf32> to vector<8x32xf32>
    %203 = vector.extract_strided_slice %201 {offsets = [0, 0], sizes = [8, 32], strides = [1, 1]} : vector<8x96xf32> to vector<8x32xf32>
    %204 = arith.addf %202, %203 : vector<8x32xf32>
    %205 = arith.negf %204 : vector<8x32xf32>
    %206 = math.exp %205 : vector<8x32xf32>
    %cst_41 = arith.constant 1.000000e+00 : f32
    %207 = vector.broadcast %cst_41 : f32 to vector<8x32xf32>
    %208 = arith.addf %207, %206 : vector<8x32xf32>
    %209 = arith.divf %207, %208 : vector<8x32xf32>
    %210 = vector.extract_strided_slice %197 {offsets = [0, 32], sizes = [8, 32], strides = [1, 1]} : vector<8x96xf32> to vector<8x32xf32>
    %211 = vector.extract_strided_slice %201 {offsets = [0, 32], sizes = [8, 32], strides = [1, 1]} : vector<8x96xf32> to vector<8x32xf32>
    %212 = arith.addf %210, %211 : vector<8x32xf32>
    %213 = arith.negf %212 : vector<8x32xf32>
    %214 = math.exp %213 : vector<8x32xf32>
    %cst_42 = arith.constant 1.000000e+00 : f32
    %215 = vector.broadcast %cst_42 : f32 to vector<8x32xf32>
    %216 = arith.addf %215, %214 : vector<8x32xf32>
    %217 = arith.divf %215, %216 : vector<8x32xf32>
    %218 = vector.extract_strided_slice %197 {offsets = [0, 64], sizes = [8, 32], strides = [1, 1]} : vector<8x96xf32> to vector<8x32xf32>
    %219 = vector.extract_strided_slice %201 {offsets = [0, 64], sizes = [8, 32], strides = [1, 1]} : vector<8x96xf32> to vector<8x32xf32>
    %220 = arith.mulf %209, %219 : vector<8x32xf32>
    %221 = arith.addf %218, %220 : vector<8x32xf32>
    %222 = math.tanh %221 : vector<8x32xf32>
    %cst_43 = arith.constant 1.000000e+00 : f32
    %223 = vector.broadcast %cst_43 : f32 to vector<8x32xf32>
    %224 = arith.subf %223, %217 : vector<8x32xf32>
    %225 = arith.mulf %224, %222 : vector<8x32xf32>
    %226 = arith.mulf %217, %196 : vector<8x32xf32>
    %227 = arith.addf %225, %226 : vector<8x32xf32>
    %c56 = arith.constant 56 : index
    %c0_44 = arith.constant 0 : index
    %228 = vector.load %arg14[%c56, %c0_44] : memref<64x96xf32, #tpu.memory_space<vmem>>, vector<8x96xf32>
    %229 = arith.truncf %227 : vector<8x32xf32> to vector<8x32xbf16>
    %cst_45 = arith.constant dense<0.000000e+00> : vector<8x96xf32>
    %230 = tpu.matmul %229, %7, %cst_45 {dimension_numbers = #tpu.dot_dimension_numbers<[1], [0], [0], [1], [0, 0, 1, 1], [], []>} : vector<8x32xbf16>, vector<32x96xbf16>, vector<8x96xf32> -> vector<8x96xf32>
    %231 = vector.broadcast %9 : vector<1x96xf32> to vector<8x96xf32>
    %232 = arith.addf %230, %231 : vector<8x96xf32>
    %233 = vector.extract_strided_slice %228 {offsets = [0, 0], sizes = [8, 32], strides = [1, 1]} : vector<8x96xf32> to vector<8x32xf32>
    %234 = vector.extract_strided_slice %232 {offsets = [0, 0], sizes = [8, 32], strides = [1, 1]} : vector<8x96xf32> to vector<8x32xf32>
    %235 = arith.addf %233, %234 : vector<8x32xf32>
    %236 = arith.negf %235 : vector<8x32xf32>
    %237 = math.exp %236 : vector<8x32xf32>
    %cst_46 = arith.constant 1.000000e+00 : f32
    %238 = vector.broadcast %cst_46 : f32 to vector<8x32xf32>
    %239 = arith.addf %238, %237 : vector<8x32xf32>
    %240 = arith.divf %238, %239 : vector<8x32xf32>
    %241 = vector.extract_strided_slice %228 {offsets = [0, 32], sizes = [8, 32], strides = [1, 1]} : vector<8x96xf32> to vector<8x32xf32>
    %242 = vector.extract_strided_slice %232 {offsets = [0, 32], sizes = [8, 32], strides = [1, 1]} : vector<8x96xf32> to vector<8x32xf32>
    %243 = arith.addf %241, %242 : vector<8x32xf32>
    %244 = arith.negf %243 : vector<8x32xf32>
    %245 = math.exp %244 : vector<8x32xf32>
    %cst_47 = arith.constant 1.000000e+00 : f32
    %246 = vector.broadcast %cst_47 : f32 to vector<8x32xf32>
    %247 = arith.addf %246, %245 : vector<8x32xf32>
    %248 = arith.divf %246, %247 : vector<8x32xf32>
    %249 = vector.extract_strided_slice %228 {offsets = [0, 64], sizes = [8, 32], strides = [1, 1]} : vector<8x96xf32> to vector<8x32xf32>
    %250 = vector.extract_strided_slice %232 {offsets = [0, 64], sizes = [8, 32], strides = [1, 1]} : vector<8x96xf32> to vector<8x32xf32>
    %251 = arith.mulf %240, %250 : vector<8x32xf32>
    %252 = arith.addf %249, %251 : vector<8x32xf32>
    %253 = math.tanh %252 : vector<8x32xf32>
    %cst_48 = arith.constant 1.000000e+00 : f32
    %254 = vector.broadcast %cst_48 : f32 to vector<8x32xf32>
    %255 = arith.subf %254, %248 : vector<8x32xf32>
    %256 = arith.mulf %255, %253 : vector<8x32xf32>
    %257 = arith.mulf %248, %227 : vector<8x32xf32>
    %258 = arith.addf %256, %257 : vector<8x32xf32>
    %259 = tpu.concatenate %41, %72, %103, %134, %165, %196, %227, %258 in 0 : vector<8x32xf32>, vector<8x32xf32>, vector<8x32xf32>, vector<8x32xf32>, vector<8x32xf32>, vector<8x32xf32>, vector<8x32xf32>, vector<8x32xf32> -> vector<64x32xf32>
    %c0_49 = arith.constant 0 : index
    %c0_50 = arith.constant 0 : index
    %260 = vector.load %arg13[%c0_49, %c0_50] : memref<64x32xf32, #tpu.memory_space<vmem>>, vector<64x32xf32>
    tpu.vector_store %arg13[%c0_49, %c0_50], %259 {strides = array<i32>} : memref<64x32xf32, #tpu.memory_space<vmem>>, vector<64x32xf32>,
    %c3_i32 = arith.constant 3 : i32
    %261 = arith.cmpi eq, %arg0, %c3_i32 : i32
    %262 = arith.extui %261 : i1 to i32
    %c0_i32_51 = arith.constant 0 : i32
    %263 = arith.cmpi ne, %262, %c0_i32_51 : i32
    scf.if %263 {
      %264 = arith.truncf %259 : vector<64x32xf32> to vector<64x32xbf16>
      %c0_52 = arith.constant 0 : index
      %c0_53 = arith.constant 0 : index
      %265 = vector.load %arg10[%c0_52, %c0_53] : memref<32x128xbf16, #tpu.memory_space<vmem>>, vector<32x128xbf16>
      %cst_54 = arith.constant dense<0.000000e+00> : vector<64x128xf32>
      %266 = tpu.matmul %264, %265, %cst_54 {dimension_numbers = #tpu.dot_dimension_numbers<[1], [0], [0], [1], [0, 0, 1, 1], [], []>} : vector<64x32xbf16>, vector<32x128xbf16>, vector<64x128xf32> -> vector<64x128xf32>
      %c0_55 = arith.constant 0 : index
      %c0_56 = arith.constant 0 : index
      %267 = vector.load %arg11[%c0_55, %c0_56] : memref<1x128xf32, #tpu.memory_space<vmem>>, vector<1x128xf32>
      %268 = vector.broadcast %267 : vector<1x128xf32> to vector<64x128xf32>
      %269 = arith.addf %266, %268 : vector<64x128xf32>
      %c0_57 = arith.constant 0 : index
      %c0_58 = arith.constant 0 : index
      %270 = vector.load %arg12[%c0_57, %c0_58] : memref<64x128xf32, #tpu.memory_space<vmem>>, vector<64x128xf32>
      tpu.vector_store %arg12[%c0_57, %c0_58], %269 {strides = array<i32>} : memref<64x128xf32, #tpu.memory_space<vmem>>, vector<64x128xf32>,
    } else {
    }
    return
  }
  func.func @transform_0(%arg0: i32) -> (i32, i32, i32) {
    %c0_i32 = arith.constant 0 : i32
    %c0_i32_0 = arith.constant 0 : i32
    %c0_i32_1 = arith.constant 0 : i32
    %c0_i32_2 = arith.constant 0 : i32
    return %c0_i32, %c0_i32_0, %c0_i32_1 : i32, i32, i32
  }
  func.func @transform_1(%arg0: i32) -> (i32, i32) {
    %c0_i32 = arith.constant 0 : i32
    %c0_i32_0 = arith.constant 0 : i32
    %c0_i32_1 = arith.constant 0 : i32
    return %c0_i32, %c0_i32_0 : i32, i32
  }
  func.func @transform_2(%arg0: i32) -> (i32, i32) {
    %c0_i32 = arith.constant 0 : i32
    %c0_i32_0 = arith.constant 0 : i32
    %c0_i32_1 = arith.constant 0 : i32
    return %c0_i32, %c0_i32_0 : i32, i32
  }
  func.func @transform_3(%arg0: i32) -> (i32, i32) {
    %c0_i32 = arith.constant 0 : i32
    %c0_i32_0 = arith.constant 0 : i32
    %c0_i32_1 = arith.constant 0 : i32
    return %c0_i32, %c0_i32_0 : i32, i32
  }
  func.func @transform_4(%arg0: i32) -> (i32, i32) {
    %c0_i32 = arith.constant 0 : i32
    %c0_i32_0 = arith.constant 0 : i32
    %c0_i32_1 = arith.constant 0 : i32
    return %c0_i32, %c0_i32_0 : i32, i32
  }
  func.func @transform_5(%arg0: i32) -> (i32, i32, i32) {
    %c0_i32 = arith.constant 0 : i32
    %c0_i32_0 = arith.constant 0 : i32
    %c0_i32_1 = arith.constant 0 : i32
    return %arg0, %c0_i32, %c0_i32_0 : i32, i32, i32
  }
  func.func @transform_6(%arg0: i32) -> (i32, i32, i32) {
    %c0_i32 = arith.constant 0 : i32
    %c0_i32_0 = arith.constant 0 : i32
    %c0_i32_1 = arith.constant 0 : i32
    return %arg0, %c0_i32, %c0_i32_0 : i32, i32, i32
  }
  func.func @transform_7(%arg0: i32) -> (i32, i32, i32) {
    %c0_i32 = arith.constant 0 : i32
    %c0_i32_0 = arith.constant 0 : i32
    %c0_i32_1 = arith.constant 0 : i32
    return %arg0, %c0_i32, %c0_i32_0 : i32, i32, i32
  }
  func.func @transform_8(%arg0: i32) -> (i32, i32, i32) {
    %c0_i32 = arith.constant 0 : i32
    %c0_i32_0 = arith.constant 0 : i32
    %c0_i32_1 = arith.constant 0 : i32
    return %arg0, %c0_i32, %c0_i32_0 : i32, i32, i32
  }
  func.func @transform_9(%arg0: i32) -> (i32, i32) {
    %c0_i32 = arith.constant 0 : i32
    %c0_i32_0 = arith.constant 0 : i32
    %c0_i32_1 = arith.constant 0 : i32
    return %c0_i32, %c0_i32_0 : i32, i32
  }
  func.func @transform_10(%arg0: i32) -> (i32, i32) {
    %c0_i32 = arith.constant 0 : i32
    %c0_i32_0 = arith.constant 0 : i32
    %c0_i32_1 = arith.constant 0 : i32
    return %c0_i32, %c0_i32_0 : i32, i32
  }
  func.func @transform_11(%arg0: i32) -> (i32, i32) {
    %c0_i32 = arith.constant 0 : i32
    %c0_i32_0 = arith.constant 0 : i32
    %c0_i32_1 = arith.constant 0 : i32
    return %c0_i32, %c0_i32_0 : i32, i32
  }
}

</mosaic_0001>

<bundles_post_ra>
// kernel: tpu_custom_call.1
= control target key start
LH: loop header
LB: loop body
LE: loop exit
PB: predicated region body
PF: predicated region fallthrough
CT: control target
= control target key end

     0   :  { %16 = vsyncpa [#allocation5], 0  ;;  %s6132_s17 = smov 0   ;;  %s8218_s0 = inlined_call_operand.vmem [shape: f32[8,256,4], index: 0, kind: input, shape index: {}]   ;;  %s8219_s1 = inlined_call_operand.vmem [shape: f32[4,64], index: 1, kind: input, shape index: {}]   ;;  %s8220_s2 = inlined_call_operand.vmem [shape: f32[1,64], index: 2, kind: input, shape index: {}]   ;;  %s8221_s3 = inlined_call_operand.vmem [shape: f32[64,32], index: 3, kind: input, shape index: {}]   ;;  %s8222_s4 = inlined_call_operand.vmem [shape: f32[1,32], index: 4, kind: input, shape index: {}]   ;;  %s8223_s5 = inlined_call_operand.vmem [shape: bf16[4,32,96], index: 5, kind: input, shape index: {}]   ;;  %s8224_s6 = inlined_call_operand.vmem [shape: bf16[4,32,96], index: 6, kind: input, shape index: {}]   ;;  %s8225_s7 = inlined_call_operand.vmem [shape: f32[4,1,96], index: 7, kind: input, shape index: {}]   ;;  %s8226_s8 = inlined_call_operand.vmem [shape: f32[4,1,96], index: 8, kind: input, shape index: {}]   ;;  %s8227_s9 = inlined_call_operand.vmem [shape: bf16[32,128], index: 9, kind: input, shape index: {}]   ;;  %s8228_s10 = inlined_call_operand.vmem [shape: f32[1,128], index: 10, kind: input, shape index: {}]   ;;  %s8229_s11 = inlined_call_operand.hbm [shape: f32[64,128], index: 11, kind: output, shape index: {}]  }
   0x1 LB: > { %s6138_s18 = sadd.s32 4294967295, %s6058_s17   ;;  %p4800_p0 = scmp.ge.s32.totalorder %s6058_s17, 1  ;;  %s6058_s17 = sphi %s6132_s17, %s22_s17  }
   0x2   : > { %p359_p1 = scmp.lt.s32.totalorder %s6058_s17, 5 }
   0x4   : > { %p360_p2 = pnand %p4800_p0, %p359_p1 }
   0x5   : > { %p405_p3 = scmp.lt.s32.totalorder (!%p360_p2), %s6138_s18, 3  ;;  %p4805_p4 = scmp.ne.s32.totalorder (!%p360_p2), %s6138_s18, 0 }
   0x6   : > { %363 = sbr.rel (%p360_p2) target bundleno = 7064 (0x1b98), region = 64 }
   0xd   : > { %s6144_s19 = scalar_select %p405_p3, %s6138_s18, 3 }
   0xe   : > { %425 = sbr.rel (%p4805_p4) target bundleno = 1016 (0x3f8), region = 68 }
   0xf   : > { %s5108_s20 = sshll.u32 %s6144_s19, 4  ;;  %s6151_s23 = scalar_lea.vmem %s8225_s7, %s6144_s19 }
  0x10   : > { %s6156_s26 = scalar_lea.vmem %s8223_s5, %s5108_s20  ;;  %s6161_s29 = scalar_lea.vmem %s8224_s6, %s5108_s20 }
  0x11   : > { %s420_s13 = scalar_lea.vmem %s8226_s8, %s6144_s19 }
  0x15   : > { %v682_v0 = vld [vmem:[%s8219_s1] sm:$0xf]  ;;  %vm1459_vm0 = vcmask 1043456   ;;  %vm690_vm1 = vcmask 31744   ;;  %v427_v2 = vld [vmem:[%s8218_s0 + $0x8] sm:$0xff]  ;;  %v428_v3 = vld [vmem:[%s8218_s0 + $0x10] sm:$0xff] }
  0x16   : > { %v426_v1 = vld [vmem:[%s8218_s0] sm:$0xff]  ;;  %5415 = vmatprep.subr.msk.mxu0 %vm1459_vm0, %v682_v0  ;;  %5928 = vmatprep.subr.msk.mxu1 %vm1459_vm0, %v682_v0  ;;  %v429_v4 = vld [vmem:[%s8218_s0 + $0x18] sm:$0xff]  ;;  %v431_v6 = vld [vmem:[%s8218_s0 + $0x28] sm:$0xff]  ;;  %vm3064_vm2 = vcmask 523264   ;;  %vm3649_vm3 = vcmask 1041409   ;;  %vm3651_vm4 = vcmask 1042434  }
  0x17   : > { %5417 = vmatprep.mubr.msk.f32.mxu0 %vm690_vm1, %v426_v1  ;;  %5416 = vmatpush3.msk.msra.mxu0 %vm1459_vm0, %v682_v0  ;;  %v430_v5 = vld [vmem:[%s8218_s0 + $0x20] sm:$0xff]  ;;  %v432_v7 = vld [vmem:[%s8218_s0 + $0x30] sm:$0xff]  ;;  %v433_v9 = vld [vmem:[%s8218_s0 + $0x38] sm:$0xff]  ;;  %vm6061_vm5 = vmmov 0   ;;  %vm3653_vm6 = vcmask 1043459   ;;  %vm3655_vm7 = vcmask 1044484  }
  0x18   : > { %5418 = vmatmul.mubr.msk.f32.vlgmr.msra.gmra.mrb[0].mxu0 %vm690_vm1, %v427_v2  ;;  %5929 = vmatpush3.msk.msra.mxu1 %vm1459_vm0, %v682_v0  ;;  %v558_v8 = vld [vmem:[%s8218_s0 + $0x420] sm:$0xff]  ;;  %v559_v10 = vld [vmem:[%s8218_s0 + $0x428] sm:$0xff]  ;;  %v560_v12 = vld [vmem:[%s8218_s0 + $0x430] sm:$0xff]  ;;  %vm3657_vm8 = vcmask 1045509   ;;  %vm3659_vm9 = vcmask 1046534   ;;  %vm3661_vm10 = vcmask 1047559  }
  0x19   : > { %5420 = vmatprep.mubr.msk.f32.mxu0 %vm690_vm1, %v428_v3  ;;  %5615 = vmatprep.mubr.msk.f32.mxu1 %vm690_vm1, %v558_v8  ;;  %v434_v11 = vld [vmem:[%s8218_s0 + $0x40] sm:$0xff]  ;;  %v561_v13 = vld [vmem:[%s8218_s0 + $0x438] sm:$0xff]  ;;  %v435_v15 = vld [vmem:[%s8218_s0 + $0x48] sm:$0xff]  ;;  %vm3760_vm11 = vcmask 261120   ;;  %vm3804_vm12 = vcmask 785408  }
  0x1a   : > { %5616 = vmatmul.mubr.msk.f32.vlgmr.msra.gmra.mrb[0].mxu1 %vm690_vm1, %v559_v10  ;;  %v562_v14 = vld [vmem:[%s8218_s0 + $0x440] sm:$0xff]  ;;  %v436_v16 = vld [vmem:[%s8218_s0 + $0x50] sm:$0xff]  ;;  %v563_v17 = vld [vmem:[%s8218_s0 + $0x448] sm:$0xff] }
  0x1b   : > { %5618 = vmatprep.mubr.msk.f32.mxu1 %vm690_vm1, %v560_v12  ;;  %v564_v18 = vld [vmem:[%s8218_s0 + $0x450] sm:$0xff]  ;;  %v437_v19 = vld [vmem:[%s8218_s0 + $0x58] sm:$0xff]  ;;  %v438_v20 = vld [vmem:[%s8218_s0 + $0x60] sm:$0xff] }
  0x1c   : > { %5421 = vmatmul.mubr.msk.f32.gmra.mrb[2].mxu0 %vm690_vm1, %v429_v4  ;;  %v565_v21 = vld [vmem:[%s8218_s0 + $0x458] sm:$0xff]  ;;  %v566_v22 = vld [vmem:[%s8218_s0 + $0x460] sm:$0xff]  ;;  %v439_v23 = vld [vmem:[%s8218_s0 + $0x68] sm:$0xff] }
  0x1d   : > { %5423 = vmatprep.mubr.msk.f32.mxu0 %vm690_vm1, %v430_v5  ;;  %v440_v24 = vld [vmem:[%s8218_s0 + $0x70] sm:$0xff]  ;;  %v567_v25 = vld [vmem:[%s8218_s0 + $0x468] sm:$0xff]  ;;  %v441_v27 = vld [vmem:[%s8218_s0 + $0x78] sm:$0xff] }
  0x1e   : > { %5619 = vmatmul.mubr.msk.f32.gmra.mrb[2].mxu1 %vm690_vm1, %v561_v13  ;;  %v568_v26 = vld [vmem:[%s8218_s0 + $0x470] sm:$0xff]  ;;  %v442_v28 = vld [vmem:[%s8218_s0 + $0x80] sm:$0xff]  ;;  %v569_v29 = vld [vmem:[%s8218_s0 + $0x478] sm:$0xff] }
  0x1f   : > { %5621 = vmatprep.mubr.msk.f32.mxu1 %vm690_vm1, %v562_v14  ;;  %v570_v30 = vld [vmem:[%s8218_s0 + $0x480] sm:$0xff]  ;;  %v443_v31 = vld [vmem:[%s8218_s0 + $0x88] sm:$0xff]  ;;  %v444_v32 = vld [vmem:[%s8218_s0 + $0x90] sm:$0xff] }
  0x20   : > { %5424 = vmatmul.mubr.msk.f32.gmra.mrb[4].mxu0 %vm690_vm1, %v431_v6  ;;  %v571_v33 = vld [vmem:[%s8218_s0 + $0x488] sm:$0xff]  ;;  %v572_v34 = vld [vmem:[%s8218_s0 + $0x490] sm:$0xff]  ;;  %v445_v35 = vld [vmem:[%s8218_s0 + $0x98] sm:$0xff] }
  0x21   : > { %5426 = vmatprep.mubr.msk.f32.mxu0 %vm690_vm1, %v432_v7  ;;  %v446_v36 = vld [vmem:[%s8218_s0 + $0xa0] sm:$0xff]  ;;  %v573_v37 = vld [vmem:[%s8218_s0 + $0x498] sm:$0xff]  ;;  %v447_v39 = vld [vmem:[%s8218_s0 + $0xa8] sm:$0xff] }
  0x22   : > { %5622 = vmatmul.mubr.msk.f32.gmra.mrb[4].mxu1 %vm690_vm1, %v563_v17  ;;  %v574_v38 = vld [vmem:[%s8218_s0 + $0x4a0] sm:$0xff]  ;;  %v448_v40 = vld [vmem:[%s8218_s0 + $0xb0] sm:$0xff]  ;;  %v575_v41 = vld [vmem:[%s8218_s0 + $0x4a8] sm:$0xff] }
  0x23   : > { %5624 = vmatprep.mubr.msk.f32.mxu1 %vm690_vm1, %v564_v18  ;;  %v576_v42 = vld [vmem:[%s8218_s0 + $0x4b0] sm:$0xff]  ;;  %v449_v43 = vld [vmem:[%s8218_s0 + $0xb8] sm:$0xff]  ;;  %v450_v44 = vld [vmem:[%s8218_s0 + $0xc0] sm:$0xff] }
  0x24   : > { %5427 = vmatmul.mubr.msk.f32.gmra.mrb[6].mxu0 %vm690_vm1, %v433_v9  ;;  %v577_v45 = vld [vmem:[%s8218_s0 + $0x4b8] sm:$0xff]  ;;  %v578_v46 = vld [vmem:[%s8218_s0 + $0x4c0] sm:$0xff]  ;;  %v451_v47 = vld [vmem:[%s8218_s0 + $0xc8] sm:$0xff] }
  0x25   : > { %5429 = vmatprep.mubr.msk.f32.mxu0 %vm690_vm1, %v434_v11  ;;  %v452_v48 = vld [vmem:[%s8218_s0 + $0xd0] sm:$0xff]  ;;  %v579_v49 = vld [vmem:[%s8218_s0 + $0x4c8] sm:$0xff]  ;;  %v453_v51 = vld [vmem:[%s8218_s0 + $0xd8] sm:$0xff] }
  0x26   : > { %5625 = vmatmul.mubr.msk.f32.gmra.mrb[6].mxu1 %vm690_vm1, %v565_v21  ;;  %v580_v50 = vld [vmem:[%s8218_s0 + $0x4d0] sm:$0xff]  ;;  %v454_v52 = vld [vmem:[%s8218_s0 + $0xe0] sm:$0xff]  ;;  %v581_v53 = vld [vmem:[%s8218_s0 + $0x4d8] sm:$0xff] }
  0x27   : > { %5627 = vmatprep.mubr.msk.f32.mxu1 %vm690_vm1, %v566_v22  ;;  %v582_v54 = vld [vmem:[%s8218_s0 + $0x4e0] sm:$0xff]  ;;  %v455_v55 = vld [vmem:[%s8218_s0 + $0xe8] sm:$0xff]  ;;  %v456_v56 = vld [vmem:[%s8218_s0 + $0xf0] sm:$0xff] }
  0x28   : > { %5430 = vmatmul.mubr.msk.f32.gmra.mrb[8].mxu0 %vm690_vm1, %v435_v15  ;;  %v583_v57 = vld [vmem:[%s8218_s0 + $0x4e8] sm:$0xff]  ;;  %v584_v58 = vld [vmem:[%s8218_s0 + $0x4f0] sm:$0xff]  ;;  %v457_v59 = vld [vmem:[%s8218_s0 + $0xf8] sm:$0xff] }
  0x29   : > { %5432 = vmatprep.mubr.msk.f32.mxu0 %vm690_vm1, %v436_v16  ;;  %v458_v60 = vld [vmem:[%s8218_s0 + $0x100] sm:$0xff]  ;;  %v585_v61 = vld [vmem:[%s8218_s0 + $0x4f8] sm:$0xff]  ;;  %v459_v63 = vld [vmem:[%s8218_s0 + $0x108] sm:$0xff] }
  0x2a   : > { %5628 = vmatmul.mubr.msk.f32.gmra.mrb[8].mxu1 %vm690_vm1, %v567_v25  ;;  %v586_v62 = vld [vmem:[%s8218_s0 + $0x500] sm:$0xff]  ;;  %v460_v0 = vld [vmem:[%s8218_s0 + $0x110] sm:$0xff]  ;;  %v587_v1 = vld [vmem:[%s8218_s0 + $0x508] sm:$0xff] }
  0x2b   : > { %5630 = vmatprep.mubr.msk.f32.mxu1 %vm690_vm1, %v568_v26  ;;  %v588_v2 = vld [vmem:[%s8218_s0 + $0x510] sm:$0xff]  ;;  %v461_v3 = vld [vmem:[%s8218_s0 + $0x118] sm:$0xff]  ;;  %v462_v4 = vld [vmem:[%s8218_s0 + $0x120] sm:$0xff] }
  0x2c   : > { %5433 = vmatmul.mubr.msk.f32.gmra.mrb[10].mxu0 %vm690_vm1, %v437_v19  ;;  %v589_v5 = vld [vmem:[%s8218_s0 + $0x518] sm:$0xff]  ;;  %v590_v6 = vld [vmem:[%s8218_s0 + $0x520] sm:$0xff]  ;;  %v463_v7 = vld [vmem:[%s8218_s0 + $0x128] sm:$0xff] }
  0x2d   : > { %5435 = vmatprep.mubr.msk.f32.mxu0 %vm690_vm1, %v438_v20  ;;  %v464_v8 = vld [vmem:[%s8218_s0 + $0x130] sm:$0xff]  ;;  %v591_v9 = vld [vmem:[%s8218_s0 + $0x528] sm:$0xff]  ;;  %v465_v11 = vld [vmem:[%s8218_s0 + $0x138] sm:$0xff] }
  0x2e   : > { %5631 = vmatmul.mubr.msk.f32.gmra.mrb[10].mxu1 %vm690_vm1, %v569_v29  ;;  %v592_v10 = vld [vmem:[%s8218_s0 + $0x530] sm:$0xff]  ;;  %v466_v12 = vld [vmem:[%s8218_s0 + $0x140] sm:$0xff]  ;;  %v593_v13 = vld [vmem:[%s8218_s0 + $0x538] sm:$0xff] }
  0x2f   : > { %5633 = vmatprep.mubr.msk.f32.mxu1 %vm690_vm1, %v570_v30  ;;  %v594_v14 = vld [vmem:[%s8218_s0 + $0x540] sm:$0xff]  ;;  %v467_v15 = vld [vmem:[%s8218_s0 + $0x148] sm:$0xff]  ;;  %v468_v16 = vld [vmem:[%s8218_s0 + $0x150] sm:$0xff] }
  0x30   : > { %5436 = vmatmul.mubr.msk.f32.gmra.mrb[12].mxu0 %vm690_vm1, %v439_v23  ;;  %v595_v17 = vld [vmem:[%s8218_s0 + $0x548] sm:$0xff]  ;;  %v596_v18 = vld [vmem:[%s8218_s0 + $0x550] sm:$0xff]  ;;  %v469_v19 = vld [vmem:[%s8218_s0 + $0x158] sm:$0xff] }
  0x31   : > { %5438 = vmatprep.mubr.msk.f32.mxu0 %vm690_vm1, %v440_v24  ;;  %v470_v20 = vld [vmem:[%s8218_s0 + $0x160] sm:$0xff]  ;;  %v597_v21 = vld [vmem:[%s8218_s0 + $0x558] sm:$0xff]  ;;  %v471_v23 = vld [vmem:[%s8218_s0 + $0x168] sm:$0xff] }
  0x32   : > { %5634 = vmatmul.mubr.msk.f32.gmra.mrb[12].mxu1 %vm690_vm1, %v571_v33  ;;  %v598_v22 = vld [vmem:[%s8218_s0 + $0x560] sm:$0xff]  ;;  %v472_v24 = vld [vmem:[%s8218_s0 + $0x170] sm:$0xff]  ;;  %v599_v25 = vld [vmem:[%s8218_s0 + $0x568] sm:$0xff] }
  0x33   : > { %5636 = vmatprep.mubr.msk.f32.mxu1 %vm690_vm1, %v572_v34  ;;  %v600_v26 = vld [vmem:[%s8218_s0 + $0x570] sm:$0xff]  ;;  %v601_v29 = vld [vmem:[%s8218_s0 + $0x578] sm:$0xff]  ;;  %v602_v30 = vld [vmem:[%s8218_s0 + $0x580] sm:$0xff] }
  0x34   : > { %5439 = vmatmul.mubr.msk.f32.gmra.mrb[14].mxu0 %vm690_vm1, %v441_v27  ;;  %v473_v27 = vld [vmem:[%s8218_s0 + $0x178] sm:$0xff]  ;;  %v603_v33 = vld [vmem:[%s8218_s0 + $0x588] sm:$0xff]  ;;  %v604_v34 = vld [vmem:[%s8218_s0 + $0x590] sm:$0xff] }
  0x35   : > { %5441 = vmatprep.mubr.msk.f32.mxu0 %vm690_vm1, %v442_v28  ;;  %v474_v28 = vld [vmem:[%s8218_s0 + $0x180] sm:$0xff] }
  0x36   : > { %5637 = vmatmul.mubr.msk.f32.gmra.mrb[14].mxu1 %vm690_vm1, %v573_v37  ;;  %v605_v37 = vld [vmem:[%s8218_s0 + $0x598] sm:$0xff] }
  0x37   : > { %5639 = vmatprep.mubr.msk.f32.mxu1 %vm690_vm1, %v574_v38  ;;  %v606_v38 = vld [vmem:[%s8218_s0 + $0x5a0] sm:$0xff] }
  0x38   : > { %5442 = vmatmul.mubr.msk.f32.gmra.mrb[16].mxu0 %vm690_vm1, %v443_v31  ;;  %v475_v31 = vld [vmem:[%s8218_s0 + $0x188] sm:$0xff] }
  0x39   : > { %5444 = vmatprep.mubr.msk.f32.mxu0 %vm690_vm1, %v444_v32  ;;  %v476_v32 = vld [vmem:[%s8218_s0 + $0x190] sm:$0xff] }
  0x3a   : > { %5640 = vmatmul.mubr.msk.f32.gmra.mrb[16].mxu1 %vm690_vm1, %v575_v41  ;;  %v607_v41 = vld [vmem:[%s8218_s0 + $0x5a8] sm:$0xff] }
  0x3b   : > { %5642 = vmatprep.mubr.msk.f32.mxu1 %vm690_vm1, %v576_v42  ;;  %v608_v42 = vld [vmem:[%s8218_s0 + $0x5b0] sm:$0xff] }
  0x3c   : > { %5445 = vmatmul.mubr.msk.f32.gmra.mrb[18].mxu0 %vm690_vm1, %v445_v35  ;;  %v477_v35 = vld [vmem:[%s8218_s0 + $0x198] sm:$0xff] }
  0x3d   : > { %5447 = vmatprep.mubr.msk.f32.mxu0 %vm690_vm1, %v446_v36  ;;  %v478_v36 = vld [vmem:[%s8218_s0 + $0x1a0] sm:$0xff] }
  0x3e   : > { %5643 = vmatmul.mubr.msk.f32.gmra.mrb[18].mxu1 %vm690_vm1, %v577_v45  ;;  %v609_v45 = vld [vmem:[%s8218_s0 + $0x5b8] sm:$0xff] }
  0x3f   : > { %5645 = vmatprep.mubr.msk.f32.mxu1 %vm690_vm1, %v578_v46  ;;  %v610_v46 = vld [vmem:[%s8218_s0 + $0x5c0] sm:$0xff] }
  0x40   : > { %5448 = vmatmul.mubr.msk.f32.gmra.mrb[20].mxu0 %vm690_vm1, %v447_v39  ;;  %v479_v39 = vld [vmem:[%s8218_s0 + $0x1a8] sm:$0xff] }
  0x41   : > { %5450 = vmatprep.mubr.msk.f32.mxu0 %vm690_vm1, %v448_v40  ;;  %v480_v40 = vld [vmem:[%s8218_s0 + $0x1b0] sm:$0xff] }
  0x42   : > { %5646 = vmatmul.mubr.msk.f32.gmra.mrb[20].mxu1 %vm690_vm1, %v579_v49  ;;  %v611_v49 = vld [vmem:[%s8218_s0 + $0x5c8] sm:$0xff] }
  0x43   : > { %5648 = vmatprep.mubr.msk.f32.mxu1 %vm690_vm1, %v580_v50  ;;  %v612_v50 = vld [vmem:[%s8218_s0 + $0x5d0] sm:$0xff] }
  0x44   : > { %5451 = vmatmul.mubr.msk.f32.gmra.mrb[22].mxu0 %vm690_vm1, %v449_v43  ;;  %v481_v43 = vld [vmem:[%s8218_s0 + $0x1b8] sm:$0xff] }
  0x45   : > { %5453 = vmatprep.mubr.msk.f32.mxu0 %vm690_vm1, %v450_v44  ;;  %v482_v44 = vld [vmem:[%s8218_s0 + $0x1c0] sm:$0xff] }
  0x46   : > { %5649 = vmatmul.mubr.msk.f32.gmra.mrb[22].mxu1 %vm690_vm1, %v581_v53  ;;  %v613_v53 = vld [vmem:[%s8218_s0 + $0x5d8] sm:$0xff] }
  0x47   : > { %5651 = vmatprep.mubr.msk.f32.mxu1 %vm690_vm1, %v582_v54  ;;  %v614_v54 = vld [vmem:[%s8218_s0 + $0x5e0] sm:$0xff] }
  0x48   : > { %5454 = vmatmul.mubr.msk.f32.gmra.mrb[24].mxu0 %vm690_vm1, %v451_v47  ;;  %v483_v47 = vld [vmem:[%s8218_s0 + $0x1c8] sm:$0xff] }
  0x49   : > { %5456 = vmatprep.mubr.msk.f32.mxu0 %vm690_vm1, %v452_v48  ;;  %v484_v48 = vld [vmem:[%s8218_s0 + $0x1d0] sm:$0xff] }
  0x4a   : > { %5652 = vmatmul.mubr.msk.f32.gmra.mrb[24].mxu1 %vm690_vm1, %v583_v57  ;;  %v615_v57 = vld [vmem:[%s8218_s0 + $0x5e8] sm:$0xff] }
  0x4b   : > { %5654 = vmatprep.mubr.msk.f32.mxu1 %vm690_vm1, %v584_v58  ;;  %v616_v58 = vld [vmem:[%s8218_s0 + $0x5f0] sm:$0xff] }
  0x4c   : > { %5457 = vmatmul.mubr.msk.f32.gmra.mrb[26].mxu0 %vm690_vm1, %v453_v51  ;;  %v485_v51 = vld [vmem:[%s8218_s0 + $0x1d8] sm:$0xff] }
  0x4d   : > { %5459 = vmatprep.mubr.msk.f32.mxu0 %vm690_vm1, %v454_v52  ;;  %v486_v52 = vld [vmem:[%s8218_s0 + $0x1e0] sm:$0xff] }
  0x4e   : > { %5655 = vmatmul.mubr.msk.f32.gmra.mrb[26].mxu1 %vm690_vm1, %v585_v61  ;;  %v617_v61 = vld [vmem:[%s8218_s0 + $0x5f8] sm:$0xff] }
  0x4f   : > { %5657 = vmatprep.mubr.msk.f32.mxu1 %vm690_vm1, %v586_v62  ;;  %v618_v62 = vld [vmem:[%s8218_s0 + $0x600] sm:$0xff] }
  0x50   : > { %5460 = vmatmul.mubr.msk.f32.gmra.mrb[28].mxu0 %vm690_vm1, %v455_v55  ;;  %v487_v55 = vld [vmem:[%s8218_s0 + $0x1e8] sm:$0xff] }
  0x51   : > { %5462 = vmatprep.mubr.msk.f32.mxu0 %vm690_vm1, %v456_v56  ;;  %v488_v56 = vld [vmem:[%s8218_s0 + $0x1f0] sm:$0xff] }
  0x52   : > { %5658 = vmatmul.mubr.msk.f32.gmra.mrb[28].mxu1 %vm690_vm1, %v587_v1  ;;  %v619_v1 = vld [vmem:[%s8218_s0 + $0x608] sm:$0xff] }
  0x53   : > { %5660 = vmatprep.mubr.msk.f32.mxu1 %vm690_vm1, %v588_v2  ;;  %v620_v2 = vld [vmem:[%s8218_s0 + $0x610] sm:$0xff] }
  0x54   : > { %5463 = vmatmul.mubr.msk.f32.gmra.mrb[30].mxu0 %vm690_vm1, %v457_v59  ;;  %v489_v59 = vld [vmem:[%s8218_s0 + $0x1f8] sm:$0xff] }
  0x55   : > { %5465 = vmatprep.mubr.msk.f32.mxu0 %vm690_vm1, %v458_v60  ;;  %v490_v60 = vld [vmem:[%s8218_s0 + $0x200] sm:$0xff] }
  0x56   : > { %5661 = vmatmul.mubr.msk.f32.gmra.mrb[30].mxu1 %vm690_vm1, %v589_v5  ;;  %v621_v5 = vld [vmem:[%s8218_s0 + $0x618] sm:$0xff] }
  0x57   : > { %5663 = vmatprep.mubr.msk.f32.mxu1 %vm690_vm1, %v590_v6  ;;  %v622_v6 = vld [vmem:[%s8218_s0 + $0x620] sm:$0xff] }
  0x58   : > { %5466 = vmatmul.mubr.msk.f32.gmra.mrb[32].mxu0 %vm690_vm1, %v459_v63  ;;  %v491_v63 = vld [vmem:[%s8218_s0 + $0x208] sm:$0xff] }
  0x59   : > { %5468 = vmatprep.mubr.msk.f32.mxu0 %vm690_vm1, %v460_v0  ;;  %v492_v0 = vld [vmem:[%s8218_s0 + $0x210] sm:$0xff] }
  0x5a   : > { %5664 = vmatmul.mubr.msk.f32.gmra.mrb[32].mxu1 %vm690_vm1, %v591_v9  ;;  %v623_v9 = vld [vmem:[%s8218_s0 + $0x628] sm:$0xff] }
  0x5b   : > { %5666 = vmatprep.mubr.msk.f32.mxu1 %vm690_vm1, %v592_v10  ;;  %v624_v10 = vld [vmem:[%s8218_s0 + $0x630] sm:$0xff] }
  0x5c   : > { %5469 = vmatmul.mubr.msk.f32.gmra.mrb[34].mxu0 %vm690_vm1, %v461_v3  ;;  %v493_v3 = vld [vmem:[%s8218_s0 + $0x218] sm:$0xff] }
  0x5d   : > { %5471 = vmatprep.mubr.msk.f32.mxu0 %vm690_vm1, %v462_v4  ;;  %v494_v4 = vld [vmem:[%s8218_s0 + $0x220] sm:$0xff] }
  0x5e   : > { %5667 = vmatmul.mubr.msk.f32.gmra.mrb[34].mxu1 %vm690_vm1, %v593_v13  ;;  %v625_v13 = vld [vmem:[%s8218_s0 + $0x638] sm:$0xff] }
  0x5f   : > { %5669 = vmatprep.mubr.msk.f32.mxu1 %vm690_vm1, %v594_v14  ;;  %v626_v14 = vld [vmem:[%s8218_s0 + $0x640] sm:$0xff] }
  0x60   : > { %5472 = vmatmul.mubr.msk.f32.gmra.mrb[36].mxu0 %vm690_vm1, %v463_v7  ;;  %v495_v7 = vld [vmem:[%s8218_s0 + $0x228] sm:$0xff] }
  0x61   : > { %5474 = vmatprep.mubr.msk.f32.mxu0 %vm690_vm1, %v464_v8  ;;  %v496_v8 = vld [vmem:[%s8218_s0 + $0x230] sm:$0xff] }
  0x62   : > { %5670 = vmatmul.mubr.msk.f32.gmra.mrb[36].mxu1 %vm690_vm1, %v595_v17  ;;  %v627_v17 = vld [vmem:[%s8218_s0 + $0x648] sm:$0xff] }
  0x63   : > { %5672 = vmatprep.mubr.msk.f32.mxu1 %vm690_vm1, %v596_v18  ;;  %v628_v18 = vld [vmem:[%s8218_s0 + $0x650] sm:$0xff] }
  0x64   : > { %5475 = vmatmul.mubr.msk.f32.gmra.mrb[38].mxu0 %vm690_vm1, %v465_v11  ;;  %v497_v11 = vld [vmem:[%s8218_s0 + $0x238] sm:$0xff] }
  0x65   : > { %5477 = vmatprep.mubr.msk.f32.mxu0 %vm690_vm1, %v466_v12  ;;  %v498_v12 = vld [vmem:[%s8218_s0 + $0x240] sm:$0xff] }
  0x66   : > { %5673 = vmatmul.mubr.msk.f32.gmra.mrb[38].mxu1 %vm690_vm1, %v597_v21  ;;  %v629_v21 = vld [vmem:[%s8218_s0 + $0x658] sm:$0xff] }
  0x67   : > { %5675 = vmatprep.mubr.msk.f32.mxu1 %vm690_vm1, %v598_v22  ;;  %v630_v22 = vld [vmem:[%s8218_s0 + $0x660] sm:$0xff] }
  0x68   : > { %5478 = vmatmul.mubr.msk.f32.gmra.mrb[40].mxu0 %vm690_vm1, %v467_v15  ;;  %v499_v15 = vld [vmem:[%s8218_s0 + $0x248] sm:$0xff] }
  0x69   : > { %5480 = vmatprep.mubr.msk.f32.mxu0 %vm690_vm1, %v468_v16  ;;  %v500_v16 = vld [vmem:[%s8218_s0 + $0x250] sm:$0xff] }
  0x6a   : > { %5676 = vmatmul.mubr.msk.f32.gmra.mrb[40].mxu1 %vm690_vm1, %v599_v25  ;;  %v631_v25 = vld [vmem:[%s8218_s0 + $0x668] sm:$0xff] }
  0x6b   : > { %5678 = vmatprep.mubr.msk.f32.mxu1 %vm690_vm1, %v600_v26  ;;  %v632_v26 = vld [vmem:[%s8218_s0 + $0x670] sm:$0xff] }
  0x6c   : > { %5481 = vmatmul.mubr.msk.f32.gmra.mrb[42].mxu0 %vm690_vm1, %v469_v19  ;;  %v501_v19 = vld [vmem:[%s8218_s0 + $0x258] sm:$0xff] }
  0x6d   : > { %5483 = vmatprep.mubr.msk.f32.mxu0 %vm690_vm1, %v470_v20  ;;  %v502_v20 = vld [vmem:[%s8218_s0 + $0x260] sm:$0xff] }
  0x6e   : > { %5679 = vmatmul.mubr.msk.f32.gmra.mrb[42].mxu1 %vm690_vm1, %v601_v29  ;;  %v633_v29 = vld [vmem:[%s8218_s0 + $0x678] sm:$0xff] }
  0x6f   : > { %5681 = vmatprep.mubr.msk.f32.mxu1 %vm690_vm1, %v602_v30  ;;  %v634_v30 = vld [vmem:[%s8218_s0 + $0x680] sm:$0xff] }
  0x70   : > { %5484 = vmatmul.mubr.msk.f32.gmra.mrb[44].mxu0 %vm690_vm1, %v471_v23  ;;  %v503_v23 = vld [vmem:[%s8218_s0 + $0x268] sm:$0xff] }
  0x71   : > { %5486 = vmatprep.mubr.msk.f32.mxu0 %vm690_vm1, %v472_v24  ;;  %v504_v24 = vld [vmem:[%s8218_s0 + $0x270] sm:$0xff] }
  0x72   : > { %5682 = vmatmul.mubr.msk.f32.gmra.mrb[44].mxu1 %vm690_vm1, %v603_v33  ;;  %v635_v33 = vld [vmem:[%s8218_s0 + $0x688] sm:$0xff] }
  0x73   : > { %5684 = vmatprep.mubr.msk.f32.mxu1 %vm690_vm1, %v604_v34  ;;  %v636_v34 = vld [vmem:[%s8218_s0 + $0x690] sm:$0xff] }
  0x74   : > { %5487 = vmatmul.mubr.msk.f32.gmra.mrb[46].mxu0 %vm690_vm1, %v473_v27  ;;  %v505_v27 = vld [vmem:[%s8218_s0 + $0x278] sm:$0xff] }
  0x75   : > { %5489 = vmatprep.mubr.msk.f32.mxu0 %vm690_vm1, %v474_v28  ;;  %v506_v28 = vld [vmem:[%s8218_s0 + $0x280] sm:$0xff] }
  0x76   : > { %5685 = vmatmul.mubr.msk.f32.gmra.mrb[46].mxu1 %vm690_vm1, %v605_v37  ;;  %v637_v37 = vld [vmem:[%s8218_s0 + $0x698] sm:$0xff] }
  0x77   : > { %5687 = vmatprep.mubr.msk.f32.mxu1 %vm690_vm1, %v606_v38  ;;  %v638_v38 = vld [vmem:[%s8218_s0 + $0x6a0] sm:$0xff] }
  0x78   : > { %5490 = vmatmul.mubr.msk.f32.gmra.mrb[48].mxu0 %vm690_vm1, %v475_v31  ;;  %v507_v31 = vld [vmem:[%s8218_s0 + $0x288] sm:$0xff] }
  0x79   : > { %5492 = vmatprep.mubr.msk.f32.mxu0 %vm690_vm1, %v476_v32  ;;  %v508_v32 = vld [vmem:[%s8218_s0 + $0x290] sm:$0xff] }
  0x7a   : > { %5688 = vmatmul.mubr.msk.f32.gmra.mrb[48].mxu1 %vm690_vm1, %v607_v41  ;;  %v639_v41 = vld [vmem:[%s8218_s0 + $0x6a8] sm:$0xff] }
  0x7b   : > { %5690 = vmatprep.mubr.msk.f32.mxu1 %vm690_vm1, %v608_v42  ;;  %v640_v42 = vld [vmem:[%s8218_s0 + $0x6b0] sm:$0xff] }
  0x7c   : > { %5493 = vmatmul.mubr.msk.f32.gmra.mrb[50].mxu0 %vm690_vm1, %v477_v35  ;;  %v509_v35 = vld [vmem:[%s8218_s0 + $0x298] sm:$0xff] }
  0x7d   : > { %5495 = vmatprep.mubr.msk.f32.mxu0 %vm690_vm1, %v478_v36  ;;  %v510_v36 = vld [vmem:[%s8218_s0 + $0x2a0] sm:$0xff] }
  0x7e   : > { %5691 = vmatmul.mubr.msk.f32.gmra.mrb[50].mxu1 %vm690_vm1, %v609_v45  ;;  %v641_v45 = vld [vmem:[%s8218_s0 + $0x6b8] sm:$0xff] }
  0x7f   : > { %5693 = vmatprep.mubr.msk.f32.mxu1 %vm690_vm1, %v610_v46  ;;  %v642_v46 = vld [vmem:[%s8218_s0 + $0x6c0] sm:$0xff] }
  0x80   : > { %5496 = vmatmul.mubr.msk.f32.gmra.mrb[52].mxu0 %vm690_vm1, %v479_v39  ;;  %v511_v39 = vld [vmem:[%s8218_s0 + $0x2a8] sm:$0xff] }
  0x81   : > { %5498 = vmatprep.mubr.msk.f32.mxu0 %vm690_vm1, %v480_v40  ;;  %v512_v40 = vld [vmem:[%s8218_s0 + $0x2b0] sm:$0xff] }
  0x82   : > { %5694 = vmatmul.mubr.msk.f32.gmra.mrb[52].mxu1 %vm690_vm1, %v611_v49  ;;  %v643_v49 = vld [vmem:[%s8218_s0 + $0x6c8] sm:$0xff] }
  0x83   : > { %5696 = vmatprep.mubr.msk.f32.mxu1 %vm690_vm1, %v612_v50  ;;  %v644_v50 = vld [vmem:[%s8218_s0 + $0x6d0] sm:$0xff] }
  0x84   : > { %5499 = vmatmul.mubr.msk.f32.gmra.mrb[54].mxu0 %vm690_vm1, %v481_v43  ;;  %v513_v43 = vld [vmem:[%s8218_s0 + $0x2b8] sm:$0xff] }
  0x85   : > { %5501 = vmatprep.mubr.msk.f32.mxu0 %vm690_vm1, %v482_v44  ;;  %v514_v44 = vld [vmem:[%s8218_s0 + $0x2c0] sm:$0xff] }
  0x86   : > { %5697 = vmatmul.mubr.msk.f32.gmra.mrb[54].mxu1 %vm690_vm1, %v613_v53  ;;  %v645_v53 = vld [vmem:[%s8218_s0 + $0x6d8] sm:$0xff] }
  0x87   : > { %5699 = vmatprep.mubr.msk.f32.mxu1 %vm690_vm1, %v614_v54  ;;  %v646_v54 = vld [vmem:[%s8218_s0 + $0x6e0] sm:$0xff] }
  0x88   : > { %5502 = vmatmul.mubr.msk.f32.gmra.mrb[56].mxu0 %vm690_vm1, %v483_v47  ;;  %v515_v47 = vld [vmem:[%s8218_s0 + $0x2c8] sm:$0xff] }
  0x89   : > { %5504 = vmatprep.mubr.msk.f32.mxu0 %vm690_vm1, %v484_v48  ;;  %v516_v48 = vld [vmem:[%s8218_s0 + $0x2d0] sm:$0xff] }
  0x8a   : > { %5700 = vmatmul.mubr.msk.f32.gmra.mrb[56].mxu1 %vm690_vm1, %v615_v57  ;;  %v647_v57 = vld [vmem:[%s8218_s0 + $0x6e8] sm:$0xff] }
  0x8b   : > { %5702 = vmatprep.mubr.msk.f32.mxu1 %vm690_vm1, %v616_v58  ;;  %v648_v58 = vld [vmem:[%s8218_s0 + $0x6f0] sm:$0xff] }
  0x8c   : > { %5505 = vmatmul.mubr.msk.f32.gmra.mrb[58].mxu0 %vm690_vm1, %v485_v51  ;;  %v517_v51 = vld [vmem:[%s8218_s0 + $0x2d8] sm:$0xff] }
  0x8d   : > { %5507 = vmatprep.mubr.msk.f32.mxu0 %vm690_vm1, %v486_v52  ;;  %v518_v52 = vld [vmem:[%s8218_s0 + $0x2e0] sm:$0xff] }
  0x8e   : > { %5703 = vmatmul.mubr.msk.f32.gmra.mrb[58].mxu1 %vm690_vm1, %v617_v61  ;;  %v522_v61 = vld [vmem:[%s8218_s0 + $0x300] sm:$0xff] }
  0x8f   : > { %5705 = vmatprep.mubr.msk.f32.mxu1 %vm690_vm1, %v618_v62  ;;  %v3626_v62 = vld [vmem:[%s8221_s3] sm:$0xff] }
  0x90   : > { %5508 = vmatmul.mubr.msk.f32.gmra.mrb[60].mxu0 %vm690_vm1, %v487_v55  ;;  %v519_v55 = vld [vmem:[%s8218_s0 + $0x2e8] sm:$0xff] }
  0x91   : > { %5510 = vmatprep.mubr.msk.f32.mxu0 %vm690_vm1, %v488_v56  ;;  %v520_v56 = vld [vmem:[%s8218_s0 + $0x2f0] sm:$0xff] }
  0x92   : > { %5706 = vmatmul.mubr.msk.f32.gmra.mrb[60].mxu1 %vm690_vm1, %v619_v1 }
  0x93   : > { %5708 = vmatprep.mubr.msk.f32.mxu1 %vm690_vm1, %v620_v2  ;;  %v650_v2 = vld [vmem:[%s8218_s0 + $0x700] sm:$0xff] }
  0x94   : > { %5511 = vmatmul.mubr.msk.f32.gmra.mrb[62].mxu0 %vm690_vm1, %v489_v59  ;;  %v521_v59 = vld [vmem:[%s8218_s0 + $0x2f8] sm:$0xff] }
  0x95   : > { %5513 = vmatprep.mubr.msk.f32.mxu0 %vm690_vm1, %v490_v60  ;;  %v6060_v60 = vmov 0.0|0.0  }
  0x96   : > { %5709 = vmatmul.mubr.msk.f32.gmra.mrb[62].mxu1 %vm690_vm1, %v621_v5  ;;  %5916 = vmatprep.subr.bf16.mxu1 %v6060_v60  ;;  %v651_v5 = vld [vmem:[%s8218_s0 + $0x708] sm:$0xff] }
  0x97   : > { %5711 = vmatprep.mubr.msk.f32.mxu1 %vm690_vm1, %v622_v6  ;;  %v652_v6 = vld [vmem:[%s8218_s0 + $0x710] sm:$0xff] }
  0x98   : > { %5514 = vmatmul.mubr.msk.f32.gmra.mrb[64].mxu0 %vm690_vm1, %v491_v63  ;;  %v3627_v63 = vld [vmem:[%s8221_s3 + $0x8] sm:$0xff] }
  0x99   : > { %5516 = vmatprep.mubr.msk.f32.mxu0 %vm690_vm1, %v492_v0  ;;  %v649_v0 = vld [vmem:[%s8218_s0 + $0x6f8] sm:$0xff]  ;;  %v5917_v1 = vpack.c.bf16 %v3627_v63, %v3626_v62 }
  0x9a   : > { %5712 = vmatmul.mubr.msk.f32.gmra.mrb[64].mxu1 %vm690_vm1, %v623_v9  ;;  %v653_v9 = vld [vmem:[%s8218_s0 + $0x718] sm:$0xff] }
  0x9b   : > { %5714 = vmatprep.mubr.msk.f32.mxu1 %vm690_vm1, %v624_v10  ;;  %5918 = vmatpush3.bf16.msra.mxu1 %v5917_v1  ;;  %v654_v10 = vld [vmem:[%s8218_s0 + $0x720] sm:$0xff] }
  0x9c   : > { %5517 = vmatmul.mubr.msk.f32.gmra.mrb[66].mxu0 %vm690_vm1, %v493_v3  ;;  %v523_v3 = vld [vmem:[%s8218_s0 + $0x308] sm:$0xff]  ;;  %5919 = vmatprep.subr.bf16.mxu1 %v6060_v60 }
  0x9d   : > { %5519 = vmatprep.mubr.msk.f32.mxu0 %vm690_vm1, %v494_v4  ;;  %v524_v4 = vld [vmem:[%s8218_s0 + $0x310] sm:$0xff] }
  0x9e   : > { %5715 = vmatmul.mubr.msk.f32.gmra.mrb[66].mxu1 %vm690_vm1, %v625_v13  ;;  %v655_v13 = vld [vmem:[%s8218_s0 + $0x728] sm:$0xff] }
  0x9f   : > { %5717 = vmatprep.mubr.msk.f32.mxu1 %vm690_vm1, %v626_v14  ;;  %v656_v14 = vld [vmem:[%s8218_s0 + $0x730] sm:$0xff] }
  0xa0   : > { %5520 = vmatmul.mubr.msk.f32.gmra.mrb[68].mxu0 %vm690_vm1, %v495_v7  ;;  %v525_v7 = vld [vmem:[%s8218_s0 + $0x318] sm:$0xff] }
  0xa1   : > { %5522 = vmatprep.mubr.msk.f32.mxu0 %vm690_vm1, %v496_v8  ;;  %v526_v8 = vld [vmem:[%s8218_s0 + $0x320] sm:$0xff] }
  0xa2   : > { %5718 = vmatmul.mubr.msk.f32.gmra.mrb[68].mxu1 %vm690_vm1, %v627_v17  ;;  %v657_v17 = vld [vmem:[%s8218_s0 + $0x738] sm:$0xff] }
  0xa3   : > { %5720 = vmatprep.mubr.msk.f32.mxu1 %vm690_vm1, %v628_v18  ;;  %v658_v18 = vld [vmem:[%s8218_s0 + $0x740] sm:$0xff] }
  0xa4   : > { %5523 = vmatmul.mubr.msk.f32.gmra.mrb[70].mxu0 %vm690_vm1, %v497_v11  ;;  %v527_v11 = vld [vmem:[%s8218_s0 + $0x328] sm:$0xff] }
  0xa5   : > { %5525 = vmatprep.mubr.msk.f32.mxu0 %vm690_vm1, %v498_v12  ;;  %v528_v12 = vld [vmem:[%s8218_s0 + $0x330] sm:$0xff] }
  0xa6   : > { %5721 = vmatmul.mubr.msk.f32.gmra.mrb[70].mxu1 %vm690_vm1, %v629_v21  ;;  %v659_v21 = vld [vmem:[%s8218_s0 + $0x748] sm:$0xff] }
  0xa7   : > { %5723 = vmatprep.mubr.msk.f32.mxu1 %vm690_vm1, %v630_v22  ;;  %v660_v22 = vld [vmem:[%s8218_s0 + $0x750] sm:$0xff] }
  0xa8   : > { %5526 = vmatmul.mubr.msk.f32.gmra.mrb[72].mxu0 %vm690_vm1, %v499_v15  ;;  %v529_v15 = vld [vmem:[%s8218_s0 + $0x338] sm:$0xff] }
  0xa9   : > { %5528 = vmatprep.mubr.msk.f32.mxu0 %vm690_vm1, %v500_v16  ;;  %v530_v16 = vld [vmem:[%s8218_s0 + $0x340] sm:$0xff] }
  0xaa   : > { %5724 = vmatmul.mubr.msk.f32.gmra.mrb[72].mxu1 %vm690_vm1, %v631_v25  ;;  %v534_v25 = vld [vmem:[%s8218_s0 + $0x360] sm:$0xff] }
  0xab   : > { %5726 = vmatprep.mubr.msk.f32.mxu1 %vm690_vm1, %v632_v26 }
  0xac   : > { %5529 = vmatmul.mubr.msk.f32.gmra.mrb[74].mxu0 %vm690_vm1, %v501_v19  ;;  %v531_v19 = vld [vmem:[%s8218_s0 + $0x348] sm:$0xff] }
  0xad   : > { %5531 = vmatprep.mubr.msk.f32.mxu0 %vm690_vm1, %v502_v20  ;;  %v532_v20 = vld [vmem:[%s8218_s0 + $0x350] sm:$0xff] }
  0xae   : > { %5727 = vmatmul.mubr.msk.f32.gmra.mrb[74].mxu1 %vm690_vm1, %v633_v29 }
  0xaf   : > { %5729 = vmatprep.mubr.msk.f32.mxu1 %vm690_vm1, %v634_v30  ;;  %v662_v30 = vld [vmem:[%s8218_s0 + $0x760] sm:$0xff] }
  0xb0   : > { %5532 = vmatmul.mubr.msk.f32.gmra.mrb[76].mxu0 %vm690_vm1, %v503_v23  ;;  %v7019_v23 = vld [vmem:[%s8220_s2] ss:$0 sm:$0xff] }
  0xb1   : > { %5534 = vmatprep.mubr.msk.f32.mxu0 %vm690_vm1, %v504_v24  ;;  %v533_v24 = vld [vmem:[%s8218_s0 + $0x358] sm:$0xff] }
  0xb2   : > { %5730 = vmatmul.mubr.msk.f32.gmra.mrb[76].mxu1 %vm690_vm1, %v635_v33 }
  0xb3   : > { %5732 = vmatprep.mubr.msk.f32.mxu1 %vm690_vm1, %v636_v34  ;;  %v536_v34 = vld [vmem:[%s8218_s0 + $0x370] sm:$0xff] }
  0xb4   : > { %5535 = vmatmul.mubr.msk.f32.gmra.mrb[78].mxu0 %vm690_vm1, %v505_v27  ;;  %v661_v27 = vld [vmem:[%s8218_s0 + $0x758] sm:$0xff] }
  0xb5   : > { %5537 = vmatprep.mubr.msk.f32.mxu0 %vm690_vm1, %v506_v28 }
  0xb6   : > { %5733 = vmatmul.mubr.msk.f32.gmra.mrb[78].mxu1 %vm690_vm1, %v637_v37  ;;  %v663_v37 = vld [vmem:[%s8218_s0 + $0x768] sm:$0xff] }
  0xb7   : > { %5735 = vmatprep.mubr.msk.f32.mxu1 %vm690_vm1, %v638_v38 }
  0xb8   : > { %5538 = vmatmul.mubr.msk.f32.gmra.mrb[80].mxu0 %vm690_vm1, %v507_v31 }
  0xb9   : > { %5540 = vmatprep.mubr.msk.f32.mxu0 %vm690_vm1, %v508_v32  ;;  %v535_v32 = vld [vmem:[%s8218_s0 + $0x368] sm:$0xff] }
  0xba   : > { %5736 = vmatmul.mubr.msk.f32.gmra.mrb[80].mxu1 %vm690_vm1, %v639_v41  ;;  %v664_v41 = vld [vmem:[%s8218_s0 + $0x770] sm:$0xff] }
  0xbb   : > { %5738 = vmatprep.mubr.msk.f32.mxu1 %vm690_vm1, %v640_v42 }
  0xbc   : > { %5541 = vmatmul.mubr.msk.f32.gmra.mrb[82].mxu0 %vm690_vm1, %v509_v35 }
  0xbd   : > { %5543 = vmatprep.mubr.msk.f32.mxu0 %vm690_vm1, %v510_v36 }
  0xbe   : > { %5739 = vmatmul.mubr.msk.f32.gmra.mrb[82].mxu1 %vm690_vm1, %v641_v45 }
  0xbf   : > { %5741 = vmatprep.mubr.msk.f32.mxu1 %vm690_vm1, %v642_v46  ;;  %v538_v46 = vld [vmem:[%s8218_s0 + $0x380] sm:$0xff] }
  0xc0   : > { %5544 = vmatmul.mubr.msk.f32.gmra.mrb[84].mxu0 %vm690_vm1, %v511_v39 }
  0xc1   : > { %5546 = vmatprep.mubr.msk.f32.mxu0 %vm690_vm1, %v512_v40 }
  0xc2   : > { %5742 = vmatmul.mubr.msk.f32.gmra.mrb[84].mxu1 %vm690_vm1, %v643_v49 }
  0xc3   : > { %5744 = vmatprep.mubr.msk.f32.mxu1 %vm690_vm1, %v644_v50  ;;  %v665_v50 = vld [vmem:[%s8218_s0 + $0x778] sm:$0xff] }
  0xc4   : > { %5547 = vmatmul.mubr.msk.f32.gmra.mrb[86].mxu0 %vm690_vm1, %v513_v43 }
  0xc5   : > { %5549 = vmatprep.mubr.msk.f32.mxu0 %vm690_vm1, %v514_v44  ;;  %v537_v44 = vld [vmem:[%s8218_s0 + $0x378] sm:$0xff] }
  0xc6   : > { %5745 = vmatmul.mubr.msk.f32.gmra.mrb[86].mxu1 %vm690_vm1, %v645_v53  ;;  %v666_v53 = vld [vmem:[%s8218_s0 + $0x780] sm:$0xff] }
  0xc7   : > { %5747 = vmatprep.mubr.msk.f32.mxu1 %vm690_vm1, %v646_v54 }
  0xc8   : > { %5550 = vmatmul.mubr.msk.f32.gmra.mrb[88].mxu0 %vm690_vm1, %v515_v47 }
  0xc9   : > { %5552 = vmatprep.mubr.msk.f32.mxu0 %vm690_vm1, %v516_v48 }
  0xca   : > { %5748 = vmatmul.mubr.msk.f32.gmra.mrb[88].mxu1 %vm690_vm1, %v647_v57 }
  0xcb   : > { %5750 = vmatprep.mubr.msk.f32.mxu1 %vm690_vm1, %v648_v58 }
  0xcc   : > { %5553 = vmatmul.mubr.msk.f32.gmra.mrb[90].mxu0 %vm690_vm1, %v517_v51 }
  0xcd   : > { %5555 = vmatprep.mubr.msk.f32.mxu0 %vm690_vm1, %v518_v52 }
  0xce   : > { %5751 = vmatmul.mubr.msk.f32.gmra.mrb[90].mxu1 %vm690_vm1, %v649_v0 }
  0xcf   : > { %5753 = vmatprep.mubr.msk.f32.mxu1 %vm690_vm1, %v650_v2  ;;  %v667_v2 = vld [vmem:[%s8218_s0 + $0x788] sm:$0xff] }
  0xd0   : > { %5556 = vmatmul.mubr.msk.f32.gmra.mrb[92].mxu0 %vm690_vm1, %v519_v55 }
  0xd1   : > { %5558 = vmatprep.mubr.msk.f32.mxu0 %vm690_vm1, %v520_v56  ;;  %v539_v56 = vld [vmem:[%s8218_s0 + $0x388] sm:$0xff] }
  0xd2   : > { %5754 = vmatmul.mubr.msk.f32.gmra.mrb[92].mxu1 %vm690_vm1, %v651_v5 }
  0xd3   : > { %5756 = vmatprep.mubr.msk.f32.mxu1 %vm690_vm1, %v652_v6  ;;  %v668_v6 = vld [vmem:[%s8218_s0 + $0x790] sm:$0xff] }
  0xd4   : > { %5559 = vmatmul.mubr.msk.f32.gmra.mrb[94].mxu0 %vm690_vm1, %v521_v59  ;;  %v540_v59 = vld [vmem:[%s8218_s0 + $0x390] sm:$0xff] }
  0xd5   : > { %5561 = vmatprep.mubr.msk.f32.mxu0 %vm690_vm1, %v522_v61 }
  0xd6   : > { %5757 = vmatmul.mubr.msk.f32.gmra.mrb[94].mxu1 %vm690_vm1, %v653_v9  ;;  %v541_v9 = vld [vmem:[%s8218_s0 + $0x398] sm:$0xff] }
  0xd7   : > { %5759 = vmatprep.mubr.msk.f32.mxu1 %vm690_vm1, %v654_v10 }
  0xd8   : > { %5562 = vmatmul.mubr.msk.f32.gmra.mrb[96].mxu0 %vm690_vm1, %v523_v3 }
  0xd9   : > { %5564 = vmatprep.mubr.msk.f32.mxu0 %vm690_vm1, %v524_v4 }
  0xda   : > { %5760 = vmatmul.mubr.msk.f32.gmra.mrb[96].mxu1 %vm690_vm1, %v655_v13 }
  0xdb   : > { %5762 = vmatprep.mubr.msk.f32.mxu1 %vm690_vm1, %v656_v14 }
  0xdc   : > { %5565 = vmatmul.mubr.msk.f32.gmra.mrb[98].mxu0 %vm690_vm1, %v525_v7 }
  0xdd   : > { %5567 = vmatprep.mubr.msk.f32.mxu0 %vm690_vm1, %v526_v8 }
  0xde   : > { %5763 = vmatmul.mubr.msk.f32.gmra.mrb[98].mxu1 %vm690_vm1, %v657_v17 }
  0xdf   : > { %5765 = vmatprep.mubr.msk.f32.mxu1 %vm690_vm1, %v658_v18  ;;  %v669_v18 = vld [vmem:[%s8218_s0 + $0x798] sm:$0xff] }
  0xe0   : > { %5568 = vmatmul.mubr.msk.f32.gmra.mrb[100].mxu0 %vm690_vm1, %v527_v11 }
  0xe1   : > { %5570 = vmatprep.mubr.msk.f32.mxu0 %vm690_vm1, %v528_v12  ;;  %v542_v12 = vld [vmem:[%s8218_s0 + $0x3a0] sm:$0xff] }
  0xe2   : > { %5766 = vmatmul.mubr.msk.f32.gmra.mrb[100].mxu1 %vm690_vm1, %v659_v21 }
  0xe3   : > { %5768 = vmatprep.mubr.msk.f32.mxu1 %vm690_vm1, %v660_v22  ;;  %v670_v22 = vld [vmem:[%s8218_s0 + $0x7a0] sm:$0xff] }
  0xe4   : > { %5571 = vmatmul.mubr.msk.f32.gmra.mrb[102].mxu0 %vm690_vm1, %v529_v15 }
  0xe5   : > { %5573 = vmatprep.mubr.msk.f32.mxu0 %vm690_vm1, %v530_v16 }
  0xe6   : > { %5769 = vmatmul.mubr.msk.f32.gmra.mrb[102].mxu1 %vm690_vm1, %v661_v27 }
  0xe7   : > { %5771 = vmatprep.mubr.msk.f32.mxu1 %vm690_vm1, %v662_v30 }
  0xe8   : > { %5574 = vmatmul.mubr.msk.f32.gmra.mrb[104].mxu0 %vm690_vm1, %v531_v19 }
  0xe9   : > { %5576 = vmatprep.mubr.msk.f32.mxu0 %vm690_vm1, %v532_v20 }
  0xea   : > { %5772 = vmatmul.mubr.msk.f32.gmra.mrb[104].mxu1 %vm690_vm1, %v663_v37 }
  0xeb   : > { %v5419_v26 = vpop.f32.mrb[0].mxu0  ;;  %5774 = vmatprep.mubr.msk.f32.mxu1 %vm690_vm1, %v664_v41 }
  0xec   : > { %v1535_v28 = vadd.f32 %v5419_v26, %v7019_v23  ;;  %v1529_v29 = vpop.f32.mrb[1].mxu0  ;;  %5577 = vmatmul.mubr.msk.f32.gmra.mrb[106].mxu0 %vm690_vm1, %v533_v24  ;;  %v543_v26 = vld [vmem:[%s8218_s0 + $0x3a8] sm:$0xff] }
  0xed   : > { %v1530_v31 = vadd.f32 %v7019_v23, %v1529_v29  ;;  %5579 = vmatprep.mubr.msk.f32.mxu0 %vm690_vm1, %v534_v25  ;;  %v7082_v57 = vpop.f32.mrb[0].mxu1  ;;  %v544_v29 = vld [vmem:[%s8218_s0 + $0x3b0] sm:$0xff] }
  0xee   : > { %v2809_v33 = vmax.f32 %v1535_v28, 0.0  ;;  %5775 = vmatmul.mubr.msk.f32.gmra.mrb[106].mxu1 %vm690_vm1, %v665_v50  ;;  %v7088_v61 = vpop.f32.mrb[1].mxu1 }
  0xef   : > { %v2808_v35 = vmax.f32 %v1530_v31, 0.0  ;;  %v5422_v36 = vpop.f32.mrb[2].mxu0  ;;  %5777 = vmatprep.mubr.msk.f32.mxu1 %vm690_vm1, %v666_v53 }
  0xf0   : > { %v3066_v38 = vsel %vm3064_vm2, %v2809_v33, 0.0  ;;  %v1545_v39 = vadd.f32 %v5422_v36, %v7019_v23  ;;  %v1539_v40 = vpop.f32.mrb[3].mxu0  ;;  %5580 = vmatmul.mubr.msk.f32.gmra.mrb[108].mxu0 %vm690_vm1, %v535_v32 }
  0xf1   : > { %v3065_v42 = vsel %vm3064_vm2, %v2808_v35, 0.0  ;;  %v1540_v43 = vadd.f32 %v7019_v23, %v1539_v40  ;;  %5582 = vmatprep.mubr.msk.f32.mxu0 %vm690_vm1, %v536_v34  ;;  %v7106_v10 = vpop.f32.mrb[2].mxu1  ;;  %v671_v35 = vld [vmem:[%s8218_s0 + $0x7a8] sm:$0xff] }
  0xf2   : > { %v3067_v45 = vadd.f32 %v3066_v38, %v3065_v42  ;;  %v2811_v47 = vmax.f32 %v1545_v39, 0.0  ;;  %5778 = vmatmul.mubr.msk.f32.gmra.mrb[108].mxu1 %vm690_vm1, %v667_v2  ;;  %v7112_v13 = vpop.f32.mrb[3].mxu1  ;;  %v672_v39 = vld [vmem:[%s8218_s0 + $0x7b0] sm:$0xff]  ;;  %v545_v42 = vld [vmem:[%s8218_s0 + $0x3b8] sm:$0xff] }
  0xf3   : > { %v2810_v48 = vmax.f32 %v1540_v43, 0.0  ;;  %v5425_v49 = vpop.f32.mrb[4].mxu0  ;;  %5780 = vmatprep.mubr.msk.f32.mxu1 %vm690_vm1, %v668_v6  ;;  %v675_v6 = vld [vmem:[%s8218_s0 + $0x7c8] sm:$0xff] }
  0xf4   : > { %v1555_v51 = vadd.f32 %v5425_v49, %v7019_v23  ;;  %v1549_v52 = vpop.f32.mrb[5].mxu0  ;;  %5583 = vmatmul.mubr.msk.f32.gmra.mrb[110].mxu0 %vm690_vm1, %v537_v44  ;;  %v3070_v62 = vsel %vm3064_vm2, %v2811_v47, 0.0 }
  0xf5   : > { %v3068_v54 = vsel %vm3064_vm2, %v2810_v48, 0.0  ;;  %v1550_v55 = vadd.f32 %v7019_v23, %v1549_v52  ;;  %5585 = vmatprep.mubr.msk.f32.mxu0 %vm690_vm1, %v538_v46  ;;  %v7130_v27 = vpop.f32.mrb[4].mxu1 }
  0xf6   : > { %v3069_v58 = vadd.f32 %v3068_v54, %v3067_v45  ;;  %v2813_v63 = vmax.f32 %v1555_v51, 0.0  ;;  %5781 = vmatmul.mubr.msk.f32.gmra.mrb[110].mxu1 %vm690_vm1, %v669_v18  ;;  %v7136_v30 = vpop.f32.mrb[5].mxu1  ;;  %v546_v45 = vld [vmem:[%s8218_s0 + $0x3c0] sm:$0xff]  ;;  %v673_v51 = vld [vmem:[%s8218_s0 + $0x7b8] sm:$0xff] }
  0xf7   : > { %v2812_v0 = vmax.f32 %v1550_v55, 0.0  ;;  %v5428_v1 = vpop.f32.mrb[6].mxu0  ;;  %5783 = vmatprep.mubr.msk.f32.mxu1 %vm690_vm1, %v670_v22  ;;  %v674_v55 = vld [vmem:[%s8218_s0 + $0x7c0] sm:$0xff] }
  0xf8   : > { %v3071_v3 = vadd.f32 %v3070_v62, %v3069_v58  ;;  %v1565_v4 = vadd.f32 %v5428_v1, %v7019_v23  ;;  %v1559_v5 = vpop.f32.mrb[7].mxu0  ;;  %5586 = vmatmul.mubr.msk.f32.gmra.mrb[112].mxu0 %vm690_vm1, %v539_v56  ;;  %v3074_v14 = vsel %vm3064_vm2, %v2813_v63, 0.0  ;;  %v550_v18 = vld [vmem:[%s8218_s0 + $0x3e0] sm:$0xff] }
  0xf9   : > { %v3072_v7 = vsel %vm3064_vm2, %v2812_v0, 0.0  ;;  %v1560_v8 = vadd.f32 %v7019_v23, %v1559_v5  ;;  %5588 = vmatprep.mubr.msk.f32.mxu0 %vm690_vm1, %v540_v59  ;;  %v7154_v43 = vpop.f32.mrb[6].mxu1  ;;  %v547_v59 = vld [vmem:[%s8218_s0 + $0x3c8] sm:$0xff]  ;;  %v548_v0 = vld [vmem:[%s8218_s0 + $0x3d0] sm:$0xff] }
  0xfa   : > { %v3073_v11 = vadd.f32 %v3072_v7, %v3071_v3  ;;  %v2815_v15 = vmax.f32 %v1565_v4, 0.0  ;;  %5784 = vmatmul.mubr.msk.f32.gmra.mrb[112].mxu1 %vm690_vm1, %v671_v35  ;;  %v7160_v46 = vpop.f32.mrb[7].mxu1 }
  0xfb   : > { %v2814_v16 = vmax.f32 %v1560_v8, 0.0  ;;  %v5431_v17 = vpop.f32.mrb[8].mxu0  ;;  %5786 = vmatprep.mubr.msk.f32.mxu1 %vm690_vm1, %v672_v39  ;;  %v3628_v39 = vld [vmem:[%s8221_s3 + $0x10] sm:$0xff] }
  0xfc   : > { %v3075_v19 = vadd.f32 %v3074_v14, %v3073_v11  ;;  %v1575_v20 = vadd.f32 %v5431_v17, %v7019_v23  ;;  %v1569_v21 = vpop.f32.mrb[9].mxu0  ;;  %5589 = vmatmul.mubr.msk.f32.gmra.mrb[114].mxu0 %vm690_vm1, %v541_v9  ;;  %v3078_v31 = vsel %vm3064_vm2, %v2815_v15, 0.0  ;;  %v676_v11 = vld [vmem:[%s8218_s0 + $0x7d0] sm:$0xff]  ;;  %v549_v15 = vld [vmem:[%s8218_s0 + $0x3d8] sm:$0xff] }
  0xfd   : > { %v3076_v24 = vsel %vm3064_vm2, %v2814_v16, 0.0  ;;  %v1570_v25 = vadd.f32 %v7019_v23, %v1569_v21  ;;  %5591 = vmatprep.mubr.msk.f32.mxu0 %vm690_vm1, %v542_v12  ;;  %v7178_v62 = vpop.f32.mrb[8].mxu1 }
  0xfe   : > { %v3077_v28 = vadd.f32 %v3076_v24, %v3075_v19  ;;  %v2817_v32 = vmax.f32 %v1575_v20, 0.0  ;;  %5787 = vmatmul.mubr.msk.f32.gmra.mrb[114].mxu1 %vm690_vm1, %v673_v51  ;;  %v7184_v1 = vpop.f32.mrb[9].mxu1 }
  0xff   : > { %v2816_v33 = vmax.f32 %v1570_v25, 0.0  ;;  %v5434_v34 = vpop.f32.mrb[10].mxu0  ;;  %5789 = vmatprep.mubr.msk.f32.mxu1 %vm690_vm1, %v674_v55  ;;  %v677_v25 = vld [vmem:[%s8218_s0 + $0x7d8] sm:$0xff] }
 0x100   : > { %v3079_v36 = vadd.f32 %v3078_v31, %v3077_v28  ;;  %v1585_v37 = vadd.f32 %v5434_v34, %v7019_v23  ;;  %v1579_v38 = vpop.f32.mrb[11].mxu0  ;;  %5592 = vmatmul.mubr.msk.f32.gmra.mrb[116].mxu0 %vm690_vm1, %v543_v26  ;;  %v3082_v47 = vsel %vm3064_vm2, %v2817_v32, 0.0  ;;  %v678_v31 = vld [vmem:[%s8218_s0 + $0x7e0] sm:$0xff]  ;;  %v551_v34 = vld [vmem:[%s8218_s0 + $0x3e8] sm:$0xff]  ;;  %v553_v55 = vld [vmem:[%s8218_s0 + $0x3f8] sm:$0xff] }
 0x101   : > { %v3080_v40 = vsel %vm3064_vm2, %v2816_v33, 0.0  ;;  %v1580_v41 = vadd.f32 %v7019_v23, %v1579_v38  ;;  %5594 = vmatprep.mubr.msk.f32.mxu0 %vm690_vm1, %v544_v29  ;;  %v7202_v16 = vpop.f32.mrb[10].mxu1 }
 0x102   : > { %v3081_v44 = vadd.f32 %v3080_v40, %v3079_v36  ;;  %v2819_v48 = vmax.f32 %v1585_v37, 0.0  ;;  %5790 = vmatmul.mubr.msk.f32.gmra.mrb[116].mxu1 %vm690_vm1, %v675_v6  ;;  %v7208_v19 = vpop.f32.mrb[11].mxu1  ;;  %v552_v37 = vld [vmem:[%s8218_s0 + $0x3f0] sm:$0xff]  ;;  %v3629_v40 = vld [vmem:[%s8221_s3 + $0x18] sm:$0xff] }
 0x103   : > { %v2818_v49 = vmax.f32 %v1580_v41, 0.0  ;;  %v5437_v50 = vpop.f32.mrb[12].mxu0  ;;  %5792 = vmatprep.mubr.msk.f32.mxu1 %vm690_vm1, %v676_v11 }
 0x104   : > { %v3083_v52 = vadd.f32 %v3082_v47, %v3081_v44  ;;  %v1595_v53 = vadd.f32 %v5437_v50, %v7019_v23  ;;  %v1589_v54 = vpop.f32.mrb[13].mxu0  ;;  %5595 = vmatmul.mubr.msk.f32.gmra.mrb[118].mxu0 %vm690_vm1, %v545_v42  ;;  %v3086_v2 = vsel %vm3064_vm2, %v2819_v48, 0.0  ;;  %v679_v47 = vld [vmem:[%s8218_s0 + $0x7e8] sm:$0xff]  ;;  %v5920_v48 = vpack.c.bf16 %v3629_v40, %v3628_v39 }
 0x105   : > { %v3084_v56 = vsel %vm3064_vm2, %v2818_v49, 0.0  ;;  %v1590_v58 = vadd.f32 %v7019_v23, %v1589_v54  ;;  %5597 = vmatprep.mubr.msk.f32.mxu0 %vm690_vm1, %v546_v45  ;;  %v7226_v35 = vpop.f32.mrb[12].mxu1 }
 0x106   : > { %v3085_v63 = vadd.f32 %v3084_v56, %v3083_v52  ;;  %v2821_v3 = vmax.f32 %v1595_v53, 0.0  ;;  %5793 = vmatmul.mubr.msk.f32.gmra.mrb[118].mxu1 %vm690_vm1, %v677_v25  ;;  %v7232_v38 = vpop.f32.mrb[13].mxu1  ;;  %v680_v52 = vld [vmem:[%s8218_s0 + $0x7f0] sm:$0xff] }
 0x107   : > { %v2820_v4 = vmax.f32 %v1590_v58, 0.0  ;;  %v5440_v5 = vpop.f32.mrb[14].mxu0  ;;  %5795 = vmatprep.mubr.msk.f32.mxu1 %vm690_vm1, %v678_v31  ;;  %5921 = vmatpush3.bf16.msra.mxu1 %v5920_v48 }
 0x108   : > { %v3087_v7 = vadd.f32 %v3086_v2, %v3085_v63  ;;  %v1605_v8 = vadd.f32 %v5440_v5, %v7019_v23  ;;  %v1599_v9 = vpop.f32.mrb[15].mxu0  ;;  %5598 = vmatmul.mubr.msk.f32.gmra.mrb[120].mxu0 %vm690_vm1, %v547_v59  ;;  %v3090_v20 = vsel %vm3064_vm2, %v2821_v3, 0.0  ;;  %v554_v59 = vld [vmem:[%s8218_s0 + $0x400] sm:$0xff]  ;;  %5922 = vmatprep.subr.bf16.mxu1 %v6060_v60  ;;  %v681_v5 = vld [vmem:[%s8218_s0 + $0x7f8] sm:$0xff] }
 0x109   : > { %v3088_v12 = vsel %vm3064_vm2, %v2820_v4, 0.0  ;;  %v1600_v14 = vadd.f32 %v7019_v23, %v1599_v9  ;;  %5600 = vmatprep.mubr.msk.f32.mxu0 %vm690_vm1, %v548_v0  ;;  %v7256_v56 = vpop.f32.mrb[14].mxu1 }
 0x10a   : > { %v3089_v17 = vadd.f32 %v3088_v12, %v3087_v7  ;;  %v2823_v21 = vmax.f32 %v1605_v8, 0.0  ;;  %5796 = vmatmul.mubr.msk.f32.gmra.mrb[120].mxu1 %vm690_vm1, %v679_v47  ;;  %v7262_v63 = vpop.f32.mrb[15].mxu1  ;;  %v555_v12 = vld [vmem:[%s8218_s0 + $0x408] sm:$0xff] }
 0x10b   : > { %v2822_v22 = vmax.f32 %v1600_v14, 0.0  ;;  %v5443_v24 = vpop.f32.mrb[16].mxu0  ;;  %5798 = vmatprep.mubr.msk.f32.mxu1 %vm690_vm1, %v680_v52 }
 0x10c   : > { %v3091_v26 = vadd.f32 %v3090_v20, %v3089_v17  ;;  %v1615_v28 = vadd.f32 %v5443_v24, %v7019_v23  ;;  %v1609_v29 = vpop.f32.mrb[17].mxu0  ;;  %5601 = vmatmul.mubr.msk.f32.gmra.mrb[122].mxu0 %vm690_vm1, %v549_v15  ;;  %v3094_v41 = vsel %vm3064_vm2, %v2823_v21, 0.0  ;;  %v556_v17 = vld [vmem:[%s8218_s0 + $0x410] sm:$0xff] }
 0x10d   : > { %v3092_v32 = vsel %vm3064_vm2, %v2822_v22, 0.0  ;;  %v1610_v33 = vadd.f32 %v7019_v23, %v1609_v29  ;;  %5603 = vmatprep.mubr.msk.f32.mxu0 %vm690_vm1, %v550_v18  ;;  %v7278_v14 = vpop.f32.mrb[16].mxu1 }
 0x10e   : > { %v3093_v36 = vadd.f32 %v3092_v32, %v3091_v26  ;;  %v2825_v42 = vmax.f32 %v1615_v28, 0.0  ;;  %5799 = vmatmul.mubr.msk.f32.gmra.mrb[122].mxu1 %vm690_vm1, %v681_v5  ;;  %v7284_v18 = vpop.f32.mrb[17].mxu1  ;;  %v557_v32 = vld [vmem:[%s8218_s0 + $0x418] sm:$0xff] }
 0x10f   : > { %v2824_v44 = vmax.f32 %v1610_v33, 0.0  ;;  %v5446_v45 = vpop.f32.mrb[18].mxu0 }
 0x110   : > { %v3095_v49 = vadd.f32 %v3094_v41, %v3093_v36  ;;  %v1625_v50 = vadd.f32 %v5446_v45, %v7019_v23  ;;  %v1619_v51 = vpop.f32.mrb[19].mxu0  ;;  %5604 = vmatmul.mubr.msk.f32.gmra.mrb[124].mxu0 %vm690_vm1, %v551_v34  ;;  %v3098_v0 = vsel %vm3064_vm2, %v2825_v42, 0.0 }
 0x111   : > { %v3096_v53 = vsel %vm3064_vm2, %v2824_v44, 0.0  ;;  %v1620_v54 = vadd.f32 %v7019_v23, %v1619_v51  ;;  %5606 = vmatprep.mubr.msk.f32.mxu0 %vm690_vm1, %v552_v37  ;;  %v7295_v33 = vpop.f32.mrb[18].mxu1 }
 0x112   : > { %v3097_v58 = vadd.f32 %v3096_v53, %v3095_v49  ;;  %v2827_v2 = vmax.f32 %v1625_v50, 0.0  ;;  %v7297_v36 = vpop.f32.mrb[19].mxu1 }
 0x113   : > { %v2826_v3 = vmax.f32 %v1620_v54, 0.0  ;;  %v5449_v4 = vpop.f32.mrb[20].mxu0 }
 0x114   : > { %v3099_v6 = vadd.f32 %v3098_v0, %v3097_v58  ;;  %v1635_v7 = vadd.f32 %v5449_v4, %v7019_v23  ;;  %v1629_v8 = vpop.f32.mrb[21].mxu0  ;;  %5607 = vmatmul.mubr.msk.f32.gmra.mrb[126].mxu0 %vm690_vm1, %v553_v55  ;;  %v3102_v20 = vsel %vm3064_vm2, %v2827_v2, 0.0 }
 0x115   : > { %v3100_v9 = vsel %vm3064_vm2, %v2826_v3, 0.0  ;;  %v1630_v11 = vadd.f32 %v7019_v23, %v1629_v8  ;;  %5609 = vmatprep.mubr.msk.f32.mxu0 %vm690_vm1, %v554_v59  ;;  %v7304_v49 = vpop.f32.mrb[20].mxu1 }
 0x116   : > { %v3101_v15 = vadd.f32 %v3100_v9, %v3099_v6  ;;  %v2829_v21 = vmax.f32 %v1635_v7, 0.0  ;;  %v7306_v51 = vpop.f32.mrb[21].mxu1 }
 0x117   : > { %v2828_v22 = vmax.f32 %v1630_v11, 0.0  ;;  %v5452_v24 = vpop.f32.mrb[22].mxu0 }
 0x118   : > { %v3103_v25 = vadd.f32 %v3102_v20, %v3101_v15  ;;  %v1645_v26 = vadd.f32 %v5452_v24, %v7019_v23  ;;  %v1639_v28 = vpop.f32.mrb[23].mxu0  ;;  %5610 = vmatmul.mubr.msk.f32.gmra.mrb[128].mxu0 %vm690_vm1, %v555_v12  ;;  %v3106_v37 = vsel %vm3064_vm2, %v2829_v21, 0.0 }
 0x119   : > { %v3104_v29 = vsel %vm3064_vm2, %v2828_v22, 0.0  ;;  %v1640_v31 = vadd.f32 %v7019_v23, %v1639_v28  ;;  %5612 = vmatprep.mubr.msk.f32.mxu0 %vm690_vm1, %v556_v17  ;;  %v7312_v4 = vpop.f32.mrb[22].mxu1 }
 0x11a   : > { %v3105_v34 = vadd.f32 %v3104_v29, %v3103_v25  ;;  %v2831_v39 = vmax.f32 %v1645_v26, 0.0  ;;  %v7314_v6 = vpop.f32.mrb[23].mxu1 }
 0x11b   : > { %v2830_v40 = vmax.f32 %v1640_v31, 0.0  ;;  %v5455_v41 = vpop.f32.mrb[24].mxu0 }
 0x11c   : > { %v3107_v42 = vadd.f32 %v3106_v37, %v3105_v34  ;;  %v1655_v44 = vadd.f32 %v5455_v41, %v7019_v23  ;;  %v1649_v45 = vpop.f32.mrb[25].mxu0  ;;  %5613 = vmatmul.mubr.msk.f32.gmra.mrb[130].mxu0 %vm690_vm1, %v557_v32  ;;  %v3110_v52 = vsel %vm3064_vm2, %v2831_v39, 0.0 }
 0x11d   : > { %v3108_v47 = vsel %vm3064_vm2, %v2830_v40, 0.0  ;;  %v1650_v48 = vadd.f32 %v7019_v23, %v1649_v45  ;;  %v7320_v22 = vpop.f32.mrb[24].mxu1 }
 0x11e   : > { %v3109_v50 = vadd.f32 %v3108_v47, %v3107_v42  ;;  %v2833_v53 = vmax.f32 %v1655_v44, 0.0  ;;  %v7322_v25 = vpop.f32.mrb[25].mxu1 }
 0x11f   : > { %v2832_v54 = vmax.f32 %v1650_v48, 0.0  ;;  %v5458_v55 = vpop.f32.mrb[26].mxu0 }
 0x120   : > { %v3111_v58 = vadd.f32 %v3110_v52, %v3109_v50  ;;  %v1665_v59 = vadd.f32 %v5458_v55, %v7019_v23  ;;  %v1659_v0 = vpop.f32.mrb[27].mxu0  ;;  %v3114_v7 = vsel %vm3064_vm2, %v2833_v53, 0.0 }
 0x121   : > { %v3112_v2 = vsel %vm3064_vm2, %v2832_v54, 0.0  ;;  %v1660_v3 = vadd.f32 %v7019_v23, %v1659_v0  ;;  %v7328_v41 = vpop.f32.mrb[26].mxu1 }
 0x122   : > { %v3113_v5 = vadd.f32 %v3112_v2, %v3111_v58  ;;  %v2835_v8 = vmax.f32 %v1665_v59, 0.0  ;;  %8232 = vst [vmem:[#allocation7_spill] sm:$0xff] %v7328_v41  ;;  %v7330_v44 = vpop.f32.mrb[27].mxu1 }
 0x123   : > { %v2834_v9 = vmax.f32 %v1660_v3, 0.0  ;;  %v5461_v11 = vpop.f32.mrb[28].mxu0 }
 0x124   : > { %v3115_v12 = vadd.f32 %v3114_v7, %v3113_v5  ;;  %v1675_v15 = vadd.f32 %v5461_v11, %v7019_v23  ;;  %v1669_v17 = vpop.f32.mrb[29].mxu0  ;;  %v3118_v26 = vsel %vm3064_vm2, %v2835_v8, 0.0 }
 0x125   : > { %v3116_v20 = vsel %vm3064_vm2, %v2834_v9, 0.0  ;;  %v1670_v21 = vadd.f32 %v7019_v23, %v1669_v17  ;;  %v5659_v59 = vpop.f32.mrb[28].mxu1 }
 0x126   : > { %v3117_v24 = vadd.f32 %v3116_v20, %v3115_v12  ;;  %v2837_v28 = vmax.f32 %v1675_v15, 0.0  ;;  %v2335_v3 = vadd.f32 %v5659_v59, %v7019_v23  ;;  %v2329_v5 = vpop.f32.mrb[29].mxu1 }
 0x127   : > { %v2836_v29 = vmax.f32 %v1670_v21, 0.0  ;;  %v5464_v31 = vpop.f32.mrb[30].mxu0  ;;  %v2330_v11 = vadd.f32 %v7019_v23, %v2329_v5 }
 0x128   : > { %v3119_v32 = vadd.f32 %v3118_v26, %v3117_v24  ;;  %v1685_v34 = vadd.f32 %v5464_v31, %v7019_v23  ;;  %v1679_v37 = vpop.f32.mrb[31].mxu0  ;;  %v3122_v45 = vsel %vm3064_vm2, %v2837_v28, 0.0  ;;  %v2969_v21 = vmax.f32 %v2335_v3, 0.0 }
 0x129   : > { %v3120_v39 = vsel %vm3064_vm2, %v2836_v29, 0.0  ;;  %v1680_v40 = vadd.f32 %v7019_v23, %v1679_v37  ;;  %v2968_v28 = vmax.f32 %v2330_v11, 0.0  ;;  %v5662_v29 = vpop.f32.mrb[30].mxu1 }
 0x12a   : > { %v3121_v42 = vadd.f32 %v3120_v39, %v3119_v32  ;;  %v2839_v47 = vmax.f32 %v1685_v34, 0.0  ;;  %v3411_v37 = vsel %vm3064_vm2, %v2969_v21, 0.0  ;;  %v2339_v39 = vpop.f32.mrb[31].mxu1 }
 0x12b   : > { %v2838_v48 = vmax.f32 %v1680_v40, 0.0  ;;  %v5467_v50 = vpop.f32.mrb[32].mxu0 }
 0x12c   : > { %v3123_v52 = vadd.f32 %v3122_v45, %v3121_v42  ;;  %v1695_v53 = vadd.f32 %v5467_v50, %v7019_v23  ;;  %v1689_v54 = vpop.f32.mrb[33].mxu0  ;;  %v3126_v7 = vsel %vm3064_vm2, %v2839_v47, 0.0  ;;  %v3410_v45 = vsel %vm3064_vm2, %v2968_v28, 0.0 }
 0x12d   : > { %v3124_v55 = vsel %vm3064_vm2, %v2838_v48, 0.0  ;;  %v1690_v58 = vadd.f32 %v7019_v23, %v1689_v54  ;;  %v2345_v47 = vadd.f32 %v5662_v29, %v7019_v23  ;;  %v2340_v48 = vadd.f32 %v7019_v23, %v2339_v39 }
 0x12e   : > { %v3125_v0 = vadd.f32 %v3124_v55, %v3123_v52  ;;  %v2841_v2 = vmax.f32 %v1695_v53, 0.0  ;;  %v3412_v53 = vadd.f32 %v3411_v37, %v3410_v45 }
 0x12f   : > { %v2840_v8 = vmax.f32 %v1690_v58, 0.0  ;;  %v5470_v9 = vpop.f32.mrb[34].mxu0  ;;  %v2971_v58 = vmax.f32 %v2345_v47, 0.0  ;;  %v2970_v59 = vmax.f32 %v2340_v48, 0.0 }
 0x130   : > { %v3127_v12 = vadd.f32 %v3126_v7, %v3125_v0  ;;  %v3135_v15 = vsel %vm3064_vm2, %v2841_v2, 0.0  ;;  %v1705_v17 = vadd.f32 %v5470_v9, %v7019_v23  ;;  %v1699_v20 = vpop.f32.mrb[35].mxu0  ;;  %v5665_v0 = vpop.f32.mrb[32].mxu1 }
 0x131   : > { %v3134_v24 = vsel %vm3064_vm2, %v2840_v8, 0.0  ;;  %v1700_v26 = vadd.f32 %v7019_v23, %v1699_v20  ;;  %v2355_v7 = vadd.f32 %v5665_v0, %v7019_v23  ;;  %v2349_v8 = vpop.f32.mrb[33].mxu1  ;;  %v3415_v28 = vsel %vm3064_vm2, %v2971_v58, 0.0 }
 0x132   : > { %v3128_v31 = vrot.slane %v3127_v12, 4  ;;  %v3136_v32 = vadd.f32 %v3135_v15, %v3134_v24  ;;  %v2843_v34 = vmax.f32 %v1705_v17, 0.0  ;;  %v3413_v17 = vsel %vm3064_vm2, %v2970_v59, 0.0 }
 0x133   : > { %v2842_v40 = vmax.f32 %v1700_v26, 0.0  ;;  %v5473_v42 = vpop.f32.mrb[36].mxu0  ;;  %v2350_v20 = vadd.f32 %v7019_v23, %v2349_v8 }
 0x134   : > { %v1715_v50 = vadd.f32 %v5473_v42, %v7019_v23  ;;  %v1709_v52 = vpop.f32.mrb[37].mxu0  ;;  %v3129_v2 = vadd.f32 %v3128_v31, %v3127_v12  ;;  %v3139_v3 = vsel %vm3064_vm2, %v2843_v34, 0.0  ;;  %v3414_v31 = vadd.f32 %v3413_v17, %v3412_v53  ;;  %v5668_v34 = vpop.f32.mrb[34].mxu1 }
 0x135   : > { %v3137_v54 = vsel %vm3064_vm2, %v2842_v40, 0.0  ;;  %v1710_v55 = vadd.f32 %v7019_v23, %v1709_v52  ;;  %v2972_v42 = vmax.f32 %v2350_v20, 0.0  ;;  %v2359_v45 = vpop.f32.mrb[35].mxu1 }
 0x136   : > { %v3138_v5 = vadd.f32 %v3137_v54, %v3136_v32  ;;  %v2845_v9 = vmax.f32 %v1715_v50, 0.0  ;;  %v2973_v32 = vmax.f32 %v2355_v7, 0.0  ;;  %v3130_v37 = vrot.slane %v3129_v2, 2  ;;  %v5671_v8 = vpop.f32.mrb[36].mxu1 }
 0x137   : > { %v2844_v11 = vmax.f32 %v1710_v55, 0.0  ;;  %v5476_v15 = vpop.f32.mrb[38].mxu0  ;;  %v3416_v52 = vadd.f32 %v3415_v28, %v3414_v31  ;;  %v2365_v54 = vadd.f32 %v5668_v34, %v7019_v23  ;;  %v2369_v20 = vpop.f32.mrb[37].mxu1  ;;  %v2360_v28 = vadd.f32 %v7019_v23, %v2359_v45 }
 0x138   : > { %v3140_v21 = vadd.f32 %v3139_v3, %v3138_v5  ;;  %v1725_v24 = vadd.f32 %v5476_v15, %v7019_v23  ;;  %v1719_v26 = vpop.f32.mrb[39].mxu0  ;;  %v3143_v47 = vsel %vm3064_vm2, %v2845_v9, 0.0  ;;  %v3419_v53 = vsel %vm3064_vm2, %v2973_v32, 0.0 }
 0x139   : > { %v3141_v12 = vsel %vm3064_vm2, %v2844_v11, 0.0  ;;  %v1720_v29 = vadd.f32 %v7019_v23, %v1719_v26  ;;  %v3417_v5 = vsel %vm3064_vm2, %v2972_v42, 0.0  ;;  %v2975_v7 = vmax.f32 %v2365_v54, 0.0 }
 0x13a   : > { %v3142_v39 = vadd.f32 %v3141_v12, %v3140_v21  ;;  %v2847_v40 = vmax.f32 %v1725_v24, 0.0  ;;  %v7365_v9 = vadd.f32 %v3130_v37, %v3129_v2  ;;  %v3418_v17 = vadd.f32 %v3417_v5, %v3416_v52 }
 0x13b   : > { %v2846_v48 = vmax.f32 %v1720_v29, 0.0  ;;  %v5479_v50 = vpop.f32.mrb[40].mxu0  ;;  %v2375_v12 = vadd.f32 %v5671_v8, %v7019_v23  ;;  %v3423_v34 = vsel %vm3064_vm2, %v2975_v7, 0.0  ;;  %v2370_v45 = vadd.f32 %v7019_v23, %v2369_v20 }
 0x13c   : > { %v3144_v55 = vadd.f32 %v3143_v47, %v3142_v39  ;;  %v1735_v58 = vadd.f32 %v5479_v50, %v7019_v23  ;;  %v1729_v59 = vpop.f32.mrb[41].mxu0  ;;  %v3147_v11 = vsel %vm3064_vm2, %v2847_v40, 0.0  ;;  %v3420_v2 = vadd.f32 %v3419_v53, %v3418_v17  ;;  %v5674_v47 = vpop.f32.mrb[38].mxu1 }
 0x13d   : > { %v3145_v0 = vsel %vm3064_vm2, %v2846_v48, 0.0  ;;  %v1730_v3 = vadd.f32 %v7019_v23, %v1729_v59  ;;  %v2974_v40 = vmax.f32 %v2360_v28, 0.0  ;;  %v2977_v42 = vmax.f32 %v2375_v12, 0.0  ;;  %v2379_v54 = vpop.f32.mrb[39].mxu1 }
 0x13e   : > { %v3146_v15 = vadd.f32 %v3145_v0, %v3144_v55  ;;  %v2849_v21 = vmax.f32 %v1735_v58, 0.0  ;;  %v2385_v52 = vadd.f32 %v5674_v47, %v7019_v23  ;;  %v2380_v0 = vadd.f32 %v7019_v23, %v2379_v54 }
 0x13f   : > { %v2848_v24 = vmax.f32 %v1730_v3, 0.0  ;;  %v5482_v26 = vpop.f32.mrb[42].mxu0  ;;  %v3421_v53 = vsel %vm3064_vm2, %v2974_v40, 0.0  ;;  %v2976_v20 = vmax.f32 %v2370_v45, 0.0 }
 0x140   : > { %v3148_v29 = vadd.f32 %v3147_v11, %v3146_v15  ;;  %v1745_v31 = vadd.f32 %v5482_v26, %v7019_v23  ;;  %v1739_v32 = vpop.f32.mrb[43].mxu0  ;;  %v3151_v55 = vsel %vm3064_vm2, %v2849_v21, 0.0  ;;  %v3422_v8 = vadd.f32 %v3421_v53, %v3420_v2  ;;  %v5677_v21 = vpop.f32.mrb[40].mxu1 }
 0x141   : > { %v3149_v37 = vsel %vm3064_vm2, %v2848_v24, 0.0  ;;  %v1740_v39 = vadd.f32 %v7019_v23, %v1739_v32  ;;  %v3427_v11 = vsel %vm3064_vm2, %v2977_v42, 0.0  ;;  %v2979_v24 = vmax.f32 %v2385_v52, 0.0 }
 0x142   : > { %v3150_v48 = vadd.f32 %v3149_v37, %v3148_v29  ;;  %v2851_v50 = vmax.f32 %v1745_v31, 0.0  ;;  %v3424_v12 = vadd.f32 %v3423_v34, %v3422_v8  ;;  %v2978_v29 = vmax.f32 %v2380_v0, 0.0  ;;  %v2389_v31 = vpop.f32.mrb[41].mxu1 }
 0x143   : > { %v2850_v58 = vmax.f32 %v1740_v39, 0.0  ;;  %v5485_v59 = vpop.f32.mrb[44].mxu0  ;;  %v3425_v2 = vsel %vm3064_vm2, %v2976_v20, 0.0  ;;  %v2395_v40 = vadd.f32 %v5677_v21, %v7019_v23  ;;  %v3431_v52 = vsel %vm3064_vm2, %v2979_v24, 0.0 }
 0x144   : > { %v3152_v3 = vadd.f32 %v3151_v55, %v3150_v48  ;;  %v1755_v5 = vadd.f32 %v5485_v59, %v7019_v23  ;;  %v1749_v7 = vpop.f32.mrb[45].mxu0  ;;  %v3155_v26 = vsel %vm3064_vm2, %v2851_v50, 0.0  ;;  %v3426_v45 = vadd.f32 %v3425_v2, %v3424_v12 }
 0x145   : > { %v3153_v15 = vsel %vm3064_vm2, %v2850_v58, 0.0  ;;  %v1750_v17 = vadd.f32 %v7019_v23, %v1749_v7  ;;  %v3429_v54 = vsel %vm3064_vm2, %v2978_v29, 0.0  ;;  %v2981_v55 = vmax.f32 %v2395_v40, 0.0  ;;  %v5680_v58 = vpop.f32.mrb[42].mxu1 }
 0x146   : > { %v3154_v28 = vadd.f32 %v3153_v15, %v3152_v3  ;;  %v2853_v32 = vmax.f32 %v1755_v5, 0.0  ;;  %v3428_v0 = vadd.f32 %v3427_v11, %v3426_v45  ;;  %v2390_v3 = vadd.f32 %v7019_v23, %v2389_v31  ;;  %v2399_v5 = vpop.f32.mrb[43].mxu1 }
 0x147   : > { %v2852_v37 = vmax.f32 %v1750_v17, 0.0  ;;  %v5488_v39 = vpop.f32.mrb[46].mxu0  ;;  %v2405_v17 = vadd.f32 %v5680_v58, %v7019_v23  ;;  %v2400_v20 = vadd.f32 %v7019_v23, %v2399_v5  ;;  %v3435_v12 = vsel %vm3064_vm2, %v2981_v55, 0.0 }
 0x148   : > { %v3156_v42 = vadd.f32 %v3155_v26, %v3154_v28  ;;  %v1765_v47 = vadd.f32 %v5488_v39, %v7019_v23  ;;  %v1759_v48 = vpop.f32.mrb[47].mxu0  ;;  %v3159_v7 = vsel %vm3064_vm2, %v2853_v32, 0.0  ;;  %v3430_v28 = vadd.f32 %v3429_v54, %v3428_v0  ;;  %v5683_v32 = vpop.f32.mrb[44].mxu1 }
 0x149   : > { %v3157_v50 = vsel %vm3064_vm2, %v2852_v37, 0.0  ;;  %v1760_v34 = vadd.f32 %v7019_v23, %v1759_v48  ;;  %v2980_v31 = vmax.f32 %v2390_v3, 0.0  ;;  %v2983_v37 = vmax.f32 %v2405_v17, 0.0 }
 0x14a   : > { %v3158_v59 = vadd.f32 %v3157_v50, %v3156_v42  ;;  %v2855_v53 = vmax.f32 %v1765_v47, 0.0  ;;  %v3432_v40 = vadd.f32 %v3431_v52, %v3430_v28  ;;  %v2982_v42 = vmax.f32 %v2400_v20, 0.0  ;;  %v2409_v47 = vpop.f32.mrb[45].mxu1 }
 0x14b   : > { %v2854_v8 = vmax.f32 %v1760_v34, 0.0  ;;  %v5491_v15 = vpop.f32.mrb[48].mxu0  ;;  %v3433_v34 = vsel %vm3064_vm2, %v2980_v31, 0.0  ;;  %v2415_v54 = vadd.f32 %v5683_v32, %v7019_v23  ;;  %v3439_v3 = vsel %vm3064_vm2, %v2983_v37, 0.0 }
 0x14c   : > { %v3160_v24 = vadd.f32 %v3159_v7, %v3158_v59  ;;  %v1775_v21 = vadd.f32 %v5491_v15, %v7019_v23  ;;  %v1769_v26 = vpop.f32.mrb[49].mxu0  ;;  %v3163_v39 = vsel %vm3064_vm2, %v2855_v53, 0.0  ;;  %v3434_v0 = vadd.f32 %v3433_v34, %v3432_v40 }
 0x14d   : > { %v3161_v11 = vsel %vm3064_vm2, %v2854_v8, 0.0  ;;  %v1770_v29 = vadd.f32 %v7019_v23, %v1769_v26  ;;  %v3437_v5 = vsel %vm3064_vm2, %v2982_v42, 0.0  ;;  %v2985_v7 = vmax.f32 %v2415_v54, 0.0  ;;  %v5686_v8 = vpop.f32.mrb[46].mxu1 }
 0x14e   : > { %v3162_v2 = vadd.f32 %v3161_v11, %v3160_v24  ;;  %v2857_v48 = vmax.f32 %v1775_v21, 0.0  ;;  %v3436_v20 = vadd.f32 %v3435_v12, %v3434_v0  ;;  %v2410_v24 = vadd.f32 %v7019_v23, %v2409_v47  ;;  %v2419_v21 = vpop.f32.mrb[47].mxu1 }
 0x14f   : > { %v2856_v45 = vmax.f32 %v1770_v29, 0.0  ;;  %v5494_v50 = vpop.f32.mrb[50].mxu0  ;;  %v2425_v29 = vadd.f32 %v5686_v8, %v7019_v23  ;;  %v2420_v31 = vadd.f32 %v7019_v23, %v2419_v21  ;;  %v3443_v40 = vsel %vm3064_vm2, %v2985_v7, 0.0 }
 0x150   : > { %v3164_v55 = vadd.f32 %v3163_v39, %v3162_v2  ;;  %v1785_v58 = vadd.f32 %v5494_v50, %v7019_v23  ;;  %v1779_v59 = vpop.f32.mrb[51].mxu0  ;;  %v3167_v26 = vsel %vm3064_vm2, %v2857_v48, 0.0  ;;  %v3438_v2 = vadd.f32 %v3437_v5, %v3436_v20  ;;  %v5689_v48 = vpop.f32.mrb[48].mxu1 }
 0x151   : > { %v3165_v53 = vsel %vm3064_vm2, %v2856_v45, 0.0  ;;  %v1780_v52 = vadd.f32 %v7019_v23, %v1779_v59  ;;  %v2984_v47 = vmax.f32 %v2410_v24, 0.0  ;;  %v2987_v45 = vmax.f32 %v2425_v29, 0.0 }
 0x152   : > { %v3166_v15 = vadd.f32 %v3165_v53, %v3164_v55  ;;  %v2859_v17 = vmax.f32 %v1785_v58, 0.0  ;;  %v3440_v54 = vadd.f32 %v3439_v3, %v3438_v2  ;;  %v2986_v55 = vmax.f32 %v2420_v31, 0.0  ;;  %v2429_v58 = vpop.f32.mrb[49].mxu1 }
 0x153   : > { %v2858_v28 = vmax.f32 %v1780_v52, 0.0  ;;  %v5497_v11 = vpop.f32.mrb[52].mxu0  ;;  %v3441_v52 = vsel %vm3064_vm2, %v2984_v47, 0.0  ;;  %v2435_v5 = vadd.f32 %v5689_v48, %v7019_v23  ;;  %v3447_v24 = vsel %vm3064_vm2, %v2987_v45, 0.0 }
 0x154   : > { %v3168_v37 = vadd.f32 %v3167_v26, %v3166_v15  ;;  %v1795_v32 = vadd.f32 %v5497_v11, %v7019_v23  ;;  %v1789_v39 = vpop.f32.mrb[53].mxu0  ;;  %v3171_v50 = vsel %vm3064_vm2, %v2859_v17, 0.0  ;;  %v3442_v20 = vadd.f32 %v3441_v52, %v3440_v54 }
 0x155   : > { %v3169_v12 = vsel %vm3064_vm2, %v2858_v28, 0.0  ;;  %v1790_v42 = vadd.f32 %v7019_v23, %v1789_v39  ;;  %v3445_v21 = vsel %vm3064_vm2, %v2986_v55, 0.0  ;;  %v2989_v26 = vmax.f32 %v2435_v5, 0.0  ;;  %v5692_v28 = vpop.f32.mrb[50].mxu1 }
 0x156   : > { %v3170_v34 = vadd.f32 %v3169_v12, %v3168_v37  ;;  %v2861_v59 = vmax.f32 %v1795_v32, 0.0  ;;  %v3444_v31 = vadd.f32 %v3443_v40, %v3442_v20  ;;  %v2430_v37 = vadd.f32 %v7019_v23, %v2429_v58  ;;  %v2439_v32 = vpop.f32.mrb[51].mxu1 }
 0x157   : > { %v2860_v0 = vmax.f32 %v1790_v42, 0.0  ;;  %v5500_v53 = vpop.f32.mrb[54].mxu0  ;;  %v7428_v42 = vld [vmem:[%s8220_s2] ss:$0 sm:$0xff] }
 0x158   : > { %v3172_v7 = vadd.f32 %v3171_v50, %v3170_v34  ;;  %v1805_v8 = vadd.f32 %v5500_v53, %v7019_v23  ;;  %v1799_v15 = vpop.f32.mrb[55].mxu0  ;;  %v3175_v39 = vsel %vm3064_vm2, %v2861_v59, 0.0  ;;  %v2445_v47 = vadd.f32 %v7428_v42, %v5692_v28 }
 0x159   : > { %v3173_v17 = vsel %vm3064_vm2, %v2860_v0, 0.0  ;;  %v1800_v3 = vadd.f32 %v7019_v23, %v1799_v15  ;;  %v2440_v45 = vadd.f32 %v7428_v42, %v2439_v32  ;;  %v3446_v34 = vadd.f32 %v3445_v21, %v3444_v31  ;;  %v5695_v0 = vpop.f32.mrb[52].mxu1 }
 0x15a   : > { %v3174_v11 = vadd.f32 %v3173_v17, %v3172_v7  ;;  %v2863_v29 = vmax.f32 %v1805_v8, 0.0  ;;  %v3451_v23 = vsel %vm3064_vm2, %v2989_v26, 0.0  ;;  %v2988_v58 = vmax.f32 %v2430_v37, 0.0  ;;  %v2449_v8 = vpop.f32.mrb[53].mxu1 }
 0x15b   : > { %v2862_v2 = vmax.f32 %v1800_v3, 0.0  ;;  %v5503_v12 = vpop.f32.mrb[56].mxu0  ;;  %v2991_v59 = vmax.f32 %v2445_v47, 0.0  ;;  %v3448_v5 = vadd.f32 %v3447_v24, %v3446_v34  ;;  %v2990_v7 = vmax.f32 %v2440_v45, 0.0 }
 0x15c   : > { %v3176_v48 = vadd.f32 %v3175_v39, %v3174_v11  ;;  %v1815_v50 = vadd.f32 %v7428_v42, %v5503_v12  ;;  %v1809_v40 = vpop.f32.mrb[57].mxu0  ;;  %v3179_v53 = vsel %vm3064_vm2, %v2863_v29, 0.0  ;;  %v3449_v3 = vsel %vm3064_vm2, %v2988_v58, 0.0 }
 0x15d   : > { %v3177_v54 = vsel %vm3064_vm2, %v2862_v2, 0.0  ;;  %v1810_v55 = vadd.f32 %v7428_v42, %v1809_v40  ;;  %v2455_v21 = vadd.f32 %v7428_v42, %v5695_v0  ;;  %v3450_v31 = vadd.f32 %v3449_v3, %v3448_v5  ;;  %v5698_v2 = vpop.f32.mrb[54].mxu1 }
 0x15e   : > { %v3178_v52 = vadd.f32 %v3177_v54, %v3176_v48  ;;  %v2865_v15 = vmax.f32 %v1815_v50, 0.0  ;;  %v3455_v37 = vsel %vm3064_vm2, %v2991_v59, 0.0  ;;  %v3453_v32 = vsel %vm3064_vm2, %v2990_v7, 0.0  ;;  %v2459_v50 = vpop.f32.mrb[55].mxu1 }
 0x15f   : > { %v2864_v20 = vmax.f32 %v1810_v55, 0.0  ;;  %v5506_v17 = vpop.f32.mrb[58].mxu0  ;;  %v2993_v39 = vmax.f32 %v2455_v21, 0.0  ;;  %v3452_v45 = vadd.f32 %v3451_v23, %v3450_v31  ;;  %v2450_v48 = vadd.f32 %v7428_v42, %v2449_v8 }
 0x160   : > { %v3180_v26 = vadd.f32 %v3179_v53, %v3178_v52  ;;  %v1825_v28 = vadd.f32 %v7428_v42, %v5506_v17  ;;  %v1819_v11 = vpop.f32.mrb[59].mxu0  ;;  %v3183_v40 = vsel %vm3064_vm2, %v2865_v15, 0.0  ;;  %v2465_v55 = vadd.f32 %v7428_v42, %v5698_v2  ;;  %v5701_v15 = vpop.f32.mrb[56].mxu1 }
 0x161   : > { %v3181_v29 = vsel %vm3064_vm2, %v2864_v20, 0.0  ;;  %v1820_v24 = vadd.f32 %v7428_v42, %v1819_v11  ;;  %v2460_v58 = vadd.f32 %v7428_v42, %v2459_v50  ;;  %v3454_v52 = vadd.f32 %v3453_v32, %v3452_v45 }
 0x162   : > { %v3182_v12 = vadd.f32 %v3181_v29, %v3180_v26  ;;  %v2867_v47 = vmax.f32 %v1825_v28, 0.0  ;;  %v3459_v5 = vsel %vm3064_vm2, %v2993_v39, 0.0  ;;  %v2992_v8 = vmax.f32 %v2450_v48, 0.0  ;;  %v2469_v28 = vpop.f32.mrb[57].mxu1 }
 0x163   : > { %v2866_v34 = vmax.f32 %v1820_v24, 0.0  ;;  %v5509_v54 = vpop.f32.mrb[60].mxu0  ;;  %v2995_v20 = vmax.f32 %v2465_v55, 0.0  ;;  %v3456_v21 = vadd.f32 %v3455_v37, %v3454_v52  ;;  %v2994_v26 = vmax.f32 %v2460_v58, 0.0 }
 0x164   : > { %v3184_v59 = vadd.f32 %v3183_v40, %v3182_v12  ;;  %v1835_v0 = vadd.f32 %v7428_v42, %v5509_v54  ;;  %v1829_v53 = vpop.f32.mrb[61].mxu0  ;;  %v3187_v17 = vsel %vm3064_vm2, %v2867_v47, 0.0  ;;  %v3457_v24 = vsel %vm3064_vm2, %v2992_v8, 0.0 }
 0x165   : > { %v3185_v23 = vsel %vm3064_vm2, %v2866_v34, 0.0  ;;  %v1830_v7 = vadd.f32 %v7428_v42, %v1829_v53  ;;  %v2475_v32 = vadd.f32 %v7428_v42, %v5701_v15  ;;  %v3458_v45 = vadd.f32 %v3457_v24, %v3456_v21  ;;  %v5704_v34 = vpop.f32.mrb[58].mxu1 }
 0x166   : > { %v3186_v3 = vadd.f32 %v3185_v23, %v3184_v59  ;;  %v2869_v11 = vmax.f32 %v1835_v0, 0.0  ;;  %v3463_v48 = vsel %vm3064_vm2, %v2995_v20, 0.0  ;;  %v3461_v50 = vsel %vm3064_vm2, %v2994_v26, 0.0  ;;  %v2479_v0 = vpop.f32.mrb[59].mxu1 }
 0x167   : > { %v2868_v31 = vmax.f32 %v1830_v7, 0.0  ;;  %v5512_v29 = vpop.f32.mrb[62].mxu0  ;;  %v2997_v40 = vmax.f32 %v2475_v32, 0.0  ;;  %v3460_v58 = vadd.f32 %v3459_v5, %v3458_v45  ;;  %v2470_v59 = vadd.f32 %v7428_v42, %v2469_v28 }
 0x168   : > { %v3188_v39 = vadd.f32 %v3187_v17, %v3186_v3  ;;  %v1845_v2 = vadd.f32 %v7428_v42, %v5512_v29  ;;  %v1839_v12 = vpop.f32.mrb[63].mxu0  ;;  %v3191_v53 = vsel %vm3064_vm2, %v2869_v11, 0.0  ;;  %v2485_v7 = vadd.f32 %v7428_v42, %v5704_v34 }
 0x169   : > { %v3189_v47 = vsel %vm3064_vm2, %v2868_v31, 0.0  ;;  %v1840_v37 = vadd.f32 %v7428_v42, %v1839_v12  ;;  %v2480_v8 = vadd.f32 %v7428_v42, %v2479_v0  ;;  %v3462_v3 = vadd.f32 %v3461_v50, %v3460_v58  ;;  %v5707_v31 = vpop.f32.mrb[60].mxu1 }
 0x16a   : > { %v3190_v54 = vadd.f32 %v3189_v47, %v3188_v39  ;;  %v2871_v55 = vmax.f32 %v1845_v2, 0.0  ;;  %v3467_v21 = vsel %vm3064_vm2, %v2997_v40, 0.0  ;;  %v2996_v11 = vmax.f32 %v2470_v59, 0.0  ;;  %v2489_v2 = vpop.f32.mrb[61].mxu1 }
 0x16b   : > { %v2870_v52 = vmax.f32 %v1840_v37, 0.0  ;;  %v5515_v23 = vpop.f32.mrb[64].mxu0  ;;  %v3464_v32 = vadd.f32 %v3463_v48, %v3462_v3  ;;  %v2998_v39 = vmax.f32 %v2480_v8, 0.0  ;;  %v2999_v37 = vmax.f32 %v2485_v7, 0.0 }
 0x16c   : > { %v3192_v20 = vadd.f32 %v3191_v53, %v3190_v54  ;;  %v1855_v15 = vadd.f32 %v7428_v42, %v5515_v23  ;;  %v1849_v17 = vpop.f32.mrb[65].mxu0  ;;  %v3195_v5 = vsel %vm3064_vm2, %v2871_v55, 0.0  ;;  %v3465_v47 = vsel %vm3064_vm2, %v2996_v11, 0.0 }
 0x16d   : > { %v3193_v26 = vsel %vm3064_vm2, %v2870_v52, 0.0  ;;  %v1850_v28 = vadd.f32 %v7428_v42, %v1849_v17  ;;  %v2495_v50 = vadd.f32 %v7428_v42, %v5707_v31  ;;  %v3466_v58 = vadd.f32 %v3465_v47, %v3464_v32  ;;  %v5710_v52 = vpop.f32.mrb[62].mxu1 }
 0x16e   : > { %v3194_v29 = vadd.f32 %v3193_v26, %v3192_v20  ;;  %v2873_v24 = vmax.f32 %v1855_v15, 0.0  ;;  %v3469_v0 = vsel %vm3064_vm2, %v2998_v39, 0.0  ;;  %v2499_v15 = vpop.f32.mrb[63].mxu1  ;;  %v3132_v17 = vrot.slane %v7365_v9, 1 }
 0x16f   : > { %v2872_v12 = vmax.f32 %v1850_v28, 0.0  ;;  %v5518_v45 = vpop.f32.mrb[66].mxu0  ;;  %v3001_v53 = vmax.f32 %v2495_v50, 0.0  ;;  %v3468_v20 = vadd.f32 %v3467_v21, %v3466_v58  ;;  %v3471_v26 = vsel %vm3064_vm2, %v2999_v37, 0.0  ;;  %v5713_v47 = vpop.f32.mrb[64].mxu1 }
 0x170   : > { %v3196_v40 = vadd.f32 %v3195_v5, %v3194_v29  ;;  %v3204_v34 = vsel %vm3064_vm2, %v2873_v24, 0.0  ;;  %v1865_v54 = vadd.f32 %v7428_v42, %v5518_v45  ;;  %v1859_v55 = vpop.f32.mrb[67].mxu0  ;;  %v2490_v28 = vadd.f32 %v7428_v42, %v2489_v2 }
 0x171   : > { %v3203_v59 = vsel %vm3064_vm2, %v2872_v12, 0.0  ;;  %v1860_v48 = vadd.f32 %v7428_v42, %v1859_v55  ;;  %v3470_v24 = vadd.f32 %v3469_v0, %v3468_v20  ;;  %v3480_v32 = vsel %vm3064_vm2, %v3001_v53, 0.0 }
 0x172   : > { %v3197_v23 = vrot.slane %v3196_v40, 4  ;;  %v3205_v8 = vadd.f32 %v3204_v34, %v3203_v59  ;;  %v2875_v7 = vmax.f32 %v1865_v54, 0.0  ;;  %v3000_v45 = vmax.f32 %v2490_v28, 0.0 }
 0x173   : > { %v2874_v3 = vmax.f32 %v1860_v48, 0.0  ;;  %v5521_v5 = vpop.f32.mrb[68].mxu0  ;;  %v7484_v37 = vadd.f32 %v3471_v26, %v3470_v24  ;;  %v2505_v2 = vadd.f32 %v7428_v42, %v5710_v52  ;;  %v2500_v48 = vadd.f32 %v7428_v42, %v2499_v15 }
 0x174   : > { %v3198_v11 = vadd.f32 %v3197_v23, %v3196_v40  ;;  %v1875_v31 = vadd.f32 %v7428_v42, %v5521_v5  ;;  %v1869_v29 = vpop.f32.mrb[69].mxu0  ;;  %v3208_v39 = vsel %vm3064_vm2, %v2875_v7, 0.0  ;;  %v2509_v40 = vpop.f32.mrb[65].mxu1  ;;  %v3479_v59 = vsel %vm3064_vm2, %v3000_v45, 0.0 }
 0x175   : > { %v3206_v21 = vsel %vm3064_vm2, %v2874_v3, 0.0  ;;  %v1870_v12 = vadd.f32 %v7428_v42, %v1869_v29  ;;  %8233 = vst [vmem:[#allocation8_spill] sm:$0xff] %v7484_v37  ;;  %v3133_v20 = vadd.f32 %v3132_v17, %v7365_v9  ;;  %v3481_v52 = vadd.f32 %v3480_v32, %v3479_v59  ;;  %v5716_v5 = vpop.f32.mrb[66].mxu1 }
 0x176   : > { %v3199_v50 = vrot.slane %v3198_v11, 2  ;;  %v3207_v34 = vadd.f32 %v3206_v21, %v3205_v8  ;;  %v2877_v54 = vmax.f32 %v1875_v31, 0.0  ;;  %v3003_v31 = vmax.f32 %v2505_v2, 0.0  ;;  %v2519_v29 = vpop.f32.mrb[67].mxu1 }
 0x177   : > { %v2876_v55 = vmax.f32 %v1870_v12, 0.0  ;;  %v5524_v58 = vpop.f32.mrb[70].mxu0  ;;  %v3002_v21 = vmax.f32 %v2500_v48, 0.0  ;;  %v3618_v32 = vmul.f32 0.00390625, %v3133_v20 }
 0x178   : > { %v3200_v0 = vadd.f32 %v3199_v50, %v3198_v11  ;;  %v3209_v53 = vadd.f32 %v3208_v39, %v3207_v34  ;;  %v1885_v23 = vadd.f32 %v7428_v42, %v5524_v58  ;;  %v1879_v7 = vpop.f32.mrb[71].mxu0  ;;  %v3212_v15 = vsel %vm3064_vm2, %v2877_v54, 0.0  ;;  %v5719_v58 = vpop.f32.mrb[68].mxu1 }
 0x179   : > { %v3210_v8 = vsel %vm3064_vm2, %v2876_v55, 0.0  ;;  %v1880_v3 = vadd.f32 %v7428_v42, %v1879_v7  ;;  %v2515_v50 = vadd.f32 %v7428_v42, %v5713_v47  ;;  %v3482_v2 = vsel %vm3064_vm2, %v3002_v21, 0.0 }
 0x17a   : > { %v3201_v26 = vrot.slane %v3200_v0, 1  ;;  %v3211_v28 = vadd.f32 %v3210_v8, %v3209_v53  ;;  %v2879_v11 = vmax.f32 %v1885_v23, 0.0  ;;  %v3484_v53 = vsel %vm3064_vm2, %v3003_v31, 0.0 }
 0x17b   : > { %v2878_v24 = vmax.f32 %v1880_v3, 0.0  ;;  %v5527_v39 = vpop.f32.mrb[72].mxu0  ;;  %v3483_v48 = vadd.f32 %v3482_v2, %v3481_v52  ;;  %v2510_v47 = vadd.f32 %v7428_v42, %v2509_v40  ;;  %v7508_v31 = vadd.f32 %v7428_v42, %v7082_v57 }
 0x17c   : > { %v3202_v12 = vadd.f32 %v3201_v26, %v3200_v0  ;;  %v3213_v45 = vadd.f32 %v3212_v15, %v3211_v28  ;;  %v1895_v9 = vadd.f32 %v7428_v42, %v5527_v39  ;;  %v1889_v17 = vpop.f32.mrb[73].mxu0  ;;  %v2529_v0 = vpop.f32.mrb[69].mxu1  ;;  %v3216_v23 = vsel %vm3064_vm2, %v2879_v11, 0.0 }
 0x17d   : > { %v3214_v34 = vsel %vm3064_vm2, %v2878_v24, 0.0  ;;  %v1890_v55 = vadd.f32 %v7428_v42, %v1889_v17  ;;  %v3005_v24 = vmax.f32 %v2515_v50, 0.0  ;;  %v5722_v39 = vpop.f32.mrb[70].mxu1  ;;  %v3004_v40 = vmax.f32 %v2510_v47, 0.0 }
 0x17e   : > { %v3619_v54 = vmul.f32 0.00390625, %v3202_v12  ;;  %v3215_v59 = vadd.f32 %v3214_v34, %v3213_v45  ;;  %v2881_v7 = vmax.f32 %v1895_v9, 0.0  ;;  %v3485_v45 = vadd.f32 %v3484_v53, %v3483_v48  ;;  %v2539_v9 = vpop.f32.mrb[71].mxu1 }
 0x17f   : > { %v2880_v8 = vmax.f32 %v1890_v55, 0.0  ;;  %v5530_v3 = vpop.f32.mrb[74].mxu0  ;;  %v2525_v50 = vadd.f32 %v7428_v42, %v5716_v5  ;;  %v2520_v55 = vadd.f32 %v7428_v42, %v2519_v29 }
 0x180   : > { %v7503_v20 = vsel %vm3649_vm3, %v3619_v54, %v3618_v32  ;;  %v3217_v26 = vadd.f32 %v3216_v23, %v3215_v59  ;;  %v1905_v28 = vadd.f32 %v7428_v42, %v5530_v3  ;;  %v1899_v15 = vpop.f32.mrb[75].mxu0  ;;  %v3220_v17 = vsel %vm3064_vm2, %v2881_v7, 0.0  ;;  %v5725_v3 = vpop.f32.mrb[72].mxu1 }
 0x181   : > { %v3218_v52 = vsel %vm3064_vm2, %v2880_v8, 0.0  ;;  %v1900_v11 = vadd.f32 %v7428_v42, %v1899_v15  ;;  %v3488_v59 = vsel %vm3064_vm2, %v3005_v24, 0.0  ;;  %v3486_v23 = vsel %vm3064_vm2, %v3004_v40, 0.0 }
 0x182   : > { %v3219_v21 = vadd.f32 %v3218_v52, %v3217_v26  ;;  %v2883_v12 = vmax.f32 %v1905_v28, 0.0  ;;  %v3487_v7 = vadd.f32 %v3486_v23, %v3485_v45  ;;  %v3007_v26 = vmax.f32 %v2525_v50, 0.0  ;;  %v2549_v28 = vpop.f32.mrb[73].mxu1 }
 0x183   : > { %v2882_v32 = vmax.f32 %v1900_v11, 0.0  ;;  %v5533_v34 = vpop.f32.mrb[76].mxu0  ;;  %v3006_v29 = vmax.f32 %v2520_v55, 0.0  ;;  %v2535_v24 = vadd.f32 %v7428_v42, %v5719_v58 }
 0x184   : > { %v3221_v57 = vadd.f32 %v3220_v17, %v3219_v21  ;;  %v1915_v2 = vadd.f32 %v7428_v42, %v5533_v34  ;;  %v1909_v54 = vpop.f32.mrb[77].mxu0  ;;  %v3224_v8 = vsel %vm3064_vm2, %v2883_v12, 0.0  ;;  %v3489_v11 = vadd.f32 %v3488_v59, %v3487_v7 }
 0x185   : > { %v3222_v53 = vsel %vm3064_vm2, %v2882_v32, 0.0  ;;  %v1910_v48 = vadd.f32 %v7428_v42, %v1909_v54  ;;  %v2530_v21 = vadd.f32 %v7428_v42, %v2529_v0  ;;  %v3492_v45 = vsel %vm3064_vm2, %v3007_v26, 0.0 }
 0x186   : > { %v3223_v47 = vadd.f32 %v3222_v53, %v3221_v57  ;;  %v2885_v5 = vmax.f32 %v1915_v2, 0.0  ;;  %v3490_v55 = vsel %vm3064_vm2, %v3006_v29, 0.0  ;;  %v3009_v57 = vmax.f32 %v2535_v24, 0.0  ;;  %v5728_v2 = vpop.f32.mrb[74].mxu1 }
 0x187   : > { %v2884_v15 = vmax.f32 %v1910_v48, 0.0  ;;  %v5536_v52 = vpop.f32.mrb[78].mxu0  ;;  %v3491_v59 = vadd.f32 %v3490_v55, %v3489_v11  ;;  %v3008_v0 = vmax.f32 %v2530_v21, 0.0  ;;  %v2559_v23 = vpop.f32.mrb[75].mxu1  ;;  %v2545_v7 = vadd.f32 %v7428_v42, %v5722_v39 }
 0x188   : > { %v3228_v12 = vsel %vm3064_vm2, %v2885_v5, 0.0  ;;  %v3225_v40 = vadd.f32 %v3224_v8, %v3223_v47  ;;  %v1925_v17 = vadd.f32 %v7428_v42, %v5536_v52  ;;  %v1919_v32 = vpop.f32.mrb[79].mxu0  ;;  %v3496_v48 = vsel %vm3064_vm2, %v3009_v57, 0.0 }
 0x189   : > { %v3226_v34 = vsel %vm3064_vm2, %v2884_v15, 0.0  ;;  %v1920_v50 = vadd.f32 %v7428_v42, %v1919_v32  ;;  %v2540_v47 = vadd.f32 %v7428_v42, %v2539_v9  ;;  %v3493_v52 = vadd.f32 %v3492_v45, %v3491_v59 }
 0x18a   : > { %v3227_v54 = vadd.f32 %v3226_v34, %v3225_v40  ;;  %v2887_v58 = vmax.f32 %v1925_v17, 0.0  ;;  %v3494_v21 = vsel %vm3064_vm2, %v3008_v0, 0.0  ;;  %v3011_v40 = vmax.f32 %v2545_v7, 0.0  ;;  %v5731_v17 = vpop.f32.mrb[76].mxu1 }
 0x18b   : > { %v2886_v53 = vmax.f32 %v1920_v50, 0.0  ;;  %v5539_v8 = vpop.f32.mrb[80].mxu0  ;;  %v3495_v39 = vadd.f32 %v3494_v21, %v3493_v52  ;;  %v3010_v50 = vmax.f32 %v2540_v47, 0.0  ;;  %v2569_v9 = vpop.f32.mrb[77].mxu1  ;;  %v2550_v45 = vadd.f32 %v7428_v42, %v2549_v28 }
 0x18c   : > { %v3232_v5 = vsel %vm3064_vm2, %v2887_v58, 0.0  ;;  %v3229_v26 = vadd.f32 %v3228_v12, %v3227_v54  ;;  %v1935_v29 = vadd.f32 %v7428_v42, %v5539_v8  ;;  %v1929_v15 = vpop.f32.mrb[81].mxu0  ;;  %v3500_v12 = vsel %vm3064_vm2, %v3011_v40, 0.0 }
 0x18d   : > { %v3230_v24 = vsel %vm3064_vm2, %v2886_v53, 0.0  ;;  %v1930_v11 = vadd.f32 %v7428_v42, %v1929_v15  ;;  %v2555_v54 = vadd.f32 %v7428_v42, %v5725_v3  ;;  %v3497_v8 = vadd.f32 %v3496_v48, %v3495_v39  ;;  %v5734_v15 = vpop.f32.mrb[78].mxu1 }
 0x18e   : > { %v3231_v32 = vadd.f32 %v3230_v24, %v3229_v26  ;;  %v2889_v34 = vmax.f32 %v1935_v29, 0.0  ;;  %v3498_v26 = vsel %vm3064_vm2, %v3010_v50, 0.0  ;;  %v2579_v28 = vpop.f32.mrb[79].mxu1  ;;  %v2560_v48 = vadd.f32 %v7428_v42, %v2559_v23 }
 0x18f   : > { %v2888_v55 = vmax.f32 %v1930_v11, 0.0  ;;  %v5542_v57 = vpop.f32.mrb[82].mxu0  ;;  %v3013_v29 = vmax.f32 %v2555_v54, 0.0  ;;  %v3499_v3 = vadd.f32 %v3498_v26, %v3497_v8  ;;  %v3012_v11 = vmax.f32 %v2550_v45, 0.0 }
 0x190   : > { %v3236_v58 = vsel %vm3064_vm2, %v2889_v34, 0.0  ;;  %v3233_v59 = vadd.f32 %v3232_v5, %v3231_v32  ;;  %v1945_v0 = vadd.f32 %v7428_v42, %v5542_v57  ;;  %v1939_v53 = vpop.f32.mrb[83].mxu0  ;;  %v2565_v32 = vadd.f32 %v7428_v42, %v5728_v2 }
 0x191   : > { %v3234_v7 = vsel %vm3064_vm2, %v2888_v55, 0.0  ;;  %v1940_v47 = vadd.f32 %v7428_v42, %v1939_v53  ;;  %v3504_v5 = vsel %vm3064_vm2, %v3013_v29, 0.0  ;;  %v3501_v57 = vadd.f32 %v3500_v12, %v3499_v3  ;;  %v5737_v53 = vpop.f32.mrb[80].mxu1 }
 0x192   : > { %v3235_v52 = vadd.f32 %v3234_v7, %v3233_v59  ;;  %v2891_v24 = vmax.f32 %v1945_v0, 0.0  ;;  %v3502_v59 = vsel %vm3064_vm2, %v3012_v11, 0.0  ;;  %v3015_v0 = vmax.f32 %v2565_v32, 0.0  ;;  %v2589_v23 = vpop.f32.mrb[81].mxu1  ;;  %v3630_v32 = vld [vmem:[%s8221_s3 + $0x20] sm:$0xff] }
 0x193   : > { %v2890_v21 = vmax.f32 %v1940_v47, 0.0  ;;  %v5545_v40 = vpop.f32.mrb[84].mxu0  ;;  %v3503_v2 = vadd.f32 %v3502_v59, %v3501_v57  ;;  %v3014_v47 = vmax.f32 %v2560_v48, 0.0  ;;  %v2570_v12 = vadd.f32 %v7428_v42, %v2569_v9  ;;  %v3631_v48 = vld [vmem:[%s8221_s3 + $0x28] sm:$0xff] }
 0x194   : > { %v3240_v34 = vsel %vm3064_vm2, %v2891_v24, 0.0  ;;  %v3237_v39 = vadd.f32 %v3236_v58, %v3235_v52  ;;  %v1955_v50 = vadd.f32 %v7428_v42, %v5545_v40  ;;  %v1949_v55 = vpop.f32.mrb[85].mxu0  ;;  %v3508_v58 = vsel %vm3064_vm2, %v3015_v0, 0.0 }
 0x195   : > { %v3238_v54 = vsel %vm3064_vm2, %v2890_v21, 0.0  ;;  %v1950_v45 = vadd.f32 %v7428_v42, %v1949_v55  ;;  %v2575_v52 = vadd.f32 %v7428_v42, %v5731_v17  ;;  %v3505_v40 = vadd.f32 %v3504_v5, %v3503_v2 }
 0x196   : > { %v3239_v8 = vadd.f32 %v3238_v54, %v3237_v39  ;;  %v2893_v7 = vmax.f32 %v1955_v50, 0.0  ;;  %v3506_v9 = vsel %vm3064_vm2, %v3014_v47, 0.0  ;;  %v3016_v5 = vmax.f32 %v2570_v12, 0.0 }
 0x197   : > { %v2892_v26 = vmax.f32 %v1950_v45, 0.0  ;;  %v5548_v29 = vpop.f32.mrb[86].mxu0  ;;  %v3017_v50 = vmax.f32 %v2575_v52, 0.0  ;;  %v3507_v54 = vadd.f32 %v3506_v9, %v3505_v40  ;;  %v2585_v2 = vadd.f32 %v7428_v42, %v5734_v15 }
 0x198   : > { %v3244_v24 = vsel %vm3064_vm2, %v2893_v7, 0.0  ;;  %v3241_v3 = vadd.f32 %v3240_v34, %v3239_v8  ;;  %v1965_v11 = vadd.f32 %v7428_v42, %v5548_v29  ;;  %v1959_v21 = vpop.f32.mrb[87].mxu0  ;;  %v5740_v34 = vpop.f32.mrb[82].mxu1  ;;  %v5923_v7 = vpack.c.bf16 %v3631_v48, %v3630_v32 }
 0x199   : > { %v3242_v39 = vsel %vm3064_vm2, %v2892_v26, 0.0  ;;  %v1960_v17 = vadd.f32 %v7428_v42, %v1959_v21  ;;  %v2599_v45 = vpop.f32.mrb[83].mxu1  ;;  %v3512_v8 = vsel %vm3064_vm2, %v3017_v50, 0.0  ;;  %v3509_v52 = vadd.f32 %v3508_v58, %v3507_v54 }
 0x19a   : > { %v3243_v55 = vadd.f32 %v3242_v39, %v3241_v3  ;;  %v2895_v57 = vmax.f32 %v1965_v11, 0.0  ;;  %v3510_v12 = vsel %vm3064_vm2, %v3016_v5, 0.0  ;;  %5924 = vmatpush3.bf16.msra.mxu1 %v5923_v7  ;;  %v3019_v40 = vmax.f32 %v2585_v2, 0.0  ;;  %v5743_v39 = vpop.f32.mrb[84].mxu1 }
 0x19b   : > { %v2894_v59 = vmax.f32 %v1960_v17, 0.0  ;;  %v5551_v0 = vpop.f32.mrb[88].mxu0  ;;  %v3511_v48 = vadd.f32 %v3510_v12, %v3509_v52  ;;  %v2580_v15 = vadd.f32 %v7428_v42, %v2579_v28  ;;  %v2609_v9 = vpop.f32.mrb[85].mxu1  ;;  %5925 = vmatprep.subr.bf16.mxu1 %v6060_v60 }
 0x19c   : > { %v3248_v26 = vsel %vm3064_vm2, %v2895_v57, 0.0  ;;  %v3245_v29 = vadd.f32 %v3244_v24, %v3243_v55  ;;  %v1975_v21 = vadd.f32 %v7428_v42, %v5551_v0  ;;  %v1969_v47 = vpop.f32.mrb[89].mxu0  ;;  %v3516_v58 = vsel %vm3064_vm2, %v3019_v40, 0.0 }
 0x19d   : > { %v3246_v3 = vsel %vm3064_vm2, %v2894_v59, 0.0  ;;  %v1970_v11 = vadd.f32 %v7428_v42, %v1969_v47  ;;  %v2595_v55 = vadd.f32 %v7428_v42, %v5737_v53  ;;  %v2590_v57 = vadd.f32 %v7428_v42, %v2589_v23 }
 0x19e   : > { %v3247_v17 = vadd.f32 %v3246_v3, %v3245_v29  ;;  %v2897_v32 = vmax.f32 %v1975_v21, 0.0  ;;  %v3018_v7 = vmax.f32 %v2580_v15, 0.0  ;;  %v3513_v60 = vadd.f32 %v3512_v8, %v3511_v48  ;;  %v5746_v21 = vpop.f32.mrb[86].mxu1 }
 0x19f   : > { %v2896_v24 = vmax.f32 %v1970_v11, 0.0  ;;  %v5554_v50 = vpop.f32.mrb[90].mxu0  ;;  %v3021_v29 = vmax.f32 %v2595_v55, 0.0  ;;  %v3020_v3 = vmax.f32 %v2590_v57, 0.0  ;;  %v2619_v23 = vpop.f32.mrb[87].mxu1 }
 0x1a0   : > { %v3252_v54 = vsel %vm3064_vm2, %v2897_v32, 0.0  ;;  %v3249_v5 = vadd.f32 %v3248_v26, %v3247_v17  ;;  %v1985_v59 = vadd.f32 %v7428_v42, %v5554_v50  ;;  %v1979_v0 = vpop.f32.mrb[91].mxu0  ;;  %v3514_v53 = vsel %vm3064_vm2, %v3018_v7, 0.0 }
 0x1a1   : > { %v3250_v28 = vsel %vm3064_vm2, %v2896_v24, 0.0  ;;  %v1980_v2 = vadd.f32 %v7428_v42, %v1979_v0  ;;  %v3515_v26 = vadd.f32 %v3514_v53, %v3513_v60  ;;  %v3520_v40 = vsel %vm3064_vm2, %v3021_v29, 0.0 }
 0x1a2   : > { %v3251_v47 = vadd.f32 %v3250_v28, %v3249_v5  ;;  %v2899_v52 = vmax.f32 %v1985_v59, 0.0  ;;  %v2605_v17 = vadd.f32 %v7428_v42, %v5740_v34  ;;  %v3518_v24 = vsel %vm3064_vm2, %v3020_v3, 0.0  ;;  %v5749_v59 = vpop.f32.mrb[88].mxu1 }
 0x1a3   : > { %v2898_v11 = vmax.f32 %v1980_v2, 0.0  ;;  %v5557_v12 = vpop.f32.mrb[92].mxu0  ;;  %v3517_v57 = vadd.f32 %v3516_v58, %v3515_v26  ;;  %v2600_v28 = vadd.f32 %v7428_v42, %v2599_v45  ;;  %v2615_v34 = vadd.f32 %v7428_v42, %v5743_v39  ;;  %v2629_v2 = vpop.f32.mrb[89].mxu1 }
 0x1a4   : > { %v3256_v32 = vsel %vm3064_vm2, %v2899_v52, 0.0  ;;  %v3253_v15 = vadd.f32 %v3252_v54, %v3251_v47  ;;  %v1995_v8 = vadd.f32 %v7428_v42, %v5557_v12  ;;  %v1989_v48 = vpop.f32.mrb[93].mxu0  ;;  %v3023_v5 = vmax.f32 %v2605_v17, 0.0 }
 0x1a5   : > { %v3254_v50 = vsel %vm3064_vm2, %v2898_v11, 0.0  ;;  %v1990_v55 = vadd.f32 %v7428_v42, %v1989_v48  ;;  %v3519_v29 = vadd.f32 %v3518_v24, %v3517_v57  ;;  %v2610_v52 = vadd.f32 %v7428_v42, %v2609_v9 }
 0x1a6   : > { %v3255_v0 = vadd.f32 %v3254_v50, %v3253_v15  ;;  %v2901_v7 = vmax.f32 %v1995_v8, 0.0  ;;  %v3524_v47 = vsel %vm3064_vm2, %v3023_v5, 0.0  ;;  %v3022_v12 = vmax.f32 %v2600_v28, 0.0  ;;  %v5752_v15 = vpop.f32.mrb[90].mxu1 }
 0x1a7   : > { %v2900_v54 = vmax.f32 %v1990_v55, 0.0  ;;  %v5560_v60 = vpop.f32.mrb[94].mxu0  ;;  %v3521_v39 = vadd.f32 %v3520_v40, %v3519_v29  ;;  %v3025_v17 = vmax.f32 %v2615_v34, 0.0  ;;  %v3024_v50 = vmax.f32 %v2610_v52, 0.0  ;;  %v7600_v9 = vpop.f32.mrb[91].mxu1 }
 0x1a8   : > { %v3260_v53 = vsel %vm3064_vm2, %v2901_v7, 0.0  ;;  %v3257_v3 = vadd.f32 %v3256_v32, %v3255_v0  ;;  %v2005_v58 = vadd.f32 %v7428_v42, %v5560_v60  ;;  %v1999_v11 = vpop.f32.mrb[95].mxu0  ;;  %v3522_v24 = vsel %vm3064_vm2, %v3022_v12, 0.0 }
 0x1a9   : > { %v3258_v26 = vsel %vm3064_vm2, %v2900_v54, 0.0  ;;  %v2000_v45 = vadd.f32 %v7428_v42, %v1999_v11  ;;  %v3523_v57 = vadd.f32 %v3522_v24, %v3521_v39  ;;  %v3528_v5 = vsel %vm3064_vm2, %v3025_v17, 0.0 }
 0x1aa   : > { %v3259_v8 = vadd.f32 %v3258_v26, %v3257_v3  ;;  %v2903_v48 = vmax.f32 %v2005_v58, 0.0  ;;  %v2625_v0 = vadd.f32 %v7428_v42, %v5746_v21  ;;  %v3526_v54 = vsel %vm3064_vm2, %v3024_v50, 0.0  ;;  %v5755_v58 = vpop.f32.mrb[92].mxu1 }
 0x1ab   : > { %v2902_v55 = vmax.f32 %v2000_v45, 0.0  ;;  %v5563_v32 = vpop.f32.mrb[96].mxu0  ;;  %v3525_v52 = vadd.f32 %v3524_v47, %v3523_v57  ;;  %v2620_v26 = vadd.f32 %v7428_v42, %v2619_v23  ;;  %v2635_v21 = vadd.f32 %v7428_v42, %v5749_v59  ;;  %v7611_v45 = vpop.f32.mrb[93].mxu1 }
 0x1ac   : > { %v3264_v7 = vsel %vm3064_vm2, %v2903_v48, 0.0  ;;  %v3261_v28 = vadd.f32 %v3260_v53, %v3259_v8  ;;  %v2015_v40 = vadd.f32 %v7428_v42, %v5563_v32  ;;  %v2009_v34 = vpop.f32.mrb[97].mxu0  ;;  %v3027_v3 = vmax.f32 %v2625_v0, 0.0 }
 0x1ad   : > { %v3262_v60 = vsel %vm3064_vm2, %v2902_v55, 0.0  ;;  %v2010_v29 = vadd.f32 %v7428_v42, %v2009_v34  ;;  %v3527_v17 = vadd.f32 %v3526_v54, %v3525_v52  ;;  %v2630_v48 = vadd.f32 %v7428_v42, %v2629_v2 }
 0x1ae   : > { %v3263_v11 = vadd.f32 %v3262_v60, %v3261_v28  ;;  %v2905_v12 = vmax.f32 %v2015_v40, 0.0  ;;  %v3532_v8 = vsel %vm3064_vm2, %v3027_v3, 0.0  ;;  %v3026_v32 = vmax.f32 %v2620_v26, 0.0  ;;  %v7619_v28 = vpop.f32.mrb[94].mxu1 }
 0x1af   : > { %v2904_v53 = vmax.f32 %v2010_v29, 0.0  ;;  %v5566_v39 = vpop.f32.mrb[98].mxu0  ;;  %v3529_v57 = vadd.f32 %v3528_v5, %v3527_v17  ;;  %v3029_v0 = vmax.f32 %v2635_v21, 0.0  ;;  %v7626_v60 = vadd.f32 %v7428_v42, %v7088_v61 }
 0x1b0   : > { %v3265_v24 = vadd.f32 %v3264_v7, %v3263_v11  ;;  %v3273_v47 = vsel %vm3064_vm2, %v2905_v12, 0.0  ;;  %v2025_v50 = vadd.f32 %v7428_v42, %v5566_v39  ;;  %v2019_v55 = vpop.f32.mrb[99].mxu0  ;;  %v3530_v2 = vsel %vm3064_vm2, %v3026_v32, 0.0  ;;  %v7622_v7 = vpop.f32.mrb[95].mxu1 }
 0x1b1   : > { %v3272_v23 = vsel %vm3064_vm2, %v2904_v53, 0.0  ;;  %v2020_v59 = vadd.f32 %v7428_v42, %v2019_v55  ;;  %v3531_v3 = vadd.f32 %v3530_v2, %v3529_v57  ;;  %v3028_v11 = vmax.f32 %v2630_v48, 0.0 }
 0x1b2   : > { %v3266_v40 = vrot.slane %v3265_v24, 4  ;;  %v3274_v34 = vadd.f32 %v3273_v47, %v3272_v23  ;;  %v2907_v54 = vmax.f32 %v2025_v50, 0.0  ;;  %v3536_v21 = vsel %vm3064_vm2, %v3029_v0, 0.0  ;;  %v7634_v50 = vpop.f32.mrb[96].mxu1 }
 0x1b3   : > { %v2906_v29 = vmax.f32 %v2020_v59, 0.0  ;;  %v5569_v52 = vpop.f32.mrb[100].mxu0  ;;  %v2645_v53 = vadd.f32 %v7428_v42, %v5752_v15  ;;  %v3533_v47 = vadd.f32 %v3532_v8, %v3531_v3  ;;  %v3534_v61 = vsel %vm3064_vm2, %v3028_v11, 0.0  ;;  %v7637_v23 = vpop.f32.mrb[97].mxu1 }
 0x1b4   : > { %v3267_v12 = vadd.f32 %v3266_v40, %v3265_v24  ;;  %v2035_v5 = vadd.f32 %v7428_v42, %v5569_v52  ;;  %v2029_v26 = vpop.f32.mrb[101].mxu0  ;;  %v3277_v48 = vsel %vm3064_vm2, %v2907_v54, 0.0  ;;  %v2640_v40 = vadd.f32 %v7428_v42, %v7600_v9 }
 0x1b5   : > { %v3275_v39 = vsel %vm3064_vm2, %v2906_v29, 0.0  ;;  %v2030_v17 = vadd.f32 %v7428_v42, %v2029_v26  ;;  %v3535_v0 = vadd.f32 %v3534_v61, %v3533_v47  ;;  %v3031_v15 = vmax.f32 %v2645_v53, 0.0 }
 0x1b6   : > { %v3268_v55 = vrot.slane %v3267_v12, 2  ;;  %v3276_v24 = vadd.f32 %v3275_v39, %v3274_v34  ;;  %v2909_v32 = vmax.f32 %v2035_v5, 0.0  ;;  %v2655_v3 = vadd.f32 %v7428_v42, %v5755_v58  ;;  %v7645_v5 = vpop.f32.mrb[98].mxu1 }
 0x1b7   : > { %v2908_v59 = vmax.f32 %v2030_v17, 0.0  ;;  %v5572_v57 = vpop.f32.mrb[102].mxu0  ;;  %v3030_v11 = vmax.f32 %v2640_v40, 0.0  ;;  %v3537_v17 = vadd.f32 %v3536_v21, %v3535_v0  ;;  %v7647_v9 = vpop.f32.mrb[99].mxu1  ;;  %v3540_v58 = vsel %vm3064_vm2, %v3031_v15, 0.0 }
 0x1b8   : > { %v3269_v2 = vadd.f32 %v3268_v55, %v3267_v12  ;;  %v3278_v8 = vadd.f32 %v3277_v48, %v3276_v24  ;;  %v2045_v29 = vadd.f32 %v7428_v42, %v5572_v57  ;;  %v2039_v52 = vpop.f32.mrb[103].mxu0  ;;  %v3281_v12 = vsel %vm3064_vm2, %v2909_v32, 0.0  ;;  %v7656_v32 = vpop.f32.mrb[100].mxu1 }
 0x1b9   : > { %v3279_v34 = vsel %vm3064_vm2, %v2908_v59, 0.0  ;;  %v2040_v54 = vadd.f32 %v7428_v42, %v2039_v52  ;;  %v3538_v55 = vsel %vm3064_vm2, %v3030_v11, 0.0  ;;  %v3033_v40 = vmax.f32 %v2655_v3, 0.0 }
 0x1ba   : > { %v3270_v26 = vrot.slane %v3269_v2, 1  ;;  %v3280_v53 = vadd.f32 %v3279_v34, %v3278_v8  ;;  %v2911_v39 = vmax.f32 %v2045_v29, 0.0  ;;  %v3539_v29 = vadd.f32 %v3538_v55, %v3537_v17 }
 0x1bb   : > { %v2910_v47 = vmax.f32 %v2040_v54, 0.0  ;;  %v5575_v61 = vpop.f32.mrb[104].mxu0  ;;  %v7660_v54 = vpop.f32.mrb[101].mxu1  ;;  %v2941_v17 = vmax.f32 %v7508_v31, 0.0 }
 0x1bc   : > { %v3271_v48 = vadd.f32 %v3270_v26, %v3269_v2  ;;  %v3282_v24 = vadd.f32 %v3281_v12, %v3280_v53  ;;  %v2055_v59 = vadd.f32 %v7428_v42, %v5575_v61  ;;  %v2049_v57 = vpop.f32.mrb[105].mxu0  ;;  %v3285_v8 = vsel %vm3064_vm2, %v2911_v39, 0.0 }
 0x1bd   : > { %v3283_v21 = vsel %vm3064_vm2, %v2910_v47, 0.0  ;;  %v2050_v0 = vadd.f32 %v7428_v42, %v2049_v57  ;;  %v2650_v2 = vadd.f32 %v7428_v42, %v7611_v45  ;;  %v7662_v3 = vadd.f32 %v3540_v58, %v3539_v29 }
 0x1be   : > { %v3620_v52 = vmul.f32 0.00390625, %v3271_v48  ;;  %v3284_v34 = vadd.f32 %v3283_v21, %v3282_v24  ;;  %v2913_v15 = vmax.f32 %v2055_v59, 0.0  ;;  %v2665_v53 = vadd.f32 %v7428_v42, %v7619_v28  ;;  %v7677_v24 = vpop.f32.mrb[102].mxu1 }
 0x1bf   : > { %v2912_v11 = vmax.f32 %v2050_v0, 0.0  ;;  %v5578_v26 = vpop.f32.mrb[106].mxu0  ;;  %8234 = vst [vmem:[#allocation9_spill] sm:$0xff] %v7662_v3  ;;  %v2660_v39 = vadd.f32 %v7428_v42, %v7622_v7  ;;  %v3549_v48 = vsel %vm3064_vm2, %v3033_v40, 0.0  ;;  %v3032_v28 = vmax.f32 %v2650_v2, 0.0  ;;  %v7679_v21 = vpop.f32.mrb[103].mxu1 }
 0x1c0   : > { %v7671_v12 = vsel %vm3651_vm4, %v3620_v52, %v7503_v20  ;;  %v3286_v47 = vadd.f32 %v3285_v8, %v3284_v34  ;;  %v2065_v45 = vadd.f32 %v7428_v42, %v5578_v26  ;;  %v2059_v61 = vpop.f32.mrb[107].mxu0  ;;  %v3035_v31 = vmax.f32 %v2665_v53, 0.0 }
 0x1c1   : > { %v3287_v55 = vsel %vm3064_vm2, %v2912_v11, 0.0  ;;  %v2060_v58 = vadd.f32 %v7428_v42, %v2059_v61  ;;  %v3034_v57 = vmax.f32 %v2660_v39, 0.0  ;;  %v3289_v20 = vsel %vm3064_vm2, %v2913_v15, 0.0  ;;  %v7686_v42 = vld [vmem:[%s8220_s2] ss:$0 sm:$0xff] }
 0x1c2   : > { %v3288_v7 = vadd.f32 %v3287_v55, %v3286_v47  ;;  %v2915_v59 = vmax.f32 %v2065_v45, 0.0  ;;  %v3548_v29 = vsel %vm3064_vm2, %v3032_v28, 0.0  ;;  %v2675_v40 = vadd.f32 %v7686_v42, %v7634_v50  ;;  %v7698_v45 = vpop.f32.mrb[104].mxu1 }
 0x1c3   : > { %v2914_v8 = vmax.f32 %v2060_v58, 0.0  ;;  %v5581_v0 = vpop.f32.mrb[108].mxu0  ;;  %v2940_v52 = vmax.f32 %v7626_v60, 0.0  ;;  %v3550_v26 = vadd.f32 %v3549_v48, %v3548_v29  ;;  %v7693_v15 = vsel %vm3064_vm2, %v2941_v17, 0.0  ;;  %v7702_v58 = vpop.f32.mrb[105].mxu1 }
 0x1c4   : > { %v3290_v34 = vadd.f32 %v3289_v20, %v3288_v7  ;;  %v2075_v2 = vadd.f32 %v7686_v42, %v5581_v0  ;;  %v2069_v11 = vpop.f32.mrb[109].mxu0  ;;  %v3293_v53 = vsel %vm3064_vm2, %v2915_v59, 0.0  ;;  %v3553_v60 = vsel %vm3064_vm2, %v3035_v31, 0.0 }
 0x1c5   : > { %v3291_v39 = vsel %vm3064_vm2, %v2914_v8, 0.0  ;;  %v2070_v47 = vadd.f32 %v7686_v42, %v2069_v11  ;;  %v3551_v55 = vsel %vm3064_vm2, %v3034_v57, 0.0  ;;  %v3037_v7 = vmax.f32 %v2675_v40, 0.0 }
 0x1c6   : > { %v3292_v61 = vadd.f32 %v3291_v39, %v3290_v34  ;;  %v2917_v50 = vmax.f32 %v2075_v2, 0.0  ;;  %v3552_v17 = vadd.f32 %v3551_v55, %v3550_v26  ;;  %v2670_v59 = vadd.f32 %v7686_v42, %v7637_v23  ;;  %v7718_v23 = vpop.f32.mrb[106].mxu1 }
 0x1c7   : > { %v2916_v48 = vmax.f32 %v2070_v47, 0.0  ;;  %v5584_v28 = vpop.f32.mrb[110].mxu0  ;;  %v7708_v20 = vadd.f32 %v7686_v42, %v7106_v10  ;;  %v7712_v8 = vadd.f32 %v7686_v42, %v7112_v13  ;;  %v2685_v13 = vadd.f32 %v7686_v42, %v7645_v5  ;;  %v7722_v39 = vpop.f32.mrb[107].mxu1 }
 0x1c8   : > { %v3294_v31 = vadd.f32 %v3293_v53, %v3292_v61  ;;  %v2085_v57 = vadd.f32 %v7686_v42, %v5584_v28  ;;  %v2079_v0 = vpop.f32.mrb[111].mxu0  ;;  %v3297_v29 = vsel %vm3064_vm2, %v2917_v50, 0.0  ;;  %v3036_v2 = vmax.f32 %v2670_v59, 0.0 }
 0x1c9   : > { %v3295_v34 = vsel %vm3064_vm2, %v2916_v48, 0.0  ;;  %v2080_v40 = vadd.f32 %v7686_v42, %v2079_v0  ;;  %v3554_v26 = vadd.f32 %v3553_v60, %v3552_v17  ;;  %v3557_v61 = vsel %vm3064_vm2, %v3037_v7, 0.0  ;;  %v7735_v0 = vpop.f32.mrb[108].mxu1 }
 0x1ca   : > { %v3296_v11 = vadd.f32 %v3295_v34, %v3294_v31  ;;  %v2919_v10 = vmax.f32 %v2085_v57, 0.0  ;;  %v3555_v50 = vsel %vm3064_vm2, %v3036_v2, 0.0  ;;  %v2680_v55 = vadd.f32 %v7686_v42, %v7647_v9  ;;  %v7738_v2 = vpop.f32.mrb[109].mxu1 }
 0x1cb   : > { %v2918_v53 = vmax.f32 %v2080_v40, 0.0  ;;  %v5587_v47 = vpop.f32.mrb[112].mxu0  ;;  %v7729_v48 = vsel %vm3064_vm2, %v2940_v52, 0.0  ;;  %v3556_v59 = vadd.f32 %v3555_v50, %v3554_v26  ;;  %v3039_v7 = vmax.f32 %v2685_v13, 0.0 }
 0x1cc   : > { %v3298_v28 = vadd.f32 %v3297_v29, %v3296_v11  ;;  %v2095_v60 = vadd.f32 %v7686_v42, %v5587_v47  ;;  %v2089_v17 = vpop.f32.mrb[113].mxu0  ;;  %v3301_v34 = vsel %vm3064_vm2, %v2919_v10, 0.0  ;;  %v3038_v40 = vmax.f32 %v2680_v55, 0.0 }
 0x1cd   : > { %v3299_v31 = vsel %vm3064_vm2, %v2918_v53, 0.0  ;;  %v2090_v57 = vadd.f32 %v7686_v42, %v2089_v17  ;;  %v3558_v52 = vadd.f32 %v3557_v61, %v3556_v59  ;;  %v2695_v26 = vadd.f32 %v7686_v42, %v7656_v32 }
 0x1ce   : > { %v3300_v9 = vadd.f32 %v3299_v31, %v3298_v28  ;;  %v2921_v29 = vmax.f32 %v2095_v60, 0.0  ;;  %v2690_v53 = vadd.f32 %v7686_v42, %v7660_v54  ;;  %v3561_v10 = vsel %vm3064_vm2, %v3039_v7, 0.0  ;;  %v7749_v31 = vpop.f32.mrb[110].mxu1 }
 0x1cf   : > { %v2920_v11 = vmax.f32 %v2090_v57, 0.0  ;;  %v5590_v47 = vpop.f32.mrb[114].mxu0  ;;  %v3559_v55 = vsel %vm3064_vm2, %v3038_v40, 0.0  ;;  %v3041_v59 = vmax.f32 %v2695_v26, 0.0  ;;  %v2705_v54 = vadd.f32 %v7686_v42, %v7677_v24 }
 0x1d0   : > { %v3302_v50 = vadd.f32 %v3301_v34, %v3300_v9  ;;  %v2105_v13 = vadd.f32 %v7686_v42, %v5590_v47  ;;  %v2099_v17 = vpop.f32.mrb[115].mxu0  ;;  %v3560_v60 = vadd.f32 %v3559_v55, %v3558_v52  ;;  %v3040_v5 = vmax.f32 %v2690_v53, 0.0  ;;  %v7753_v34 = vpop.f32.mrb[111].mxu1 }
 0x1d1   : > { %v3303_v61 = vsel %vm3064_vm2, %v2920_v11, 0.0  ;;  %v2100_v28 = vadd.f32 %v7686_v42, %v2099_v17  ;;  %v3305_v7 = vsel %vm3064_vm2, %v2921_v29, 0.0  ;;  %v2700_v11 = vadd.f32 %v7686_v42, %v7679_v21 }
 0x1d2   : > { %v3304_v32 = vadd.f32 %v3303_v61, %v3302_v50  ;;  %v2923_v57 = vmax.f32 %v2105_v13, 0.0  ;;  %v3562_v47 = vadd.f32 %v3561_v10, %v3560_v60  ;;  %v3565_v50 = vsel %vm3064_vm2, %v3041_v59, 0.0  ;;  %v7763_v61 = vpop.f32.mrb[112].mxu1 }
 0x1d3   : > { %v2922_v9 = vmax.f32 %v2100_v28, 0.0  ;;  %v5593_v40 = vpop.f32.mrb[116].mxu0  ;;  %v3563_v53 = vsel %vm3064_vm2, %v3040_v5, 0.0  ;;  %v3043_v29 = vmax.f32 %v2705_v54, 0.0  ;;  %v3042_v21 = vmax.f32 %v2700_v11, 0.0 }
 0x1d4   : > { %v3306_v52 = vadd.f32 %v3305_v7, %v3304_v32  ;;  %v2115_v26 = vadd.f32 %v7686_v42, %v5593_v40  ;;  %v2109_v17 = vpop.f32.mrb[117].mxu0  ;;  %v3564_v55 = vadd.f32 %v3563_v53, %v3562_v47  ;;  %v3309_v10 = vsel %vm3064_vm2, %v2923_v57, 0.0  ;;  %v7768_v32 = vpop.f32.mrb[113].mxu1 }
 0x1d5   : > { %v3307_v24 = vsel %vm3064_vm2, %v2922_v9, 0.0  ;;  %v2110_v13 = vadd.f32 %v7686_v42, %v2109_v17  ;;  %v2715_v60 = vadd.f32 %v7686_v42, %v7698_v45  ;;  %v2710_v9 = vadd.f32 %v7686_v42, %v7702_v58 }
 0x1d6   : > { %v3308_v28 = vadd.f32 %v3307_v24, %v3306_v52  ;;  %v2925_v59 = vmax.f32 %v2115_v26, 0.0  ;;  %v3566_v40 = vadd.f32 %v3565_v50, %v3564_v55  ;;  %v3569_v57 = vsel %vm3064_vm2, %v3043_v29, 0.0  ;;  %v7777_v24 = vpop.f32.mrb[114].mxu1 }
 0x1d7   : > { %v2924_v7 = vmax.f32 %v2110_v13, 0.0  ;;  %v5596_v5 = vpop.f32.mrb[118].mxu0  ;;  %v3567_v11 = vsel %vm3064_vm2, %v3042_v21, 0.0  ;;  %v3045_v26 = vmax.f32 %v2715_v60, 0.0  ;;  %v3044_v55 = vmax.f32 %v2710_v9, 0.0 }
 0x1d8   : > { %v3310_v47 = vadd.f32 %v3309_v10, %v3308_v28  ;;  %v2125_v54 = vadd.f32 %v7686_v42, %v5596_v5  ;;  %v2119_v17 = vpop.f32.mrb[119].mxu0  ;;  %v3568_v53 = vadd.f32 %v3567_v11, %v3566_v40  ;;  %v2725_v58 = vadd.f32 %v7686_v42, %v7718_v23  ;;  %v7781_v10 = vpop.f32.mrb[115].mxu1 }
 0x1d9   : > { %v3311_v52 = vsel %vm3064_vm2, %v2924_v7, 0.0  ;;  %v2120_v45 = vadd.f32 %v7686_v42, %v2119_v17  ;;  %v3313_v29 = vsel %vm3064_vm2, %v2925_v59, 0.0  ;;  %v2720_v7 = vadd.f32 %v7686_v42, %v7722_v39 }
 0x1da   : > { %v3312_v50 = vadd.f32 %v3311_v52, %v3310_v47  ;;  %v2927_v13 = vmax.f32 %v2125_v54, 0.0  ;;  %v3570_v5 = vadd.f32 %v3569_v57, %v3568_v53  ;;  %v3573_v47 = vsel %vm3064_vm2, %v3045_v26, 0.0  ;;  %v7791_v52 = vpop.f32.mrb[116].mxu1 }
 0x1db   : > { %v2926_v28 = vmax.f32 %v2120_v45, 0.0  ;;  %v5599_v21 = vpop.f32.mrb[120].mxu0  ;;  %v3571_v9 = vsel %vm3064_vm2, %v3044_v55, 0.0  ;;  %v3047_v59 = vmax.f32 %v2725_v58, 0.0  ;;  %v3046_v39 = vmax.f32 %v2720_v7, 0.0  ;;  %v3632_v58 = vld [vmem:[%s8221_s3 + $0x30] sm:$0xff] }
 0x1dc   : > { %v3314_v40 = vadd.f32 %v3313_v29, %v3312_v50  ;;  %v2135_v60 = vadd.f32 %v7686_v42, %v5599_v21  ;;  %v2129_v17 = vpop.f32.mrb[121].mxu0  ;;  %v3572_v11 = vadd.f32 %v3571_v9, %v3570_v5  ;;  %v3317_v57 = vsel %vm3064_vm2, %v2927_v13, 0.0  ;;  %v7796_v50 = vpop.f32.mrb[117].mxu1  ;;  %v3633_v13 = vld [vmem:[%s8221_s3 + $0x38] sm:$0xff] }
 0x1dd   : > { %v3315_v23 = vsel %vm3064_vm2, %v2926_v28, 0.0  ;;  %v2130_v54 = vadd.f32 %v7686_v42, %v2129_v17  ;;  %v2735_v53 = vadd.f32 %v7686_v42, %v7735_v0  ;;  %v2730_v28 = vadd.f32 %v7686_v42, %v7738_v2 }
 0x1de   : > { %v3316_v45 = vadd.f32 %v3315_v23, %v3314_v40  ;;  %v2929_v26 = vmax.f32 %v2135_v60, 0.0  ;;  %v3574_v21 = vadd.f32 %v3573_v47, %v3572_v11  ;;  %v3577_v40 = vsel %vm3064_vm2, %v3047_v59, 0.0  ;;  %v7811_v23 = vpop.f32.mrb[118].mxu1 }
 0x1df   : > { %v2928_v29 = vmax.f32 %v2130_v54, 0.0  ;;  %v5602_v55 = vpop.f32.mrb[122].mxu0  ;;  %v3575_v60 = vsel %vm3064_vm2, %v3046_v39, 0.0  ;;  %v3049_v9 = vmax.f32 %v2735_v53, 0.0  ;;  %v3048_v3 = vmax.f32 %v2730_v28, 0.0 }
 0x1e0   : > { %v3318_v5 = vadd.f32 %v3317_v57, %v3316_v45  ;;  %v2145_v0 = vadd.f32 %v7686_v42, %v5602_v55  ;;  %v2139_v7 = vpop.f32.mrb[123].mxu0  ;;  %v3576_v47 = vadd.f32 %v3575_v60, %v3574_v21  ;;  %v5926_v37 = vpack.c.bf16 %v3633_v13, %v3632_v58  ;;  %v7813_v57 = vpop.f32.mrb[119].mxu1 }
 0x1e1   : > { %v3319_v17 = vsel %vm3064_vm2, %v2928_v29, 0.0  ;;  %v2140_v2 = vadd.f32 %v7686_v42, %v2139_v7  ;;  %v3321_v45 = vsel %vm3064_vm2, %v2929_v26, 0.0  ;;  %v2745_v39 = vadd.f32 %v7686_v42, %v7749_v31 }
 0x1e2   : > { %v3320_v54 = vadd.f32 %v3319_v17, %v3318_v5  ;;  %v2931_v11 = vmax.f32 %v2145_v0, 0.0  ;;  %v3578_v41 = vadd.f32 %v3577_v40, %v3576_v47  ;;  %v3581_v7 = vsel %vm3064_vm2, %v3049_v9, 0.0  ;;  %5927 = vmatpush3.bf16.msra.mxu1 %v5926_v37  ;;  %v7823_v0 = vpop.f32.mrb[120].mxu1 }
 0x1e3   : > { %v2930_v55 = vmax.f32 %v2140_v2, 0.0  ;;  %v5605_v59 = vpop.f32.mrb[124].mxu0  ;;  %v3579_v5 = vsel %vm3064_vm2, %v3048_v3, 0.0  ;;  %v3051_v13 = vmax.f32 %v2745_v39, 0.0  ;;  %v2740_v60 = vadd.f32 %v7686_v42, %v7753_v34  ;;  %v7830_v2 = vpop.f32.mrb[121].mxu1 }
 0x1e4   : > { %v3322_v29 = vadd.f32 %v3321_v45, %v3320_v54  ;;  %v2155_v21 = vadd.f32 %v7686_v42, %v5605_v59  ;;  %v2149_v53 = vpop.f32.mrb[125].mxu0  ;;  %v3580_v26 = vadd.f32 %v3579_v5, %v3578_v41  ;;  %v3325_v40 = vsel %vm3064_vm2, %v2931_v11, 0.0 }
 0x1e5   : > { %v3323_v28 = vsel %vm3064_vm2, %v2930_v55, 0.0  ;;  %v2150_v58 = vadd.f32 %v7686_v42, %v2149_v53  ;;  %v2755_v17 = vadd.f32 %v7686_v42, %v7763_v61  ;;  %v2750_v41 = vadd.f32 %v7686_v42, %v7768_v32 }
 0x1e6   : > { %v3324_v31 = vadd.f32 %v3323_v28, %v3322_v29  ;;  %v2933_v37 = vmax.f32 %v2155_v21, 0.0  ;;  %v3582_v9 = vadd.f32 %v3581_v7, %v3580_v26  ;;  %v3585_v55 = vsel %vm3064_vm2, %v3051_v13, 0.0  ;;  %v7838_v21 = vpop.f32.mrb[122].mxu1 }
 0x1e7   : > { %v2932_v3 = vmax.f32 %v2150_v58, 0.0  ;;  %v5608_v47 = vpop.f32.mrb[126].mxu0  ;;  %v3050_v59 = vmax.f32 %v2740_v60, 0.0  ;;  %v3053_v39 = vmax.f32 %v2755_v17, 0.0  ;;  %v3052_v29 = vmax.f32 %v2750_v41, 0.0  ;;  %v7843_v28 = vpop.f32.mrb[123].mxu1 }
 0x1e8   : > { %v3326_v54 = vadd.f32 %v3325_v40, %v3324_v31  ;;  %v2165_v45 = vadd.f32 %v7686_v42, %v5608_v47  ;;  %v2159_v11 = vpop.f32.mrb[127].mxu0  ;;  %v2765_v32 = vadd.f32 %v7686_v42, %v7777_v24  ;;  %v3329_v58 = vsel %vm3064_vm2, %v2933_v37, 0.0 }
 0x1e9   : > { %v3327_v34 = vsel %vm3064_vm2, %v2932_v3, 0.0  ;;  %v2160_v61 = vadd.f32 %v7686_v42, %v2159_v11  ;;  %v3583_v5 = vsel %vm3064_vm2, %v3050_v59, 0.0  ;;  %v3589_v31 = vsel %vm3064_vm2, %v3053_v39, 0.0 }
 0x1ea   : > { %v3328_v53 = vadd.f32 %v3327_v34, %v3326_v54  ;;  %v2935_v7 = vmax.f32 %v2165_v45, 0.0  ;;  %v3584_v40 = vadd.f32 %v3583_v5, %v3582_v9  ;;  %v3587_v47 = vsel %vm3064_vm2, %v3052_v29, 0.0 }
 0x1eb   : > { %v2934_v26 = vmax.f32 %v2160_v61, 0.0  ;;  %v5611_v13 = vpop.f32.mrb[128].mxu0  ;;  %v3055_v41 = vmax.f32 %v2765_v32, 0.0  ;;  %v2760_v37 = vadd.f32 %v7686_v42, %v7781_v10  ;;  %v2775_v34 = vadd.f32 %v7686_v42, %v7791_v52 }
 0x1ec   : > { %v3330_v60 = vadd.f32 %v3329_v58, %v3328_v53  ;;  %v2175_v17 = vadd.f32 %v7686_v42, %v5611_v13  ;;  %v2169_v3 = vpop.f32.mrb[129].mxu0  ;;  %v3586_v45 = vadd.f32 %v3585_v55, %v3584_v40  ;;  %v3333_v11 = vsel %vm3064_vm2, %v2935_v7, 0.0 }
 0x1ed   : > { %v3331_v54 = vsel %vm3064_vm2, %v2934_v26, 0.0  ;;  %v2170_v24 = vadd.f32 %v7686_v42, %v2169_v3  ;;  %v3054_v29 = vmax.f32 %v2760_v37, 0.0  ;;  %v2770_v5 = vadd.f32 %v7686_v42, %v7796_v50 }
 0x1ee   : > { %v3332_v9 = vadd.f32 %v3331_v54, %v3330_v60  ;;  %v2937_v59 = vmax.f32 %v2175_v17, 0.0  ;;  %v3588_v53 = vadd.f32 %v3587_v47, %v3586_v45  ;;  %v3593_v7 = vsel %vm3064_vm2, %v3055_v41, 0.0 }
 0x1ef   : > { %v2936_v61 = vmax.f32 %v2170_v24, 0.0  ;;  %v5614_v39 = vpop.f32.mrb[130].mxu0  ;;  %v3591_v40 = vsel %vm3064_vm2, %v3054_v29, 0.0  ;;  %v3057_v47 = vmax.f32 %v2775_v34, 0.0  ;;  %v3056_v24 = vmax.f32 %v2770_v5, 0.0 }
 0x1f0   : > { %v3334_v32 = vadd.f32 %v3333_v11, %v3332_v9  ;;  %v3342_v55 = vsel %vm3064_vm2, %v2937_v59, 0.0  ;;  %v2185_v58 = vadd.f32 %v7686_v42, %v5614_v39  ;;  %v2179_v10 = vpop.f32.mrb[131].mxu0  ;;  %v3590_v52 = vadd.f32 %v3589_v31, %v3588_v53 }
 0x1f1   : > { %v3341_v26 = vsel %vm3064_vm2, %v2936_v61, 0.0  ;;  %v2180_v13 = vadd.f32 %v7686_v42, %v2179_v10  ;;  %v2785_v45 = vadd.f32 %v7686_v42, %v7811_v23  ;;  %v2210_v41 = vadd.f32 %v7686_v42, %v7136_v30 }
 0x1f2   : > { %v3335_v60 = vrot.slane %v3334_v32, 4  ;;  %v3343_v17 = vadd.f32 %v3342_v55, %v3341_v26  ;;  %v2939_v3 = vmax.f32 %v2185_v58, 0.0  ;;  %v3592_v54 = vadd.f32 %v3591_v40, %v3590_v52 }
 0x1f3   : > { %v2938_v50 = vmax.f32 %v2180_v13, 0.0  ;;  %v2780_v11 = vadd.f32 %v7686_v42, %v7813_v57  ;;  %v2795_v31 = vadd.f32 %v7686_v42, %v7823_v0  ;;  %v3595_v34 = vsel %vm3064_vm2, %v3056_v24, 0.0 }
 0x1f4   : > { %v3336_v37 = vadd.f32 %v3335_v60, %v3334_v32  ;;  %v3594_v59 = vadd.f32 %v3593_v7, %v3592_v54  ;;  %v3059_v61 = vmax.f32 %v2785_v45, 0.0  ;;  %v3597_v23 = vsel %vm3064_vm2, %v3057_v47, 0.0 }
 0x1f5   : > { %v3344_v9 = vsel %vm3064_vm2, %v2938_v50, 0.0  ;;  %v3058_v29 = vmax.f32 %v2780_v11, 0.0  ;;  %v3346_v30 = vsel %vm3064_vm2, %v2939_v3, 0.0  ;;  %v3061_v32 = vmax.f32 %v2795_v31, 0.0 }
 0x1f6   : > { %v3337_v39 = vrot.slane %v3336_v37, 2  ;;  %v3345_v53 = vadd.f32 %v3344_v9, %v3343_v17  ;;  %v3596_v5 = vadd.f32 %v3595_v34, %v3594_v59  ;;  %v2790_v57 = vadd.f32 %v7686_v42, %v7830_v2 }
 0x1f7   : > { %v3601_v58 = vsel %vm3064_vm2, %v3059_v61, 0.0  ;;  %v3599_v10 = vsel %vm3064_vm2, %v3058_v29, 0.0  ;;  %v2805_v13 = vadd.f32 %v7686_v42, %v7838_v21  ;;  %v2800_v52 = vadd.f32 %v7686_v42, %v7843_v28 }
 0x1f8   : > { %v3338_v55 = vadd.f32 %v3337_v39, %v3336_v37  ;;  %v3347_v0 = vadd.f32 %v3346_v30, %v3345_v53  ;;  %v3598_v7 = vadd.f32 %v3597_v23, %v3596_v5  ;;  %v3060_v26 = vmax.f32 %v2790_v57, 0.0 }
 0x1f9   : > { %v2943_v17 = vmax.f32 %v7708_v20, 0.0  ;;  %v8235_v2 = vmax.f32 %v7712_v8, 0.0  ;;  %v2215_v47 = vadd.f32 %v7686_v42, %v7130_v27  ;;  %v6062_v54 = vmov 0.0  }
 0x1fa   : > { %v3339_v40 = vrot.slane %v3338_v55, 1  ;;  %v3349_v60 = vadd.f32 %v7729_v48, %v3347_v0  ;;  %v3600_v50 = vadd.f32 %v3599_v10, %v3598_v7  ;;  %5817 = vmatprep.mubr.msk.f32.mxu1 %vm6061_vm5, %v6062_v54  ;;  %5820 = vmatprep.subr.bf16.mxu1 %v6062_v54  ;;  %v3603_v20 = vsel %vm3064_vm2, %v3060_v26, 0.0 }
 0x1fb   : > { %v3352_v3 = vsel %vm3064_vm2, %v8235_v2, 0.0  ;;  %v3062_v28 = vmax.f32 %v2800_v52, 0.0  ;;  %v2944_v8 = vmax.f32 %v2210_v41, 0.0  ;;  %v2220_v24 = vadd.f32 %v7686_v42, %v7160_v46 }
 0x1fc   : > { %v3340_v21 = vadd.f32 %v3339_v40, %v3338_v55  ;;  %v3351_v48 = vadd.f32 %v7693_v15, %v3349_v60  ;;  %v3602_v27 = vadd.f32 %v3601_v58, %v3600_v50  ;;  %v3605_v11 = vsel %vm3064_vm2, %v3061_v32, 0.0 }
 0x1fd   : > { %v3063_v31 = vmax.f32 %v2805_v13, 0.0  ;;  %v3354_v9 = vsel %vm3064_vm2, %v2943_v17, 0.0  ;;  %v2945_v59 = vmax.f32 %v2215_v47, 0.0  ;;  %v2225_v15 = vadd.f32 %v7686_v42, %v7154_v43 }
 0x1fe   : > { %v3621_v45 = vmul.f32 0.00390625, %v3340_v21  ;;  %v3353_v37 = vadd.f32 %v3352_v3, %v3351_v48  ;;  %v3604_v34 = vadd.f32 %v3603_v20, %v3602_v27  ;;  %v3607_v46 = vsel %vm3064_vm2, %v3062_v28, 0.0 }
 0x1ff   : > { %v3356_v39 = vsel %vm3064_vm2, %v2944_v8, 0.0  ;;  %v2946_v53 = vmax.f32 %v2220_v24, 0.0  ;;  %v2230_v23 = vadd.f32 %v7686_v42, %v7184_v1  ;;  %v3609_v5 = vsel %vm3064_vm2, %v3063_v31, 0.0 }
 0x200   : > { %v7903_v61 = vsel %vm3653_vm6, %v3621_v45, %v7671_v12  ;;  %v3355_v41 = vadd.f32 %v3354_v9, %v3353_v37  ;;  %v3606_v29 = vadd.f32 %v3605_v11, %v3604_v34  ;;  %v3358_v32 = vsel %vm3064_vm2, %v2945_v59, 0.0 }
 0x201   : > { %v2947_v43 = vmax.f32 %v2225_v15, 0.0  ;;  %v2235_v12 = vadd.f32 %v7686_v42, %v7178_v62  ;;  %v3360_v0 = vsel %vm3064_vm2, %v2946_v53, 0.0  ;;  %v2948_v58 = vmax.f32 %v2230_v23, 0.0 }
 0x202   : > { %v3357_v30 = vadd.f32 %v3356_v39, %v3355_v41  ;;  %v3608_v57 = vadd.f32 %v3607_v46, %v3606_v29  ;;  %v2240_v10 = vadd.f32 %v7686_v42, %v7208_v19  ;;  %v2245_v52 = vadd.f32 %v7686_v42, %v7202_v16 }
 0x203   : > { %v3362_v26 = vsel %vm3064_vm2, %v2947_v43, 0.0  ;;  %v2949_v13 = vmax.f32 %v2235_v12, 0.0  ;;  %v3364_v62 = vsel %vm3064_vm2, %v2948_v58, 0.0  ;;  %v2250_v17 = vadd.f32 %v7686_v42, %v7232_v38 }
 0x204   : > { %v3359_v55 = vadd.f32 %v3358_v32, %v3357_v30  ;;  %v7916_v7 = vadd.f32 %v3609_v5, %v3608_v57  ;;  %v2950_v60 = vmax.f32 %v2240_v10, 0.0  ;;  %v2951_v19 = vmax.f32 %v2245_v52, 0.0 }
 0x205   : > { %v3366_v3 = vsel %vm3064_vm2, %v2949_v13, 0.0  ;;  %v2255_v47 = vadd.f32 %v7686_v42, %v7226_v35  ;;  %v2952_v48 = vmax.f32 %v2250_v17, 0.0  ;;  %v2260_v16 = vadd.f32 %v7686_v42, %v7262_v63 }
 0x206   : > { %v3361_v1 = vadd.f32 %v3360_v0, %v3359_v55  ;;  %v3368_v21 = vsel %vm3064_vm2, %v2950_v60, 0.0  ;;  %v3370_v28 = vsel %vm3064_vm2, %v2951_v19, 0.0  ;;  %v2265_v38 = vadd.f32 %v7686_v42, %v7256_v56  ;;  %v8236_v19 = vld [vmem:[#allocation7_spill] sm:$0xff] }
 0x207   : > { %v2953_v8 = vmax.f32 %v2255_v47, 0.0  ;;  %v3372_v27 = vsel %vm3064_vm2, %v2952_v48, 0.0  ;;  %v2954_v45 = vmax.f32 %v2260_v16, 0.0  ;;  %v2270_v35 = vadd.f32 %v7686_v42, %v7284_v18  ;;  %v8237_v47 = vld [vmem:[#allocation8_spill] sm:$0xff] }
 0x208   : > { %v3363_v40 = vadd.f32 %v3362_v26, %v3361_v1  ;;  %v2955_v31 = vmax.f32 %v2265_v38, 0.0  ;;  %v2275_v63 = vadd.f32 %v7686_v42, %v7278_v14  ;;  %v2280_v56 = vadd.f32 %v7686_v42, %v7297_v36 }
 0x209   : > { %v3374_v11 = vsel %vm3064_vm2, %v2953_v8, 0.0  ;;  %v3376_v59 = vsel %vm3064_vm2, %v2954_v45, 0.0  ;;  %v2956_v15 = vmax.f32 %v2270_v35, 0.0  ;;  %v2285_v18 = vadd.f32 %v7686_v42, %v7295_v33 }
 0x20a   : > { %v3365_v2 = vadd.f32 %v3364_v62, %v3363_v40  ;;  %v3378_v41 = vsel %vm3064_vm2, %v2955_v31, 0.0  ;;  %v2957_v46 = vmax.f32 %v2275_v63, 0.0  ;;  %v2958_v23 = vmax.f32 %v2280_v56, 0.0 }
 0x20b   : > { %v3380_v53 = vsel %vm3064_vm2, %v2956_v15, 0.0  ;;  %v2290_v14 = vadd.f32 %v7686_v42, %v7306_v51  ;;  %v2959_v5 = vmax.f32 %v2285_v18, 0.0  ;;  %v2295_v36 = vadd.f32 %v7686_v42, %v7304_v49 }
 0x20c   : > { %v3367_v50 = vadd.f32 %v3366_v3, %v3365_v2  ;;  %v3382_v30 = vsel %vm3064_vm2, %v2957_v46, 0.0  ;;  %v3384_v43 = vsel %vm3064_vm2, %v2958_v23, 0.0  ;;  %v2300_v33 = vadd.f32 %v7686_v42, %v7314_v6 }
 0x20d   : > { %v2960_v12 = vmax.f32 %v2290_v14, 0.0  ;;  %v3386_v55 = vsel %vm3064_vm2, %v2959_v5, 0.0  ;;  %v2961_v0 = vmax.f32 %v2295_v36, 0.0  ;;  %v2305_v51 = vadd.f32 %v7686_v42, %v7312_v4 }
 0x20e   : > { %v3369_v20 = vadd.f32 %v3368_v21, %v3367_v50  ;;  %v2962_v1 = vmax.f32 %v2300_v33, 0.0  ;;  %v2310_v49 = vadd.f32 %v7686_v42, %v7322_v25  ;;  %v2315_v6 = vadd.f32 %v7686_v42, %v7320_v22  ;;  %v8238_v21 = vld [vmem:[#allocation9_spill] sm:$0xff] }
 0x20f   : > { %v3388_v10 = vsel %vm3064_vm2, %v2960_v12, 0.0  ;;  %v3390_v13 = vsel %vm3064_vm2, %v2961_v0, 0.0  ;;  %v2963_v52 = vmax.f32 %v2305_v51, 0.0  ;;  %v2320_v4 = vadd.f32 %v7686_v42, %v7330_v44 }
 0x210   : > { %v3371_v24 = vadd.f32 %v3370_v28, %v3369_v20  ;;  %v3392_v62 = vsel %vm3064_vm2, %v2962_v1, 0.0  ;;  %v2964_v60 = vmax.f32 %v2310_v49, 0.0  ;;  %v2965_v3 = vmax.f32 %v2315_v6, 0.0  ;;  %v5066_v6 = vld [vmem:[%s6151_s23] ss:$0 sm:$0xff] }
 0x211   : > { %v3394_v2 = vsel %vm3064_vm2, %v2963_v52, 0.0  ;;  %v2325_v25 = vadd.f32 %v7686_v42, %v8236_v19  ;;  %v3473_v50 = vrot.slane %v8237_v47, 4  ;;  %v3542_v48 = vrot.slane %v8238_v21, 4 }
 0x212   : > { %v3373_v37 = vadd.f32 %v3372_v27, %v3371_v24  ;;  %v3396_v22 = vsel %vm3064_vm2, %v2964_v60, 0.0  ;;  %v2966_v20 = vmax.f32 %v2320_v4, 0.0  ;;  %v3611_v28 = vrot.slane %v7916_v7, 4 }
 0x213   : > { %v3398_v44 = vsel %vm3064_vm2, %v2965_v3, 0.0  ;;  %v2967_v38 = vmax.f32 %v2325_v25, 0.0  ;;  %v3474_v24 = vadd.f32 %v3473_v50, %v8237_v47  ;;  %v3543_v27 = vadd.f32 %v3542_v48, %v8238_v21 }
 0x214   : > { %v3375_v9 = vadd.f32 %v3374_v11, %v3373_v37  ;;  %v3400_v42 = vsel %vm3064_vm2, %v2966_v20, 0.0  ;;  %v3612_v35 = vadd.f32 %v3611_v28, %v7916_v7 }
 0x215   : > { %v3402_v11 = vsel %vm3064_vm2, %v2967_v38, 0.0  ;;  %v3475_v31 = vrot.slane %v3474_v24, 2  ;;  %v3544_v63 = vrot.slane %v3543_v27, 2 }
 0x216   : > { %v3377_v34 = vadd.f32 %v3376_v59, %v3375_v9  ;;  %v3613_v59 = vrot.slane %v3612_v35, 2 }
 0x217   : > { %v3476_v56 = vadd.f32 %v3475_v31, %v3474_v24 }
 0x218   : > { %v3379_v39 = vadd.f32 %v3378_v41, %v3377_v34  ;;  %v3545_v34 = vadd.f32 %v3544_v63, %v3543_v27  ;;  %v3614_v46 = vadd.f32 %v3613_v59, %v3612_v35 }
 0x21a   : > { %v3381_v29 = vadd.f32 %v3380_v53, %v3379_v39  ;;  %v3477_v39 = vrot.slane %v3476_v56, 1  ;;  %v3546_v53 = vrot.slane %v3545_v34, 1  ;;  %v3615_v14 = vrot.slane %v3614_v46, 1 }
 0x21c   : > { %v3383_v32 = vadd.f32 %v3382_v30, %v3381_v29  ;;  %v3478_v30 = vadd.f32 %v3477_v39, %v3476_v56  ;;  %v3547_v7 = vadd.f32 %v3546_v53, %v3545_v34  ;;  %v3616_v36 = vadd.f32 %v3615_v14, %v3614_v46 }
 0x21e   : > { %v3385_v57 = vadd.f32 %v3384_v43, %v3383_v32  ;;  %v3623_v43 = vmul.f32 0.00390625, %v3478_v30  ;;  %v3624_v12 = vmul.f32 0.00390625, %v3547_v7 }
 0x220   : > { %v3387_v58 = vadd.f32 %v3386_v55, %v3385_v57  ;;  %v3625_v57 = vmul.f32 0.00390625, %v3616_v36 }
 0x222   : > { %v3389_v26 = vadd.f32 %v3388_v10, %v3387_v58  ;;  %v5964_v58 = vld [vmem:[%s6156_s26] sm:$0xff]   ;;  %v5965_v10 = vld [vmem:[%s6156_s26 + $0x8] sm:$0xff]  }
 0x224   : > { %v3391_v40 = vadd.f32 %v3390_v13, %v3389_v26 }
 0x226   : > { %v3393_v17 = vadd.f32 %v3392_v62, %v3391_v40 }
 0x228   : > { %v3395_v16 = vadd.f32 %v3394_v2, %v3393_v17 }
 0x22a   : > { %v3397_v8 = vadd.f32 %v3396_v22, %v3395_v16 }
 0x22c   : > { %v3399_v45 = vadd.f32 %v3398_v44, %v3397_v8 }
 0x22e   : > { %v3401_v37 = vadd.f32 %v3400_v42, %v3399_v45 }
 0x230   : > { %v3403_v9 = vadd.f32 %v3402_v11, %v3401_v37 }
 0x232   : > { %v3404_v15 = vrot.slane %v3403_v9, 4 }
 0x234   : > { %v3405_v41 = vadd.f32 %v3404_v15, %v3403_v9 }
 0x236   : > { %v3406_v18 = vrot.slane %v3405_v41, 2 }
 0x238   : > { %v3407_v23 = vadd.f32 %v3406_v18, %v3405_v41 }
 0x23a   : > { %v3408_v29 = vrot.slane %v3407_v23, 1 }
 0x23c   : > { %v3409_v5 = vadd.f32 %v3408_v29, %v3407_v23 }
 0x23e   : > { %v3622_v32 = vmul.f32 0.00390625, %v3409_v5 }
 0x240   : > { %v3656_v33 = vsel %vm3655_vm7, %v3622_v32, %v7903_v61  ;;  %v5064_v61 = vld [vmem:[%s8222_s4] ss:$0 sm:$0xff] }
 0x241   : > { %v3658_v55 = vsel %vm3657_vm8, %v3623_v43, %v3656_v33 }
 0x242   : > { %v3660_v0 = vsel %vm3659_vm9, %v3624_v12, %v3658_v55 }
 0x243   : > { %v3662_v51 = vsel %vm3661_vm10, %v3625_v57, %v3660_v0 }
 0x244   : > { %5818 = vmatmul.mubr.msk.f32.vlgmr.msra.gmra.mrb[124].mxu1 %vm3064_vm2, %v3662_v51 }
 0x245   : > { %5824 = vmatprep.mubr.msk.bf16.mxu1 %vm6061_vm5, %v6062_v54  ;;  %5821 = vmatpush3.bf16.msra.mxu1 %v5964_v58 }
 0x246   : > { %5822 = vmatprep.subr.bf16.mxu1 %v6062_v54 }
 0x249   : > { %5823 = vmatpush3.bf16.msra.mxu1 %v5965_v10 }
 0x317   : > { %v3731_v1 = vpop.f32.mrb[124].mxu1 }
 0x318   : > { %v3732_v49 = vadd.f32 %v5064_v61, %v3731_v1  ;;  %v5819_v26 = vpop.f32.mrb[125].mxu1 }
 0x31a   : > { %v3735_v13 = vmax.f32 %v3732_v49, 0.0 }
 0x31c   : > { %v3736_v52 = vpack.c.bf16 %v3735_v13, %v3735_v13 }
 0x31e   : > { %5825 = vmatmul.mubr.msk.bf16.vlgmr.msra.gmra.mrb[128].mxu1 %vm3760_vm11, %v3736_v52 }
 0x3f1   : > { %v3798_v40 = vpop.f32.mrb[128].mxu1 }
 0x3f2   : > { %v3799_v62 = vadd.f32 %v5066_v6, %v3798_v40  ;;  %v5826_v60 = vpop.f32.mrb[129].mxu1 }
 0x3f3   : > { %v3801_v4 = vpop.f32.mrb[130].mxu1 }
 0x3f4   : > { %3805 = vst.msk [vmem:[#allocation3] sm:$0xff] %vm3804_vm12, %v3799_v62  ;;  %3806 = vst.msk [vmem:[#allocation3 + $0x8] sm:$0xff] %vm3804_vm12, %v3799_v62  ;;  %v5827_v54 = vpop.f32.mrb[131].mxu1 }
 0x3f5   : > { %3807 = vst.msk [vmem:[#allocation3 + $0x10] sm:$0xff] %vm3804_vm12, %v3799_v62  ;;  %3808 = vst.msk [vmem:[#allocation3 + $0x18] sm:$0xff] %vm3804_vm12, %v3799_v62 }
 0x3f6   : > { %3809 = vst.msk [vmem:[#allocation3 + $0x20] sm:$0xff] %vm3804_vm12, %v3799_v62  ;;  %3810 = vst.msk [vmem:[#allocation3 + $0x28] sm:$0xff] %vm3804_vm12, %v3799_v62 }
 0x3f7   : > { %3811 = vst.msk [vmem:[#allocation3 + $0x30] sm:$0xff] %vm3804_vm12, %v3799_v62  ;;  %3812 = vst.msk [vmem:[#allocation3 + $0x38] sm:$0xff] %vm3804_vm12, %v3799_v62 }
 0x3f8 PF: > { %p5070_p5 = scmp.le.s32.totalorder %s6138_s18, 0 }
 0x3f9   : > { %v5968_v17 = vld [vmem:[%s6156_s26] sm:$0xff] (!%p5070_p5)   ;;  %v5969_v2 = vld [vmem:[%s6156_s26 + $0x8] sm:$0xff] (!%p5070_p5)   ;;  %vm3852_vm13 = vcmask (!%p5070_p5), 261120   ;;  %v3819_v21 = vld [vmem:[#allocation2 + $0x10] sm:$0xff] (!%p5070_p5)  ;;  %vm3930_vm14 = vcmask (!%p5070_p5), 785408  }
 0x3fa   : > { %3816 = sbr.rel (%p5070_p5) target bundleno = 1244 (0x4dc), region = 72  ;;  %5828 = vmatprep.subr.bf16.mxu0 (!%p5070_p5), %v5968_v17  ;;  %5930 = vmatprep.subr.bf16.mxu1 (!%p5070_p5), %v5968_v17  ;;  %v3817_v3 = vld [vmem:[#allocation2] sm:$0xff] (!%p5070_p5)  ;;  %v3818_v19 = vld [vmem:[#allocation2 + $0x8] sm:$0xff] (!%p5070_p5)  ;;  %v3820_v48 = vld [vmem:[#allocation2 + $0x18] sm:$0xff] (!%p5070_p5) }
 0x3fb   : > { %v3821_v25 = vld [vmem:[#allocation2 + $0x20] sm:$0xff] (!%p5070_p5)  ;;  %5829 = vmatpush3.bf16.msra.mxu0 (!%p5070_p5), %v5968_v17  ;;  %5932 = vmatpush3.bf16.msra.mxu1 (!%p5070_p5), %v5968_v17  ;;  %v3825_v47 = vpack.c.bf16 (!%p5070_p5), %v3818_v19, %v3817_v3  ;;  %v3822_v50 = vld [vmem:[#allocation2 + $0x28] sm:$0xff] (!%p5070_p5)  ;;  %v3823_v22 = vld [vmem:[#allocation2 + $0x30] sm:$0xff] (!%p5070_p5)  ;;  %v3826_v28 = vpack.c.bf16 (!%p5070_p5), %v3820_v48, %v3819_v21 }
 0x3fc   : > { %5830 = vmatprep.subr.bf16.mxu0 (!%p5070_p5), %v5969_v2  ;;  %5931 = vmatprep.subr.bf16.mxu1 (!%p5070_p5), %v5969_v2  ;;  %v3827_v16 = vpack.c.bf16 (!%p5070_p5), %v3822_v50, %v3821_v25  ;;  %v3824_v20 = vld [vmem:[#allocation2 + $0x38] sm:$0xff] (!%p5070_p5)  ;;  %v5071_v44 = vld [vmem:[%s6151_s23] ss:$0 sm:$0xff] (!%p5070_p5) }
 0x3fd   : > { %5832 = vmatprep.mubr.msk.bf16.mxu0 (!%p5070_p5), %vm3852_vm13, %v3825_v47  ;;  %v3828_v8 = vpack.c.bf16 (!%p5070_p5), %v3824_v20, %v3823_v22 }
 0x3fe   : > { %5836 = vmatprep.mubr.msk.bf16.mxu1 (!%p5070_p5), %vm3852_vm13, %v3827_v16 }
 0x3ff   : > { %5831 = vmatpush3.bf16.msra.mxu0 (!%p5070_p5), %v5969_v2  ;;  %5933 = vmatpush3.bf16.msra.mxu1 (!%p5070_p5), %v5969_v2 }
 0x402   : > { %5833 = vmatmul.mubr.msk.bf16.vlgmr.msra.gmra.mrb[0].mxu0 %vm3852_vm13, %v3826_v28  ;;  %5837 = vmatmul.mubr.msk.bf16.vlgmr.msra.gmra.mrb[0].mxu1 %vm3852_vm13, %v3828_v8 }
 0x4d5   : > { %v5834_v38 = vpop.f32.mrb[0].mxu0  ;;  %v5838_v24 = vpop.f32.mrb[0].mxu1 }
 0x4d6   : > { %v3908_v27 = vadd.f32 %v5834_v38, %v5071_v44  ;;  %v3924_v45 = vadd.f32 %v5838_v24, %v5071_v44  ;;  %v3899_v42 = vpop.f32.mrb[1].mxu0  ;;  %v3915_v35 = vpop.f32.mrb[1].mxu1 }
 0x4d7   : > { %v3900_v37 = vadd.f32 %v5071_v44, %v3899_v42  ;;  %v3916_v11 = vadd.f32 %v5071_v44, %v3915_v35  ;;  %v5835_v31 = vpop.f32.mrb[2].mxu0  ;;  %v5839_v63 = vpop.f32.mrb[2].mxu1 }
 0x4d8   : > { %3933 = vst.msk [vmem:[#allocation3 + $0x10] sm:$0xff] %vm3930_vm14, %v3908_v27  ;;  %3937 = vst.msk [vmem:[#allocation3 + $0x30] sm:$0xff] %vm3930_vm14, %v3924_v45  ;;  %v3911_v9 = vadd.f32 %v5835_v31, %v5071_v44  ;;  %v3927_v59 = vadd.f32 %v5839_v63, %v5071_v44  ;;  %v3902_v15 = vpop.f32.mrb[3].mxu0  ;;  %v3918_v56 = vpop.f32.mrb[3].mxu1 }
 0x4d9   : > { %3931 = vst.msk [vmem:[#allocation3] sm:$0xff] %vm3930_vm14, %v3900_v37  ;;  %3935 = vst.msk [vmem:[#allocation3 + $0x20] sm:$0xff] %vm3930_vm14, %v3916_v11  ;;  %v3903_v34 = vadd.f32 %v5071_v44, %v3902_v15  ;;  %v3919_v41 = vadd.f32 %v5071_v44, %v3918_v56 }
 0x4da   : > { %3934 = vst.msk [vmem:[#allocation3 + $0x18] sm:$0xff] %vm3930_vm14, %v3911_v9  ;;  %3938 = vst.msk [vmem:[#allocation3 + $0x38] sm:$0xff] %vm3930_vm14, %v3927_v59 }
 0x4db   : > { %3932 = vst.msk [vmem:[#allocation3 + $0x8] sm:$0xff] %vm3930_vm14, %v3903_v34  ;;  %3936 = vst.msk [vmem:[#allocation3 + $0x28] sm:$0xff] %vm3930_vm14, %v3919_v41 }
 0x4dc PF: > { %v8007_v46 = vld [vmem:[%s6161_s29] sm:$0xff]   ;;  %v6063_v18 = vmov 0.0   ;;  %v8013_v39 = vld [vmem:[%s6161_s29 + $0x8] sm:$0xff]   ;;  %vm6064_vm15 = vmmov 0   ;;  %v6065_v53 = vmov 0   ;;  %s6066_s29 = smov 64  }
 0x4dd   : > { %5840 = vmatprep.subr.bf16.mxu0 %v6063_v18  ;;  %5848 = vmatprep.subr.bf16.mxu1 %v6063_v18  ;;  %v8037_v23 = vld [vmem:[%s420_s13] ss:$0 sm:$0xff]  ;;  %s6067_s19 = smov 96   ;;  %vm3963_vm0 = vcmask 261120   ;;  %p5096_p6 = scmp.ne.s32.totalorder %s6138_s18, 3 }
 0x4de   : > { %5841 = vmatpush3.bf16.msra.mxu0 %v8007_v46  ;;  %5844 = vmatprep.mubr.msk.bf16.mxu0 %vm6064_vm15, %v6063_v18  ;;  %s6068_s15 = smov (!%p5096_p6), 96  }
 0x4df   : > { %5842 = vmatprep.subr.bf16.mxu0 %v6063_v18  ;;  %5849 = vmatpush3.bf16.msra.mxu1 %v8007_v46  ;;  %v4107_v31 = vld [vmem:[#allocation3 + $0x10] sm:$0xff] }
 0x4e0   : > { %5850 = vmatprep.subr.bf16.mxu1 %v6063_v18  ;;  %5852 = vmatprep.mubr.msk.bf16.mxu1 %vm6064_vm15, %v6063_v18  ;;  %v3944_v36 = vld [vmem:[#allocation3] sm:$0xff] }
 0x4e2   : > { %5843 = vmatpush3.bf16.msra.mxu0 %v8013_v39  ;;  %v4033_v17 = vld [vmem:[#allocation3 + $0x8] sm:$0xff] }
 0x4e3   : > { %5851 = vmatpush3.bf16.msra.mxu1 %v8013_v39  ;;  %5856 = vmatprep.subr.bf16.mxu0 %v6063_v18 }
 0x4e4   : > { %5864 = vmatprep.subr.bf16.mxu1 %v6063_v18 }
 0x4e5   : > { %5845 = vmatmul.mubr.bf16.vlgmr.msra.gmra.mrb[0].mxu0 %v6065_v53 }
 0x4e6   : > { %5857 = vmatpush3.bf16.msra.mxu0 %v8007_v46  ;;  %5860 = vmatprep.mubr.msk.bf16.mxu0 %vm6064_vm15, %v6063_v18 }
 0x4e7   : > { %5858 = vmatprep.subr.bf16.mxu0 %v6063_v18 }
 0x4ea   : > { %5859 = vmatpush3.bf16.msra.mxu0 %v8013_v39 }
 0x4eb   : > { %5872 = vmatprep.subr.bf16.mxu0 %v6063_v18 }
 0x5b8   : > { %v4001_v14 = vpop.f32.mrb[0].mxu0 }
 0x5b9   : > { %v4002_v29 = vadd.f32 %v8037_v23, %v4001_v14  ;;  %v5846_v30 = vpop.f32.mrb[1].mxu0 }
 0x5ba   : > { %v4004_v7 = vpop.f32.mrb[2].mxu0 }
 0x5bb   : > { %4015 = vrot.lane.b32.xlu0 %v4002_v29, %s6066_s29  ;;  %v5847_v5 = vpop.f32.mrb[3].mxu0  ;;  %v4007_v32 = vadd.f32 %v4002_v29, %v3944_v36 }
 0x5bd   : > { %v5081_v43 = vmul.f32 -1.442695, %v4007_v32 }
 0x5bf   : > { %5972 = vpow2.f32 %v5081_v43 }
 0x5c9   : > { %v5973_v12 = vpop.eup %5972 }
 0x5ca   : > { %v4011_v33 = vadd.f32 1.0, %v5973_v12 }
 0x5cc   : > { %5974 = vrcp.f32 %v4011_v33 }
 0x5d6   : > { %v5975_v57 = vpop.eup %5974 }
 0x5d7   : > { %v4025_v61 = vsub.f32 1.0, %v5975_v57  ;;  %v4031_v49 = vmul.f32 0.0, %v5975_v57 }
 0x62d   : > { %v4016_v55 = vpop.permute.xlu0 %4015 }
 0x62e   : > { %v4018_v0 = vmul.f32 %v5975_v57, %v4016_v55 }
 0x630   : > { %4020 = vrot.lane.b32.xlu0 %v4018_v0, %s6066_s29 }
 0x6a2   : > { %v4021_v51 = vpop.permute.xlu0 %4020 }
 0x6a3   : > { %v4023_v58 = vadd.f32 %v4021_v51, %v3944_v36 }
 0x6a5   : > { %5976 = vtanh.f32 %v4023_v58  ;;  %v4181_v58 = vld [vmem:[#allocation3 + $0x18] sm:$0xff] }
 0x6af   : > { %v5977_v10 = vpop.eup %5976 }
 0x6b0   : > { %4027 = vrot.lane.b32.xlu1 %v5977_v10, %s6067_s19 }
 0x722   : > { %v4028_v1 = vpop.permute.xlu1 %4027 }
 0x723   : > { %v4030_v26 = vmul.f32 %v4028_v1, %v4025_v61 }
 0x725   : > { %v8043_v13 = vadd.f32 %v4031_v49, %v4030_v26 }
 0x727   : > { %v4034_v52 = vpack.c.bf16 %v8043_v13, %v8043_v13 }
 0x729   : > { %4036 = vrot.lane.b32.xlu1 %v4034_v52, %s6067_s19 }
 0x79b   : > { %v4037_v6 = vpop.permute.xlu1 %4036 }
 0x79c   : > { %5853 = vmatmul.mubr.msk.bf16.vlgmr.msra.gmra.mrb[0].mxu1 %vm3963_vm0, %v4037_v6 }
 0x79d   : > { %5865 = vmatpush3.bf16.msra.mxu1 %v8007_v46  ;;  %5868 = vmatprep.mubr.msk.bf16.mxu1 %vm6064_vm15, %v6063_v18 }
 0x79e   : > { %5866 = vmatprep.subr.bf16.mxu1 %v6063_v18 }
 0x7a1   : > { %5867 = vmatpush3.bf16.msra.mxu1 %v8013_v39 }
 0x7a2   : > { %5880 = vmatprep.subr.bf16.mxu1 %v6063_v18 }
 0x86f   : > { %v4075_v40 = vpop.f32.mrb[0].mxu1 }
 0x870   : > { %v4076_v62 = vadd.f32 %v8037_v23, %v4075_v40  ;;  %v5854_v60 = vpop.f32.mrb[1].mxu1 }
 0x871   : > { %v4078_v4 = vpop.f32.mrb[2].mxu1 }
 0x872   : > { %4089 = vrot.lane.b32.xlu0 %v4076_v62, %s6066_s29  ;;  %v5855_v54 = vpop.f32.mrb[3].mxu1  ;;  %v4081_v2 = vadd.f32 %v4076_v62, %v4033_v17 }
 0x874   : > { %v5083_v3 = vmul.f32 -1.442695, %v4081_v2 }
 0x876   : > { %5978 = vpow2.f32 %v5083_v3 }
 0x880   : > { %v5979_v19 = vpop.eup %5978 }
 0x881   : > { %v4085_v25 = vadd.f32 1.0, %v5979_v19 }
 0x883   : > { %5980 = vrcp.f32 %v4085_v25 }
 0x88d   : > { %v5981_v47 = vpop.eup %5980 }
 0x88e   : > { %v4099_v20 = vsub.f32 1.0, %v5981_v47  ;;  %v4105_v8 = vmul.f32 %v5981_v47, %v8043_v13 }
 0x8e4   : > { %v4090_v50 = vpop.permute.xlu0 %4089 }
 0x8e5   : > { %v4092_v21 = vmul.f32 %v5981_v47, %v4090_v50 }
 0x8e7   : > { %4094 = vrot.lane.b32.xlu1 %v4092_v21, %s6066_s29 }
 0x959   : > { %v4095_v48 = vpop.permute.xlu1 %4094 }
 0x95a   : > { %v4097_v16 = vadd.f32 %v4095_v48, %v4033_v17 }
 0x95c   : > { %5982 = vtanh.f32 %v4097_v16 }
 0x966   : > { %v5983_v22 = vpop.eup %5982 }
 0x967   : > { %4101 = vrot.lane.b32.xlu0 %v5983_v22, %s6067_s19  ;;  %v4255_v22 = vld [vmem:[#allocation3 + $0x20] sm:$0xff] }
 0x9d9   : > { %v4102_v28 = vpop.permute.xlu0 %4101 }
 0x9da   : > { %v4104_v44 = vmul.f32 %v4102_v28, %v4099_v20 }
 0x9dc   : > { %v8060_v38 = vadd.f32 %v4105_v8, %v4104_v44 }
 0x9de   : > { %v4108_v24 = vpack.c.bf16 %v8060_v38, %v8060_v38 }
 0x9e0   : > { %4110 = vrot.lane.b32.xlu1 %v4108_v24, %s6067_s19 }
 0xa52   : > { %v4111_v27 = vpop.permute.xlu1 %4110 }
 0xa53   : > { %5861 = vmatmul.mubr.msk.bf16.vlgmr.msra.gmra.mrb[4].mxu0 %vm3963_vm0, %v4111_v27 }
 0xa54   : > { %5873 = vmatpush3.bf16.msra.mxu0 %v8007_v46  ;;  %5876 = vmatprep.mubr.msk.bf16.mxu0 %vm6064_vm15, %v6063_v18 }
 0xa55   : > { %5874 = vmatprep.subr.bf16.mxu0 %v6063_v18 }
 0xa58   : > { %5875 = vmatpush3.bf16.msra.mxu0 %v8013_v39 }
 0xa59   : > { %5888 = vmatprep.subr.bf16.mxu0 %v6063_v18 }
 0xb26   : > { %v4149_v45 = vpop.f32.mrb[4].mxu0 }
 0xb27   : > { %v4150_v42 = vadd.f32 %v8037_v23, %v4149_v45  ;;  %v5862_v35 = vpop.f32.mrb[5].mxu0 }
 0xb28   : > { %v4152_v37 = vpop.f32.mrb[6].mxu0 }
 0xb29   : > { %4163 = vrot.lane.b32.xlu0 %v4150_v42, %s6066_s29  ;;  %v5863_v11 = vpop.f32.mrb[7].mxu0  ;;  %v4155_v63 = vadd.f32 %v4150_v42, %v4107_v31 }
 0xb2b   : > { %v5085_v9 = vmul.f32 -1.442695, %v4155_v63 }
 0xb2d   : > { %5984 = vpow2.f32 %v5085_v9 }
 0xb37   : > { %v5985_v59 = vpop.eup %5984 }
 0xb38   : > { %v4159_v15 = vadd.f32 1.0, %v5985_v59 }
 0xb3a   : > { %5986 = vrcp.f32 %v4159_v15 }
 0xb44   : > { %v5987_v56 = vpop.eup %5986 }
 0xb45   : > { %v4173_v30 = vsub.f32 1.0, %v5987_v56  ;;  %v4179_v5 = vmul.f32 %v5987_v56, %v8060_v38 }
 0xb9b   : > { %v4164_v34 = vpop.permute.xlu0 %4163 }
 0xb9c   : > { %v4166_v41 = vmul.f32 %v5987_v56, %v4164_v34 }
 0xb9e   : > { %4168 = vrot.lane.b32.xlu1 %v4166_v41, %s6066_s29 }
 0xc10   : > { %v4169_v53 = vpop.permute.xlu1 %4168 }
 0xc11   : > { %v4171_v14 = vadd.f32 %v4169_v53, %v4107_v31 }
 0xc13   : > { %5988 = vtanh.f32 %v4171_v14 }
 0xc1d   : > { %v5989_v29 = vpop.eup %5988 }
 0xc1e   : > { %4175 = vrot.lane.b32.xlu0 %v5989_v29, %s6067_s19 }
 0xc90   : > { %v4176_v7 = vpop.permute.xlu0 %4175 }
 0xc91   : > { %v4178_v36 = vmul.f32 %v4176_v7, %v4173_v30  ;;  %v4329_v30 = vld [vmem:[#allocation3 + $0x28] sm:$0xff] }
 0xc93   : > { %v8077_v32 = vadd.f32 %v4179_v5, %v4178_v36 }
 0xc95   : > { %v4182_v43 = vpack.c.bf16 %v8077_v32, %v8077_v32 }
 0xc97   : > { %4184 = vrot.lane.b32.xlu1 %v4182_v43, %s6067_s19 }
 0xd09   : > { %v4185_v12 = vpop.permute.xlu1 %4184 }
 0xd0a   : > { %5869 = vmatmul.mubr.msk.bf16.vlgmr.msra.gmra.mrb[4].mxu1 %vm3963_vm0, %v4185_v12 }
 0xd0b   : > { %5881 = vmatpush3.bf16.msra.mxu1 %v8007_v46  ;;  %5884 = vmatprep.mubr.msk.bf16.mxu1 %vm6064_vm15, %v6063_v18 }
 0xd0c   : > { %5882 = vmatprep.subr.bf16.mxu1 %v6063_v18 }
 0xd0f   : > { %5883 = vmatpush3.bf16.msra.mxu1 %v8013_v39 }
 0xd10   : > { %5896 = vmatprep.subr.bf16.mxu1 %v6063_v18 }
 0xddd   : > { %v4223_v33 = vpop.f32.mrb[4].mxu1 }
 0xdde   : > { %v4224_v57 = vadd.f32 %v8037_v23, %v4223_v33  ;;  %v5870_v55 = vpop.f32.mrb[5].mxu1 }
 0xddf   : > { %v4226_v0 = vpop.f32.mrb[6].mxu1 }
 0xde0   : > { %4237 = vrot.lane.b32.xlu0 %v4224_v57, %s6066_s29  ;;  %v5871_v51 = vpop.f32.mrb[7].mxu1  ;;  %v4229_v10 = vadd.f32 %v4224_v57, %v4181_v58 }
 0xde2   : > { %v5087_v61 = vmul.f32 -1.442695, %v4229_v10 }
 0xde4   : > { %5990 = vpow2.f32 %v5087_v61 }
 0xdee   : > { %v5991_v1 = vpop.eup %5990 }
 0xdef   : > { %v4233_v49 = vadd.f32 1.0, %v5991_v1 }
 0xdf1   : > { %5992 = vrcp.f32 %v4233_v49 }
 0xdfb   : > { %v5993_v26 = vpop.eup %5992 }
 0xdfc   : > { %v4247_v4 = vsub.f32 1.0, %v5993_v26  ;;  %v4253_v17 = vmul.f32 %v5993_v26, %v8077_v32 }
 0xe52   : > { %v4238_v52 = vpop.permute.xlu0 %4237 }
 0xe53   : > { %v4240_v6 = vmul.f32 %v5993_v26, %v4238_v52 }
 0xe55   : > { %4242 = vrot.lane.b32.xlu1 %v4240_v6, %s6066_s29 }
 0xec7   : > { %v4243_v40 = vpop.permute.xlu1 %4242 }
 0xec8   : > { %v4245_v62 = vadd.f32 %v4243_v40, %v4181_v58 }
 0xeca   : > { %5994 = vtanh.f32 %v4245_v62  ;;  %v4403_v62 = vld [vmem:[#allocation3 + $0x30] sm:$0xff] }
 0xed4   : > { %v5995_v60 = vpop.eup %5994 }
 0xed5   : > { %4249 = vrot.lane.b32.xlu0 %v5995_v60, %s6067_s19 }
 0xf47   : > { %v4250_v54 = vpop.permute.xlu0 %4249 }
 0xf48   : > { %v4252_v2 = vmul.f32 %v4250_v54, %v4247_v4 }
 0xf4a   : > { %v8094_v3 = vadd.f32 %v4253_v17, %v4252_v2 }
 0xf4c   : > { %v4256_v19 = vpack.c.bf16 %v8094_v3, %v8094_v3 }
 0xf4e   : > { %4258 = vrot.lane.b32.xlu1 %v4256_v19, %s6067_s19 }
 0xfc0   : > { %v4259_v25 = vpop.permute.xlu1 %4258 }
 0xfc1   : > { %5877 = vmatmul.mubr.msk.bf16.vlgmr.msra.gmra.mrb[8].mxu0 %vm3963_vm0, %v4259_v25 }
 0xfc2   : > { %5889 = vmatpush3.bf16.msra.mxu0 %v8007_v46  ;;  %5892 = vmatprep.mubr.msk.bf16.mxu0 %vm6064_vm15, %v6063_v18 }
 0xfc3   : > { %5890 = vmatprep.subr.bf16.mxu0 %v6063_v18 }
 0xfc6   : > { %5891 = vmatpush3.bf16.msra.mxu0 %v8013_v39 }
0x1094   : > { %v4297_v47 = vpop.f32.mrb[8].mxu0 }
0x1095   : > { %v4298_v50 = vadd.f32 %v8037_v23, %v4297_v47  ;;  %v5878_v21 = vpop.f32.mrb[9].mxu0 }
0x1096   : > { %v4300_v48 = vpop.f32.mrb[10].mxu0 }
0x1097   : > { %4311 = vrot.lane.b32.xlu0 %v4298_v50, %s6066_s29  ;;  %v5879_v16 = vpop.f32.mrb[11].mxu0  ;;  %v4303_v20 = vadd.f32 %v4298_v50, %v4255_v22 }
0x1099   : > { %v5089_v28 = vmul.f32 -1.442695, %v4303_v20 }
0x109b   : > { %5996 = vpow2.f32 %v5089_v28 }
0x10a5   : > { %v5997_v8 = vpop.eup %5996 }
0x10a6   : > { %v4307_v44 = vadd.f32 1.0, %v5997_v8 }
0x10a8   : > { %5998 = vrcp.f32 %v4307_v44 }
0x10b2   : > { %v5999_v24 = vpop.eup %5998 }
0x10b3   : > { %v4321_v11 = vsub.f32 1.0, %v5999_v24  ;;  %v4327_v63 = vmul.f32 %v5999_v24, %v8094_v3 }
0x1109   : > { %v4312_v27 = vpop.permute.xlu0 %4311 }
0x110a   : > { %v4314_v45 = vmul.f32 %v5999_v24, %v4312_v27 }
0x110c   : > { %4316 = vrot.lane.b32.xlu1 %v4314_v45, %s6066_s29 }
0x117e   : > { %v4317_v42 = vpop.permute.xlu1 %4316 }
0x117f   : > { %v4319_v35 = vadd.f32 %v4317_v42, %v4255_v22 }
0x1181   : > { %6000 = vtanh.f32 %v4319_v35 }
0x118b   : > { %v6001_v37 = vpop.eup %6000 }
0x118c   : > { %4323 = vrot.lane.b32.xlu0 %v6001_v37, %s6067_s19  ;;  %v4477_v37 = vld [vmem:[#allocation3 + $0x38] sm:$0xff] }
0x11fe   : > { %v4324_v31 = vpop.permute.xlu0 %4323 }
0x11ff   : > { %v4326_v9 = vmul.f32 %v4324_v31, %v4321_v11 }
0x1201   : > { %v8110_v59 = vadd.f32 %v4327_v63, %v4326_v9 }
0x1203   : > { %v4330_v15 = vpack.c.bf16 %v8110_v59, %v8110_v59 }
0x1205   : > { %4332 = vrot.lane.b32.xlu1 %v4330_v15, %s6067_s19 }
0x1277   : > { %v4333_v56 = vpop.permute.xlu1 %4332 }
0x1278   : > { %5885 = vmatmul.mubr.msk.bf16.vlgmr.msra.gmra.mrb[8].mxu1 %vm3963_vm0, %v4333_v56 }
0x1279   : > { %5897 = vmatpush3.bf16.msra.mxu1 %v8007_v46  ;;  %5900 = vmatprep.mubr.msk.bf16.mxu1 %vm6064_vm15, %v6063_v18 }
0x127a   : > { %5898 = vmatprep.subr.bf16.mxu1 %v6063_v18 }
0x127d   : > { %5899 = vmatpush3.bf16.msra.mxu1 %v8013_v39 }
0x134b   : > { %v4371_v34 = vpop.f32.mrb[8].mxu1 }
0x134c   : > { %v4372_v41 = vadd.f32 %v8037_v23, %v4371_v34  ;;  %v5886_v53 = vpop.f32.mrb[9].mxu1 }
0x134d   : > { %v4374_v14 = vpop.f32.mrb[10].mxu1 }
0x134e   : > { %4385 = vrot.lane.b32.xlu0 %v4372_v41, %s6066_s29  ;;  %v5887_v29 = vpop.f32.mrb[11].mxu1  ;;  %v4377_v7 = vadd.f32 %v4372_v41, %v4329_v30 }
0x1350   : > { %v5091_v5 = vmul.f32 -1.442695, %v4377_v7 }
0x1352   : > { %6002 = vpow2.f32 %v5091_v5 }
0x135c   : > { %v6003_v46 = vpop.eup %6002 }
0x135d   : > { %v4381_v36 = vadd.f32 1.0, %v6003_v46 }
0x135f   : > { %6004 = vrcp.f32 %v4381_v36 }
0x1369   : > { %v6005_v43 = vpop.eup %6004 }
0x136a   : > { %v4395_v55 = vsub.f32 1.0, %v6005_v43  ;;  %v4401_v51 = vmul.f32 %v6005_v43, %v8110_v59 }
0x13c0   : > { %v4386_v12 = vpop.permute.xlu0 %4385 }
0x13c1   : > { %v4388_v18 = vmul.f32 %v6005_v43, %v4386_v12 }
0x13c3   : > { %4390 = vrot.lane.b32.xlu1 %v4388_v18, %s6066_s29 }
0x1435   : > { %v4391_v39 = vpop.permute.xlu1 %4390 }
0x1436   : > { %v4393_v33 = vadd.f32 %v4391_v39, %v4329_v30 }
0x1438   : > { %6006 = vtanh.f32 %v4393_v33 }
0x1442   : > { %v6007_v57 = vpop.eup %6006 }
0x1443   : > { %4397 = vrot.lane.b32.xlu0 %v6007_v57, %s6067_s19 }
0x14b5   : > { %v4398_v0 = vpop.permute.xlu0 %4397 }
0x14b6   : > { %v4400_v58 = vmul.f32 %v4398_v0, %v4395_v55  ;;  %v4595_v55 = vpack.c.bf16 (!%p5096_p6), %v8060_v38, %v8043_v13  ;;  %v4596_v0 = vpack.c.bf16 (!%p5096_p6), %v8094_v3, %v8077_v32 }
0x14b8   : > { %v8126_v10 = vadd.f32 %v4401_v51, %v4400_v58  ;;  %v6020_v51 = vld [vmem:[%s8227_s9] sm:$0xff] (!%p5096_p6)   ;;  %v6021_v58 = vld [vmem:[%s8227_s9 + $0x8] sm:$0xff] (!%p5096_p6)  }
0x14b9   : > { %5904 = vmatprep.subr.bf16.mxu0 (!%p5096_p6), %v6020_v51  ;;  %5934 = vmatprep.subr.bf16.mxu1 (!%p5096_p6), %v6020_v51 }
0x14ba   : > { %v4404_v61 = vpack.c.bf16 %v8126_v10, %v8126_v10 }
0x14bc   : > { %4406 = vrot.lane.b32.xlu1 %v4404_v61, %s6067_s19  ;;  %v4597_v61 = vpack.c.bf16 (!%p5096_p6), %v8126_v10, %v8110_v59 }
0x152e   : > { %v4407_v1 = vpop.permute.xlu1 %4406 }
0x152f   : > { %5893 = vmatmul.mubr.msk.bf16.vlgmr.msra.gmra.mrb[12].mxu0 %vm3963_vm0, %v4407_v1 }
0x1530   : > { %5905 = vmatpush3.bf16.msra.mxu0 (!%p5096_p6), %v6020_v51 }
0x1531   : > { %5906 = vmatprep.subr.bf16.mxu0 (!%p5096_p6), %v6021_v58 }
0x1534   : > { %5907 = vmatpush3.bf16.msra.mxu0 (!%p5096_p6), %v6021_v58 }
0x1602   : > { %v4445_v49 = vpop.f32.mrb[12].mxu0 }
0x1603   : > { %v4446_v26 = vadd.f32 %v8037_v23, %v4445_v49  ;;  %v5894_v52 = vpop.f32.mrb[13].mxu0 }
0x1604   : > { %v4448_v6 = vpop.f32.mrb[14].mxu0 }
0x1605   : > { %4459 = vrot.lane.b32.xlu0 %v4446_v26, %s6066_s29  ;;  %v5895_v40 = vpop.f32.mrb[15].mxu0  ;;  %v4451_v60 = vadd.f32 %v4446_v26, %v4403_v62 }
0x1607   : > { %v5093_v4 = vmul.f32 -1.442695, %v4451_v60 }
0x1609   : > { %6008 = vpow2.f32 %v5093_v4 }
0x1613   : > { %v6009_v54 = vpop.eup %6008 }
0x1614   : > { %v4455_v17 = vadd.f32 1.0, %v6009_v54 }
0x1616   : > { %6010 = vrcp.f32 %v4455_v17 }
0x1620   : > { %v6011_v2 = vpop.eup %6010 }
0x1621   : > { %v4469_v48 = vsub.f32 1.0, %v6011_v2  ;;  %v4475_v22 = vmul.f32 %v6011_v2, %v8126_v10 }
0x1677   : > { %v4460_v19 = vpop.permute.xlu0 %4459 }
0x1678   : > { %v4462_v25 = vmul.f32 %v6011_v2, %v4460_v19 }
0x167a   : > { %4464 = vrot.lane.b32.xlu1 %v4462_v25, %s6066_s29 }
0x16ec   : > { %v4465_v47 = vpop.permute.xlu1 %4464 }
0x16ed   : > { %v4467_v50 = vadd.f32 %v4465_v47, %v4403_v62 }
0x16ef   : > { %6012 = vtanh.f32 %v4467_v50 }
0x16f9   : > { %v6013_v21 = vpop.eup %6012 }
0x16fa   : > { %4471 = vrot.lane.b32.xlu0 %v6013_v21, %s6067_s19 }
0x176c   : > { %v4472_v16 = vpop.permute.xlu0 %4471 }
0x176d   : > { %v4474_v20 = vmul.f32 %v4472_v16, %v4469_v48 }
0x176f   : > { %v8137_v28 = vadd.f32 %v4475_v22, %v4474_v20 }
0x1771   : > { %v4478_v8 = vpack.c.bf16 %v8137_v28, %v8137_v28 }
0x1773   : > { %4480 = vrot.lane.b32.xlu1 %v4478_v8, %s6067_s19 }
0x17e5   : > { %v4481_v44 = vpop.permute.xlu1 %4480 }
0x17e6   : > { %5901 = vmatmul.mubr.msk.bf16.vlgmr.msra.gmra.mrb[12].mxu1 %vm3963_vm0, %v4481_v44 }
0x17e7   : > { %5936 = vmatpush3.bf16.msra.mxu1 (!%p5096_p6), %v6020_v51 }
0x17e8   : > { %5935 = vmatprep.subr.bf16.mxu1 (!%p5096_p6), %v6021_v58 }
0x17eb   : > { %5937 = vmatpush3.bf16.msra.mxu1 (!%p5096_p6), %v6021_v58 }
0x18b9   : > { %v4519_v24 = vpop.f32.mrb[12].mxu1 }
0x18ba   : > { %v4520_v27 = vadd.f32 %v8037_v23, %v4519_v24  ;;  %v5902_v45 = vpop.f32.mrb[13].mxu1 }
0x18bb   : > { %v4522_v42 = vpop.f32.mrb[14].mxu1 }
0x18bc   : > { %4533 = vrot.lane.b32.xlu0 %v4520_v27, %s6066_s29  ;;  %v5903_v35 = vpop.f32.mrb[15].mxu1  ;;  %v4525_v11 = vadd.f32 %v4520_v27, %v4477_v37 }
0x18be   : > { %v5095_v31 = vmul.f32 -1.442695, %v4525_v11 }
0x18c0   : > { %6014 = vpow2.f32 %v5095_v31 }
0x18ca   : > { %v6015_v63 = vpop.eup %6014 }
0x18cb   : > { %v4529_v9 = vadd.f32 1.0, %v6015_v63 }
0x18cd   : > { %6016 = vrcp.f32 %v4529_v9 }
0x18d7   : > { %v6017_v15 = vpop.eup %6016 }
0x18d8   : > { %v4543_v5 = vsub.f32 1.0, %v6017_v15  ;;  %v4549_v36 = vmul.f32 %v6017_v15, %v8137_v28 }
0x192e   : > { %v4534_v56 = vpop.permute.xlu0 %4533 }
0x192f   : > { %v4536_v34 = vmul.f32 %v6017_v15, %v4534_v56 }
0x1931   : > { %4538 = vrot.lane.b32.xlu1 %v4536_v34, %s6066_s29 }
0x1935   : > { %4559 = vrot.lane.b32.xlu1 %v8043_v13, %s6067_s19 }
0x1939   : > { %4563 = vrot.lane.b32.xlu1 %v8077_v32, %s6067_s19 }
0x193d   : > { %4567 = vrot.lane.b32.xlu1 %v8110_v59, %s6067_s19  ;;  %v5097_v59 = vld [vmem:[%s8228_s10] ss:$0 sm:$0xff] (!%p5096_p6) }
0x1941   : > { %4571 = vrot.lane.b32.xlu1 %v8137_v28, %s6067_s19 }
0x1945   : > { %4616 = vrot.lane.b32.xlu1 (!%p5096_p6), %v4596_v0, %s6068_s15 }
0x19a3   : > { %v4539_v23 = vpop.permute.xlu1 %4538 }
0x19a4   : > { %v4541_v41 = vadd.f32 %v4539_v23, %v4477_v37 }
0x19a6   : > { %6018 = vtanh.f32 %v4541_v41 }
0x19a7   : > { %v4560_v53 = vpop.permute.xlu1 %4559 }
0x19a8   : > { %4583 = vst.msk [vmem:[#allocation2] sm:$0xff] %vm3963_vm0, %v4560_v53 }
0x19ab   : > { %v4564_v14 = vpop.permute.xlu1 %4563 }
0x19ac   : > { %4585 = vst.msk [vmem:[#allocation2 + $0x10] sm:$0xff] %vm3963_vm0, %v4564_v14 }
0x19af   : > { %v4568_v29 = vpop.permute.xlu1 %4567 }
0x19b0   : > { %v6019_v30 = vpop.eup %6018  ;;  %4587 = vst.msk [vmem:[#allocation2 + $0x20] sm:$0xff] %vm3963_vm0, %v4568_v29 }
0x19b1   : > { %4545 = vrot.lane.b32.xlu0 %v6019_v30, %s6067_s19 }
0x19b3   : > { %v4572_v7 = vpop.permute.xlu1 %4571 }
0x19b4   : > { %4589 = vst.msk [vmem:[#allocation2 + $0x30] sm:$0xff] %vm3963_vm0, %v4572_v7 }
0x19b5   : > { %4561 = vrot.lane.b32.xlu0 %v8060_v38, %s6067_s19 }
0x19b7   : > { %v4617_v38 = vpop.permute.xlu1 (!%p5096_p6), %4616 }
0x19b9   : > { %4565 = vrot.lane.b32.xlu0 %v8094_v3, %s6067_s19 }
0x19bd   : > { %4569 = vrot.lane.b32.xlu0 %v8126_v10, %s6067_s19 }
0x1a23   : > { %v4546_v46 = vpop.permute.xlu0 %4545 }
0x1a24   : > { %v4548_v43 = vmul.f32 %v4546_v46, %v4543_v5 }
0x1a26   : > { %v4550_v12 = vadd.f32 %v4549_v36, %v4548_v43 }
0x1a27   : > { %v4562_v18 = vpop.permute.xlu0 %4561 }
0x1a28   : > { %4584 = vst.msk [vmem:[#allocation2 + $0x8] sm:$0xff] %vm3963_vm0, %v4562_v18  ;;  %4573 = vrot.lane.b32.xlu0 %v4550_v12, %s6067_s19  ;;  %v4598_v1 = vpack.c.bf16 (!%p5096_p6), %v4550_v12, %v8137_v28 }
0x1a2a   : > { %4620 = vrot.lane.b32.xlu1 (!%p5096_p6), %v4598_v1, %s6068_s15 }
0x1a2b   : > { %v4566_v39 = vpop.permute.xlu0 %4565 }
0x1a2c   : > { %4586 = vst.msk [vmem:[#allocation2 + $0x18] sm:$0xff] %vm3963_vm0, %v4566_v39  ;;  %4614 = vrot.lane.b32.xlu0 (!%p5096_p6), %v4595_v55, %s6068_s15 }
0x1a2f   : > { %v4570_v33 = vpop.permute.xlu0 %4569 }
0x1a30   : > { %4588 = vst.msk [vmem:[#allocation2 + $0x28] sm:$0xff] %vm3963_vm0, %v4570_v33  ;;  %4618 = vrot.lane.b32.xlu0 (!%p5096_p6), %v4597_v61, %s6068_s15 }
0x1a95   : > { %4594 = sbr.rel (%p5096_p6) target bundleno = 7038 (0x1b7e), region = 76 }
0x1a9a   : > { %v4574_v57 = vpop.permute.xlu0 %4573 }
0x1a9b   : > { %4590 = vst.msk [vmem:[#allocation2 + $0x38] sm:$0xff] %vm3963_vm0, %v4574_v57 }
0x1a9c   : > { %v4621_v3 = vpop.permute.xlu1 %4620 }
0x1a9e   : > { %v4615_v13 = vpop.permute.xlu0 %4614 }
0x1a9f   : > { %5908 = vmatprep.mubr.msk.bf16.mxu0 %vm3963_vm0, %v4615_v13 }
0x1aa0   : > { %5909 = vmatmul.mubr.msk.bf16.vlgmr.msra.gmra.mrb[0].mxu0 %vm3963_vm0, %v4617_v38 }
0x1aa2   : > { %v4619_v32 = vpop.permute.xlu0 %4618 }
0x1aa3   : > { %5912 = vmatprep.mubr.msk.bf16.mxu1 %vm3963_vm0, %v4619_v32 }
0x1aa4   : > { %5913 = vmatmul.mubr.msk.bf16.vlgmr.msra.gmra.mrb[0].mxu1 %vm3963_vm0, %v4621_v3 }
0x1b73   : > { %v5910_v10 = vpop.f32.mrb[0].mxu0 }
0x1b74   : > { %v4689_v49 = vadd.f32 %v5910_v10, %v5097_v59  ;;  %v4680_v26 = vpop.f32.mrb[1].mxu0 }
0x1b75   : > { %v4681_v52 = vadd.f32 %v5097_v59, %v4680_v26  ;;  %v5911_v6 = vpop.f32.mrb[2].mxu0 }
0x1b76   : > { %4713 = vst [vmem:[#allocation4 + $0x10] sm:$0xff] %v4689_v49  ;;  %v4692_v40 = vadd.f32 %v5911_v6, %v5097_v59  ;;  %v4683_v62 = vpop.f32.mrb[3].mxu0 }
0x1b77   : > { %4711 = vst [vmem:[#allocation4] sm:$0xff] %v4681_v52  ;;  %v4684_v60 = vadd.f32 %v5097_v59, %v4683_v62  ;;  %v5914_v4 = vpop.f32.mrb[0].mxu1 }
0x1b78   : > { %4714 = vst [vmem:[#allocation4 + $0x18] sm:$0xff] %v4692_v40  ;;  %v4705_v54 = vadd.f32 %v5914_v4, %v5097_v59  ;;  %v4696_v17 = vpop.f32.mrb[1].mxu1 }
0x1b79   : > { %4712 = vst [vmem:[#allocation4 + $0x8] sm:$0xff] %v4684_v60  ;;  %v4697_v2 = vadd.f32 %v5097_v59, %v4696_v17  ;;  %v5915_v19 = vpop.f32.mrb[2].mxu1 }
0x1b7a   : > { %4717 = vst [vmem:[#allocation4 + $0x30] sm:$0xff] %v4705_v54  ;;  %v4708_v25 = vadd.f32 %v5915_v19, %v5097_v59  ;;  %v4699_v47 = vpop.f32.mrb[3].mxu1 }
0x1b7b   : > { %4715 = vst [vmem:[#allocation4 + $0x20] sm:$0xff] %v4697_v2  ;;  %v4700_v50 = vadd.f32 %v5097_v59, %v4699_v47 }
0x1b7c   : > { %4718 = vst [vmem:[#allocation4 + $0x38] sm:$0xff] %v4708_v25 }
0x1b7d   : > { %4716 = vst [vmem:[#allocation4 + $0x28] sm:$0xff] %v4700_v50 }
0x1b7e PF: > { %p5942_p7 = scmp.eq.s32.totalorder %s6138_s18, 3  ;;  %s6069_s22 = smov [#allocation4]  }
0x1b7f   : > { %s4725_s20 = sshll.u32 %s6069_s22, 4  ;;  %s4726_s20 = int_to_ptr.vmem [resolvable:$true] %s4725_s20 }
0x1b80   : > { %s6022_s24 = scalar_lea.vmem %s4726_s20, 1024  ;;  %p6029_p11 = scmp.lt.s32.totalorder %s4726_s20, %s4726_s20 }
0x1b81   : > { %p6023_p8 = scmp.ne.s32.totalorder %s4726_s20, %s6022_s24  ;;  %p6030_p12 = scmp.lt.s32.totalorder %s6022_s24, %s6022_s24 }
0x1b83   : > { %p6024_p9 = pnand %p6023_p8, %p5942_p7  ;;  %p6031_p13 = por %p6030_p12, %p6029_p11 }
0x1b85   : > { %p6025_p10 = pneg %p6024_p9 }
0x1b87   : > { %p6032_p0 = pnand %p6031_p13, %p6025_p10 }
0x1b89   : > { %6035 = shalt.err (!%p6032_p0)
}
0x1b8a   : > { %s6036_s28 = scalar_lea.hbm %s8229_s11, 1024 }
0x1b8b   : > { %p6037_p1 = scmp.ne.s32.totalorder %s8229_s11, %s6036_s28  ;;  %p6042_p4 = scmp.lt.u32.totalorder %s6036_s28, %s8229_s11 }
0x1b8d   : > { %p6038_p2 = pnand %p6037_p1, %p5942_p7 }
0x1b8f   : > { %p6039_p3 = pneg %p6038_p2 }
0x1b91   : > { %p6044_p5 = pnand %p6042_p4, %p6039_p3 }
0x1b93   : > { %6047 = shalt.err (!%p6044_p5)
}
0x1b94   : > { %s6070_s13 = smov 128   ;;  %s6071_s30 = smov 8  }
0x1b95   : > { %5939 = dma.vmem_to_hbm [thread:$0]  (%p5942_p7), %s4726_s20, 1024, %s8229_s11, [#allocation5], %s6070_s13, %s6070_s13, %s6071_s30  }
0x1b96   : > { %6053 = dma.done.wait (%p5942_p7), [#allocation5], 1024  }
0x1b97   : > { %6055 = vsyncadd (%p5942_p7), [#allocation5], 4294966272 }
0x1b98 PF: > { %s22_s17 = sadd.s32 1, %s6058_s17  }
0x1b99   : > { %p19_p6 = scmp.ge.s32.totalorder %s22_s17, 6  }
0x1b9b   :  { %21 = sbr.rel (!%p19_p6) target bundleno = 1 (0x1), region = 112 }
0x1ba2   :  { %4741 = vsyncpa [#allocation5], 1 }
0x1ba3   :  { %4743 = vsyncpa [#allocation5 + $0x1], 1 }

</bundles_post_ra>
